<compile_context>
chip_gen: v6e
topology: v6e:2x2x1
jax: 0.10.0
libtpu: 0.0.40
codegen_flags: <defaults>
</compile_context>

<pallas_src>
import functools

import jax
import jax.numpy as jnp
from jax.experimental import pallas as pl
from jax.experimental.pallas import tpu as pltpu

DIM_Z = 128
H1, H2, H3 = 256, 512, 1024
OUT_CHANNELS = 1
OUT_DIM = OUT_CHANNELS * 32 * 32  # 1024

TB_MAX = 256  # max batch tile: fills the 256-tall MXU on v6e/v7x


def _round_up(x, m):
    return ((x + m - 1) // m) * m


def _num_tensorcores():
    """v7x exposes 2 TensorCores per chip; v5e/v6e have 1."""
    try:
        kind = jax.devices()[0].device_kind.lower()
    except Exception:
        return 1
    return 2 if "v7" in kind else 1


def _batch_tiling(batch, num_cores):
    """Pick (batch_tile, n_grid_steps).

    No host-side padding: grid = cdiv(batch, tb); Pallas masks the ragged last
    block's out-of-range rows on store (per-row computation is independent).
    """
    # On multi-TC chips split the batch axis across cores only once each core
    # gets >=128 rows of work; below that the duplicated ~3.5 MB per-core
    # weight fetch outweighs the parallelism.
    want_split = num_cores > 1 and batch >= 128 * num_cores
    if batch <= TB_MAX and not want_split:
        # One tile covering the whole (possibly tiny / unaligned) batch — a
        # block dim equal to the full array dim is always a legal block shape.
        return batch, 1
    n_tiles = max(num_cores if want_split else 1, pl.cdiv(batch, TB_MAX))
    if want_split:
        n_tiles = _round_up(n_tiles, num_cores)  # even split across the cores
    # Round the tile to 16 rows so the second-minor dim stays sublane/packing
    # aligned for both f32 and bf16 outputs, without padding the batch itself.
    tb = min(TB_MAX, _round_up(pl.cdiv(batch, n_tiles), 16))
    return tb, pl.cdiv(batch, tb)


def _generator_kernel(z_ref,
                      w1_ref, b1_ref,
                      w2_ref, b2_ref,
                      w3_ref, b3_ref,
                      w4_ref, b4_ref,
                      out_ref):
    bf16 = jnp.bfloat16
    # Linear(128 -> 256) + ReLU   (bf16 MXU operands, f32 accumulate)
    h = jnp.dot(z_ref[...].astype(bf16), w1_ref[...],
                preferred_element_type=jnp.float32)
    h = jnp.maximum(h + b1_ref[...], 0.0)
    # Linear(256 -> 512) + ReLU
    h = jnp.dot(h.astype(bf16), w2_ref[...],
                preferred_element_type=jnp.float32)
    h = jnp.maximum(h + b2_ref[...], 0.0)
    # Linear(512 -> 1024) + ReLU
    h = jnp.dot(h.astype(bf16), w3_ref[...],
                preferred_element_type=jnp.float32)
    h = jnp.maximum(h + b3_ref[...], 0.0)
    # Linear(1024 -> 1024) + Tanh
    h = jnp.dot(h.astype(bf16), w4_ref[...],
                preferred_element_type=jnp.float32)
    out_ref[...] = jnp.tanh(h + b4_ref[...]).astype(out_ref.dtype)


def init_generator_params(key):
    """Deterministic PyTorch-style init: U(-1/sqrt(fan_in), 1/sqrt(fan_in)), f32."""
    dims = [(DIM_Z, H1), (H1, H2), (H2, H3), (H3, OUT_DIM)]
    params = []
    for (fan_in, fan_out) in dims:
        key, kw, kb = jax.random.split(key, 3)
        bound = 1.0 / jnp.sqrt(jnp.float32(fan_in))
        w = jax.random.uniform(kw, (fan_in, fan_out), jnp.float32, -bound, bound)
        b = jax.random.uniform(kb, (1, fan_out), jnp.float32, -bound, bound)
        params.append((w, b))
    return params


def prepare_generator_params(params):
    """One-time cast of weights to bf16 (the MXU operand dtype); biases stay f32.

    Call this ONCE, outside the per-step/per-call path, so the f32->bf16
    convert (and its HBM traffic) is not re-executed on every forward.
    """
    return tuple((w.astype(jnp.bfloat16), b.astype(jnp.float32))
                 for (w, b) in params)


@functools.partial(jax.jit, static_argnames=("out_dtype",))
def generator_forward(z, params, out_dtype=jnp.float32):
    (w1, b1), (w2, b2), (w3, b3), (w4, b4) = params
    B = z.shape[0]

    num_cores = _num_tensorcores()
    tb, n_tiles = _batch_tiling(B, num_cores)

    # Constant-index, fetched-once blocks: single-buffered so the resident
    # weights are not duplicated in VMEM.
    def const_spec(shape):
        return pl.BlockSpec(shape, lambda i: (0, 0), pipeline_mode=pl.Buffered(1))

    if num_cores > 1 and n_tiles >= num_cores and n_tiles % num_cores == 0:
        # v7x: actually shard the batch tiles across the two TensorCores.
        batch_sem = pltpu.CORE_PARALLEL
    else:
        batch_sem = "parallel"

    out = pl.pallas_call(
        _generator_kernel,
        out_shape=jax.ShapeDtypeStruct((B, OUT_DIM), out_dtype),
        grid_spec=pltpu.PrefetchScalarGridSpec(
            num_scalar_prefetch=0,
            grid=(n_tiles,),
            in_specs=[
                pl.BlockSpec((tb, DIM_Z), lambda i: (i, 0)),
                const_spec((DIM_Z, H1)), const_spec((1, H1)),
                const_spec((H1, H2)), const_spec((1, H2)),
                const_spec((H2, H3)), const_spec((1, H3)),
                const_spec((H3, OUT_DIM)), const_spec((1, OUT_DIM)),
            ],
            out_specs=pl.BlockSpec((tb, OUT_DIM), lambda i: (i, 0)),
        ),
        compiler_params=pltpu.CompilerParams(
            dimension_semantics=(batch_sem,),
            # ~3.5 MiB bf16 weights (single-buffered) + double-buffered z/out
            # tiles + activation scratch << 32 MiB; fits v5e/v6e/v7x alike.
            vmem_limit_bytes=32 << 20,
        ),
    )(z, w1, b1, w2, b2, w3, b3, w4, b4)

    # Matches PyTorch: img.view(B, 1, 32, 32)  (NCHW)
    return out.reshape(B, 1, 32, 32)


def _reference_forward(z, params_f32):
    """Pure-JAX reference in matching precision (bf16 matmuls, f32 accumulate)."""
    (w1, b1), (w2, b2), (w3, b3), (w4, b4) = params_f32
    bf16 = jnp.bfloat16

    def dot(x, w):
        return jnp.dot(x.astype(bf16), w.astype(bf16),
                       preferred_element_type=jnp.float32)

    h = jnp.maximum(dot(z, w1) + b1, 0.0)
    h = jnp.maximum(dot(h, w2) + b2, 0.0)
    h = jnp.maximum(dot(h, w3) + b3, 0.0)
    h = jnp.tanh(dot(h, w4) + b4)
    return h.reshape(z.shape[0], 1, 32, 32)


if __name__ == "__main__":
    key = jax.random.PRNGKey(0)
    key_p, key_z1, key_z2 = jax.random.split(key, 3)

    params_f32 = init_generator_params(key_p)
    # One-time bf16 weight cast, hoisted out of the jitted forward.
    params = prepare_generator_params(params_f32)

    # Small demo batch: single full-batch tile, grid of 1, no padding.
    batch = 2
    z = jax.random.normal(key_z1, (batch, DIM_Z), dtype=jnp.float32)
    img = jax.block_until_ready(generator_forward(z, params))
    ref = _reference_forward(z, params_f32)
    assert img.shape == (batch, 1, 32, 32), img.shape
    assert jnp.allclose(img, ref, atol=2e-2, rtol=2e-2), "mismatch vs reference (B=2)"

    # Larger batch: multi-tile grid with a ragged last block (no pad, no slice).
    batch2 = 300
    z2 = jax.random.normal(key_z2, (batch2, DIM_Z), dtype=jnp.float32)
    img2 = jax.block_until_ready(generator_forward(z2, params))
    ref2 = _reference_forward(z2, params_f32)
    assert img2.shape == (batch2, 1, 32, 32), img2.shape
    assert jnp.allclose(img2, ref2, atol=2e-2, rtol=2e-2), "mismatch vs reference (B=300)"

    # bf16-output variant: halves the HBM writeback (v6e/v5e win), same kernel.
    img3 = jax.block_until_ready(
        generator_forward(z2, params, out_dtype=jnp.bfloat16))
    assert img3.dtype == jnp.bfloat16
    assert jnp.allclose(img3.astype(jnp.float32), ref2, atol=2e-2, rtol=2e-2), \
        "mismatch vs reference (bf16 output)"

    print("KERNEL_OK")
</pallas_src>

<mosaic_0001>
module attributes {stable_mosaic.version = 11 : i64} {
  func.func @_generator_kernel(%arg0: i32, %arg1: memref<2x128xf32, #tpu.memory_space<vmem>>, %arg2: memref<128x256xbf16, #tpu.memory_space<vmem>>, %arg3: memref<1x256xf32, #tpu.memory_space<vmem>>, %arg4: memref<256x512xbf16, #tpu.memory_space<vmem>>, %arg5: memref<1x512xf32, #tpu.memory_space<vmem>>, %arg6: memref<512x1024xbf16, #tpu.memory_space<vmem>>, %arg7: memref<1x1024xf32, #tpu.memory_space<vmem>>, %arg8: memref<1024x1024xbf16, #tpu.memory_space<vmem>>, %arg9: memref<1x1024xf32, #tpu.memory_space<vmem>>, %arg10: memref<2x1024xf32, #tpu.memory_space<vmem>>) attributes {dimension_semantics = [#tpu.dimension_semantics<parallel>], iteration_bounds = array<i64: 1>, scalar_prefetch = 0 : i64, scratch_operands = 0 : i64, tpu.core_type = #tpu.core_type<tc>, window_params = [{transform_indices = @transform_0, window_bounds = array<i64: 2, 128>}, {pipeline_mode = #tpu.pipeline_mode<synchronous>, transform_indices = @transform_1, window_bounds = array<i64: 128, 256>}, {pipeline_mode = #tpu.pipeline_mode<synchronous>, transform_indices = @transform_2, window_bounds = array<i64: 1, 256>}, {pipeline_mode = #tpu.pipeline_mode<synchronous>, transform_indices = @transform_3, window_bounds = array<i64: 256, 512>}, {pipeline_mode = #tpu.pipeline_mode<synchronous>, transform_indices = @transform_4, window_bounds = array<i64: 1, 512>}, {pipeline_mode = #tpu.pipeline_mode<synchronous>, transform_indices = @transform_5, window_bounds = array<i64: 512, 1024>}, {pipeline_mode = #tpu.pipeline_mode<synchronous>, transform_indices = @transform_6, window_bounds = array<i64: 1, 1024>}, {pipeline_mode = #tpu.pipeline_mode<synchronous>, transform_indices = @transform_7, window_bounds = array<i64: 1024, 1024>}, {pipeline_mode = #tpu.pipeline_mode<synchronous>, transform_indices = @transform_8, window_bounds = array<i64: 1, 1024>}, {transform_indices = @transform_9, window_bounds = array<i64: 2, 1024>}]} {
    %c0 = arith.constant 0 : index
    %c0_0 = arith.constant 0 : index
    %0 = vector.load %arg1[%c0, %c0_0] : memref<2x128xf32, #tpu.memory_space<vmem>>, vector<2x128xf32>
    %1 = arith.truncf %0 : vector<2x128xf32> to vector<2x128xbf16>
    %c0_1 = arith.constant 0 : index
    %c0_2 = arith.constant 0 : index
    %2 = vector.load %arg2[%c0_1, %c0_2] : memref<128x256xbf16, #tpu.memory_space<vmem>>, vector<128x256xbf16>
    %cst = arith.constant dense<0.000000e+00> : vector<2x256xf32>
    %3 = tpu.matmul %1, %2, %cst {dimension_numbers = #tpu.dot_dimension_numbers<[1], [0], [0], [1], [0, 0, 1, 1], [], []>} : vector<2x128xbf16>, vector<128x256xbf16>, vector<2x256xf32> -> vector<2x256xf32>
    %c0_3 = arith.constant 0 : index
    %c0_4 = arith.constant 0 : index
    %4 = vector.load %arg3[%c0_3, %c0_4] : memref<1x256xf32, #tpu.memory_space<vmem>>, vector<1x256xf32>
    %5 = vector.broadcast %4 : vector<1x256xf32> to vector<2x256xf32>
    %6 = arith.addf %3, %5 : vector<2x256xf32>
    %cst_5 = arith.constant 0.000000e+00 : f32
    %7 = vector.broadcast %cst_5 : f32 to vector<2x256xf32>
    %8 = arith.maximumf %6, %7 : vector<2x256xf32>
    %9 = arith.truncf %8 : vector<2x256xf32> to vector<2x256xbf16>
    %c0_6 = arith.constant 0 : index
    %c0_7 = arith.constant 0 : index
    %10 = vector.load %arg4[%c0_6, %c0_7] : memref<256x512xbf16, #tpu.memory_space<vmem>>, vector<256x512xbf16>
    %cst_8 = arith.constant dense<0.000000e+00> : vector<2x512xf32>
    %11 = tpu.matmul %9, %10, %cst_8 {dimension_numbers = #tpu.dot_dimension_numbers<[1], [0], [0], [1], [0, 0, 1, 1], [], []>} : vector<2x256xbf16>, vector<256x512xbf16>, vector<2x512xf32> -> vector<2x512xf32>
    %c0_9 = arith.constant 0 : index
    %c0_10 = arith.constant 0 : index
    %12 = vector.load %arg5[%c0_9, %c0_10] : memref<1x512xf32, #tpu.memory_space<vmem>>, vector<1x512xf32>
    %13 = vector.broadcast %12 : vector<1x512xf32> to vector<2x512xf32>
    %14 = arith.addf %11, %13 : vector<2x512xf32>
    %cst_11 = arith.constant 0.000000e+00 : f32
    %15 = vector.broadcast %cst_11 : f32 to vector<2x512xf32>
    %16 = arith.maximumf %14, %15 : vector<2x512xf32>
    %17 = arith.truncf %16 : vector<2x512xf32> to vector<2x512xbf16>
    %c0_12 = arith.constant 0 : index
    %c0_13 = arith.constant 0 : index
    %18 = vector.load %arg6[%c0_12, %c0_13] : memref<512x1024xbf16, #tpu.memory_space<vmem>>, vector<512x1024xbf16>
    %cst_14 = arith.constant dense<0.000000e+00> : vector<2x1024xf32>
    %19 = tpu.matmul %17, %18, %cst_14 {dimension_numbers = #tpu.dot_dimension_numbers<[1], [0], [0], [1], [0, 0, 1, 1], [], []>} : vector<2x512xbf16>, vector<512x1024xbf16>, vector<2x1024xf32> -> vector<2x1024xf32>
    %c0_15 = arith.constant 0 : index
    %c0_16 = arith.constant 0 : index
    %20 = vector.load %arg7[%c0_15, %c0_16] : memref<1x1024xf32, #tpu.memory_space<vmem>>, vector<1x1024xf32>
    %21 = vector.broadcast %20 : vector<1x1024xf32> to vector<2x1024xf32>
    %22 = arith.addf %19, %21 : vector<2x1024xf32>
    %cst_17 = arith.constant 0.000000e+00 : f32
    %23 = vector.broadcast %cst_17 : f32 to vector<2x1024xf32>
    %24 = arith.maximumf %22, %23 : vector<2x1024xf32>
    %25 = arith.truncf %24 : vector<2x1024xf32> to vector<2x1024xbf16>
    %c0_18 = arith.constant 0 : index
    %c0_19 = arith.constant 0 : index
    %26 = vector.load %arg8[%c0_18, %c0_19] : memref<1024x1024xbf16, #tpu.memory_space<vmem>>, vector<1024x1024xbf16>
    %cst_20 = arith.constant dense<0.000000e+00> : vector<2x1024xf32>
    %27 = tpu.matmul %25, %26, %cst_20 {dimension_numbers = #tpu.dot_dimension_numbers<[1], [0], [0], [1], [0, 0, 1, 1], [], []>} : vector<2x1024xbf16>, vector<1024x1024xbf16>, vector<2x1024xf32> -> vector<2x1024xf32>
    %c0_21 = arith.constant 0 : index
    %c0_22 = arith.constant 0 : index
    %28 = vector.load %arg9[%c0_21, %c0_22] : memref<1x1024xf32, #tpu.memory_space<vmem>>, vector<1x1024xf32>
    %29 = vector.broadcast %28 : vector<1x1024xf32> to vector<2x1024xf32>
    %30 = arith.addf %27, %29 : vector<2x1024xf32>
    %31 = math.tanh %30 : vector<2x1024xf32>
    %c0_23 = arith.constant 0 : index
    %c0_24 = arith.constant 0 : index
    %32 = vector.load %arg10[%c0_23, %c0_24] : memref<2x1024xf32, #tpu.memory_space<vmem>>, vector<2x1024xf32>
    tpu.vector_store %arg10[%c0_23, %c0_24], %31 {strides = array<i32>} : memref<2x1024xf32, #tpu.memory_space<vmem>>, vector<2x1024xf32>,
    return
  }
  func.func @transform_0(%arg0: i32) -> (i32, i32) {
    %c0_i32 = arith.constant 0 : i32
    %c0_i32_0 = arith.constant 0 : i32
    return %arg0, %c0_i32 : i32, i32
  }
  func.func @transform_1(%arg0: i32) -> (i32, i32) {
    %c0_i32 = arith.constant 0 : i32
    %c0_i32_0 = arith.constant 0 : i32
    %c0_i32_1 = arith.constant 0 : i32
    return %c0_i32, %c0_i32_0 : i32, i32
  }
  func.func @transform_2(%arg0: i32) -> (i32, i32) {
    %c0_i32 = arith.constant 0 : i32
    %c0_i32_0 = arith.constant 0 : i32
    %c0_i32_1 = arith.constant 0 : i32
    return %c0_i32, %c0_i32_0 : i32, i32
  }
  func.func @transform_3(%arg0: i32) -> (i32, i32) {
    %c0_i32 = arith.constant 0 : i32
    %c0_i32_0 = arith.constant 0 : i32
    %c0_i32_1 = arith.constant 0 : i32
    return %c0_i32, %c0_i32_0 : i32, i32
  }
  func.func @transform_4(%arg0: i32) -> (i32, i32) {
    %c0_i32 = arith.constant 0 : i32
    %c0_i32_0 = arith.constant 0 : i32
    %c0_i32_1 = arith.constant 0 : i32
    return %c0_i32, %c0_i32_0 : i32, i32
  }
  func.func @transform_5(%arg0: i32) -> (i32, i32) {
    %c0_i32 = arith.constant 0 : i32
    %c0_i32_0 = arith.constant 0 : i32
    %c0_i32_1 = arith.constant 0 : i32
    return %c0_i32, %c0_i32_0 : i32, i32
  }
  func.func @transform_6(%arg0: i32) -> (i32, i32) {
    %c0_i32 = arith.constant 0 : i32
    %c0_i32_0 = arith.constant 0 : i32
    %c0_i32_1 = arith.constant 0 : i32
    return %c0_i32, %c0_i32_0 : i32, i32
  }
  func.func @transform_7(%arg0: i32) -> (i32, i32) {
    %c0_i32 = arith.constant 0 : i32
    %c0_i32_0 = arith.constant 0 : i32
    %c0_i32_1 = arith.constant 0 : i32
    return %c0_i32, %c0_i32_0 : i32, i32
  }
  func.func @transform_8(%arg0: i32) -> (i32, i32) {
    %c0_i32 = arith.constant 0 : i32
    %c0_i32_0 = arith.constant 0 : i32
    %c0_i32_1 = arith.constant 0 : i32
    return %c0_i32, %c0_i32_0 : i32, i32
  }
  func.func @transform_9(%arg0: i32) -> (i32, i32) {
    %c0_i32 = arith.constant 0 : i32
    %c0_i32_0 = arith.constant 0 : i32
    return %arg0, %c0_i32 : i32, i32
  }
}

</mosaic_0001>

<bundles_post_ra>
// kernel: generator_forward.1
= control target key start
LH: loop header
LB: loop body
LE: loop exit
PB: predicated region body
PF: predicated region fallthrough
CT: control target
= control target key end

     0   :  { %14 = vsyncpa [#allocation3], 0  ;;  %s8054_s0 = inlined_call_operand.hbm [shape: f32[2,128], index: 0, kind: input, shape index: {}]   ;;  %s8055_s1 = inlined_call_operand.hbm [shape: bf16[128,256], index: 1, kind: input, shape index: {}]   ;;  %s8056_s2 = inlined_call_operand.hbm [shape: f32[1,256], index: 2, kind: input, shape index: {}]   ;;  %s8057_s3 = inlined_call_operand.hbm [shape: bf16[256,512], index: 3, kind: input, shape index: {}]   ;;  %s8058_s4 = inlined_call_operand.hbm [shape: f32[1,512], index: 4, kind: input, shape index: {}]   ;;  %s8059_s5 = inlined_call_operand.hbm [shape: bf16[512,1024], index: 5, kind: input, shape index: {}]   ;;  %s8060_s6 = inlined_call_operand.hbm [shape: f32[1,1024], index: 6, kind: input, shape index: {}]   ;;  %s8061_s7 = inlined_call_operand.hbm [shape: bf16[1024,1024], index: 7, kind: input, shape index: {}]   ;;  %s8062_s8 = inlined_call_operand.hbm [shape: f32[1,1024], index: 8, kind: input, shape index: {}]   ;;  %s8063_s9 = inlined_call_operand.vmem [shape: f32[2,1024], index: 9, kind: output, shape index: {}]  }
   0x1   :  { %15 = vsyncpa [#allocation5], 0 }
   0x2   :  { %16 = vsyncpa [#allocation8], 0 }
   0x3   :  { %17 = vsyncpa [#allocation11], 0 }
   0x4   :  { %18 = vsyncpa [#allocation14], 0  ;;  %s7744_s30 = smov [#allocation4]  }
   0x5   :  { %s34_s10 = sshll.u32 %s7744_s30, 4  ;;  %s35_s10 = int_to_ptr.vmem [resolvable:$true] %s34_s10 }
   0x6   :  { %s7562_s11 = scalar_lea.vmem %s35_s10, 2048  ;;  %p7567_p1 = scmp.lt.s32.totalorder %s35_s10, %s35_s10 }
   0x7   :  { %p7563_p0 = scmp.ne.s32.totalorder %s35_s10, %s7562_s11  ;;  %p7568_p2 = scmp.lt.s32.totalorder %s7562_s11, %s7562_s11 }
   0x9   :  { %p7569_p3 = por %p7568_p2, %p7567_p1 }
   0xb   :  { %p7570_p4 = pnand %p7569_p3, %p7563_p0 }
   0xd   :  { %7573 = shalt.err (!%p7570_p4)
}
   0xe   :  { %s7745_s12 = smov 128   ;;  %s7746_s13 = smov 8  }
   0xf   :  { %40 = dma.hbm_to_vmem [thread:$0]  %s8055_s1, 2048, %s35_s10, [#allocation5], %s7745_s12, %s7745_s12, %s7746_s13  }
  0x10   :  { %s7747_s16 = smov [#allocation7]  }
  0x11   :  { %s56_s17 = sshll.u32 %s7747_s16, 4  ;;  %s57_s17 = int_to_ptr.vmem [resolvable:$true] %s56_s17 }
  0x12   :  { %s7582_s18 = scalar_lea.vmem %s57_s17, 8192  ;;  %p7587_p6 = scmp.lt.s32.totalorder %s57_s17, %s57_s17 }
  0x13   :  { %p7583_p5 = scmp.ne.s32.totalorder %s57_s17, %s7582_s18  ;;  %p7588_p7 = scmp.lt.s32.totalorder %s7582_s18, %s7582_s18 }
  0x15   :  { %p7589_p8 = por %p7588_p7, %p7587_p6 }
  0x17   :  { %p7590_p9 = pnand %p7589_p8, %p7583_p5 }
  0x19   :  { %7593 = shalt.err (!%p7590_p9)
}
  0x1a   :  { %s7748_s19 = smov 256   ;;  %s7749_s20 = smov 16  }
  0x1b   :  { %62 = dma.hbm_to_vmem [thread:$0]  %s8057_s3, 8192, %s57_s17, [#allocation8], %s7748_s19, %s7748_s19, %s7749_s20  }
  0x1c   :  { %s7750_s23 = smov [#allocation10]  }
  0x1d   :  { %s78_s24 = sshll.u32 %s7750_s23, 4  ;;  %s79_s24 = int_to_ptr.vmem [resolvable:$true] %s78_s24 }
  0x1e   :  { %s7602_s1 = scalar_lea.vmem %s79_s24, 32768  ;;  %p7607_p11 = scmp.lt.s32.totalorder %s79_s24, %s79_s24 }
  0x1f   :  { %p7603_p10 = scmp.ne.s32.totalorder %s79_s24, %s7602_s1  ;;  %p7608_p12 = scmp.lt.s32.totalorder %s7602_s1, %s7602_s1 }
  0x21   :  { %p7609_p13 = por %p7608_p12, %p7607_p11 }
  0x23   :  { %p7610_p0 = pnand %p7609_p13, %p7603_p10 }
  0x25   :  { %7613 = shalt.err (!%p7610_p0)
}
  0x26   :  { %s7751_s25 = smov 512   ;;  %s7752_s26 = smov 32  }
  0x27   :  { %84 = dma.hbm_to_vmem [thread:$0]  %s8059_s5, 32768, %s79_s24, [#allocation11], %s7751_s25, %s7751_s25, %s7752_s26  }
  0x28   :  { %s7753_s29 = smov [#allocation13]   ;;  %s7754_s3 = smov [#allocation2]  }
  0x29   :  { %s100_s30 = sshll.u32 %s7753_s29, 4  ;;  %s25_s10 = sshll.u32 %s7754_s3, 4  ;;  %s101_s30 = int_to_ptr.vmem [resolvable:$true] %s100_s30  ;;  %s26_s10 = int_to_ptr.vmem [resolvable:$true] %s25_s10 }
  0x2a   :  { %s7622_s11 = scalar_lea.vmem %s101_s30, 65536  ;;  %p7627_p2 = scmp.lt.s32.totalorder %s101_s30, %s101_s30 }
  0x2b   :  { %p7623_p1 = scmp.ne.s32.totalorder %s101_s30, %s7622_s11  ;;  %p7628_p3 = scmp.lt.s32.totalorder %s7622_s11, %s7622_s11 }
  0x2d   :  { %p7629_p4 = por %p7628_p3, %p7627_p2 }
  0x2f   :  { %p7630_p5 = pnand %p7629_p4, %p7623_p1 }
  0x31   :  { %7633 = shalt.err (!%p7630_p5)
}
  0x32   :  { %106 = dma.hbm_to_vmem [thread:$0]  %s8061_s7, 65536, %s101_s30, [#allocation14], %s7751_s25, %s7751_s25, %s7752_s26  }
  0x33   :  { %s7642_s14 = scalar_lea.vmem %s26_s10, 32  ;;  %p7647_p7 = scmp.lt.s32.totalorder %s26_s10, %s26_s10 }
  0x34   :  { %p7643_p6 = scmp.ne.s32.totalorder %s26_s10, %s7642_s14  ;;  %p7648_p8 = scmp.lt.s32.totalorder %s7642_s14, %s7642_s14 }
  0x36   :  { %p7649_p9 = por %p7648_p8, %p7647_p7 }
  0x38   :  { %p7650_p10 = pnand %p7649_p9, %p7643_p6 }
  0x3a   :  { %7653 = shalt.err (!%p7650_p10)
}
  0x3b   :  { %28 = dma.hbm_to_vmem [thread:$0]  %s8054_s0, 32, %s26_s10, [#allocation3]  }
  0x3c   :  { %s7755_s16 = smov [#allocation6]   ;;  %s7756_s18 = smov [#allocation9]  }
  0x3d   :  { %s47_s17 = sshll.u32 %s7755_s16, 4  ;;  %s69_s19 = sshll.u32 %s7756_s18, 4  ;;  %s48_s17 = int_to_ptr.vmem [resolvable:$true] %s47_s17  ;;  %s70_s19 = int_to_ptr.vmem [resolvable:$true] %s69_s19 }
  0x3e   :  { %s7662_s20 = scalar_lea.vmem %s48_s17, 32  ;;  %p7667_p12 = scmp.lt.s32.totalorder %s48_s17, %s48_s17 }
  0x3f   :  { %p7663_p11 = scmp.ne.s32.totalorder %s48_s17, %s7662_s20  ;;  %p7668_p13 = scmp.lt.s32.totalorder %s7662_s20, %s7662_s20 }
  0x41   :  { %p7669_p0 = por %p7668_p13, %p7667_p12 }
  0x43   :  { %p7670_p1 = pnand %p7669_p0, %p7663_p11 }
  0x45   :  { %7673 = shalt.err (!%p7670_p1)
}
  0x46   :  { %50 = dma.hbm_to_vmem [thread:$0]  %s8056_s2, 32, %s48_s17, [#allocation5]  }
  0x47   :  { %s7682_s22 = scalar_lea.vmem %s70_s19, 64  ;;  %p7687_p3 = scmp.lt.s32.totalorder %s70_s19, %s70_s19 }
  0x48   :  { %p7683_p2 = scmp.ne.s32.totalorder %s70_s19, %s7682_s22  ;;  %p7688_p4 = scmp.lt.s32.totalorder %s7682_s22, %s7682_s22 }
  0x4a   :  { %p7689_p5 = por %p7688_p4, %p7687_p3 }
  0x4c   :  { %p7690_p6 = pnand %p7689_p5, %p7683_p2 }
  0x4e   :  { %7693 = shalt.err (!%p7690_p6)
}
  0x4f   :  { %72 = dma.hbm_to_vmem [thread:$0]  %s8058_s4, 64, %s70_s19, [#allocation8]  }
  0x50   :  { %s7757_s24 = smov [#allocation12]   ;;  %s7758_s25 = smov [#allocation15]  }
  0x51   :  { %s91_s1 = sshll.u32 %s7757_s24, 4  ;;  %s113_s26 = sshll.u32 %s7758_s25, 4  ;;  %s92_s1 = int_to_ptr.vmem [resolvable:$true] %s91_s1  ;;  %s114_s26 = int_to_ptr.vmem [resolvable:$true] %s113_s26 }
  0x52   :  { %s7702_s27 = scalar_lea.vmem %s92_s1, 128  ;;  %p7707_p8 = scmp.lt.s32.totalorder %s92_s1, %s92_s1 }
  0x53   :  { %p7703_p7 = scmp.ne.s32.totalorder %s92_s1, %s7702_s27  ;;  %p7708_p9 = scmp.lt.s32.totalorder %s7702_s27, %s7702_s27 }
  0x55   :  { %p7709_p10 = por %p7708_p9, %p7707_p8 }
  0x57   :  { %p7710_p11 = pnand %p7709_p10, %p7703_p7 }
  0x59   :  { %7713 = shalt.err (!%p7710_p11)
}
  0x5a   :  { %94 = dma.hbm_to_vmem [thread:$0]  %s8060_s6, 128, %s92_s1, [#allocation11]  }
  0x5b   :  { %s7722_s29 = scalar_lea.vmem %s114_s26, 128  ;;  %p7727_p13 = scmp.lt.s32.totalorder %s114_s26, %s114_s26 }
  0x5c   :  { %p7723_p12 = scmp.ne.s32.totalorder %s114_s26, %s7722_s29  ;;  %p7728_p0 = scmp.lt.s32.totalorder %s7722_s29, %s7722_s29 }
  0x5e   :  { %p7729_p1 = por %p7728_p0, %p7727_p13 }
  0x60   :  { %p7730_p2 = pnand %p7729_p1, %p7723_p12 }
  0x62   :  { %7733 = shalt.err (!%p7730_p2)
}
  0x63   :  { %116 = dma.hbm_to_vmem [thread:$0]  %s8062_s8, 128, %s114_s26, [#allocation14]  }
  0x64   :  { %7734 = dma.done.wait [#allocation3], 32  }
  0x65   :  { %7735 = vsyncadd [#allocation3], 4294967264 }
  0x66   :  { %7736 = dma.done.wait [#allocation5], 2080  }
  0x67   :  { %7737 = vsyncadd [#allocation5], 4294965216 }
  0x68   :  { %7738 = dma.done.wait [#allocation8], 8256  }
  0x69   :  { %7739 = vsyncadd [#allocation8], 4294959040 }
  0x6a   :  { %7740 = dma.done.wait [#allocation11], 32896  }
  0x6b   :  { %7741 = vsyncadd [#allocation11], 4294934400 }
  0x6c   :  { %7742 = dma.done.wait [#allocation14], 65664  }
  0x6d   :  { %7743 = vsyncadd [#allocation14], 4294901632  ;;  %v7759_v0 = vmov 0   ;;  %v7416_v1 = vld [vmem:[#allocation4 + $0x74] ss:$8 sps:$4 sm:$0xff]  }
  0x6e   :  { %287 = vmatprep.mubr.bf16.mxu0 %v7759_v0  ;;  %v7418_v2 = vld [vmem:[#allocation4 + $0x70] ss:$8 sps:$4 sm:$0xff]   ;;  %255 = vmatprep.subr.bf16.mxu0 %v7416_v1  ;;  %v7419_v3 = vld [vmem:[#allocation4 + $0x64] ss:$8 sps:$4 sm:$0xff]   ;;  %v7421_v4 = vld [vmem:[#allocation4 + $0x60] ss:$8 sps:$4 sm:$0xff]  }
  0x6f   :  { %256 = vmatpush1.bf16.msra.mxu0 %v7418_v2  ;;  %v7422_v5 = vld [vmem:[#allocation4 + $0x54] ss:$8 sps:$4 sm:$0xff]   ;;  %v7424_v6 = vld [vmem:[#allocation4 + $0x50] ss:$8 sps:$4 sm:$0xff]   ;;  %v7425_v7 = vld [vmem:[#allocation4 + $0x44] ss:$8 sps:$4 sm:$0xff]  }
  0x70   :  { %257 = vmatprep.subr.bf16.mxu0 %v7419_v3  ;;  %v7427_v8 = vld [vmem:[#allocation4 + $0x40] ss:$8 sps:$4 sm:$0xff]   ;;  %v7428_v10 = vld [vmem:[#allocation4 + $0x34] ss:$8 sps:$4 sm:$0xff]   ;;  %v7430_v13 = vld [vmem:[#allocation4 + $0x30] ss:$8 sps:$4 sm:$0xff]  }
  0x71   :  { %v7440_v9 = vld [vmem:[#allocation7 + $0xe4] ss:$16 sps:$4 sm:$0xff]   ;;  %v7445_v11 = vld [vmem:[#allocation7 + $0xe0] ss:$16 sps:$4 sm:$0xff]   ;;  %v145_v26 = vld [vmem:[#allocation2] sm:$0x3] }
  0x72   :  { %706 = vmatprep.subr.bf16.mxu1 %v7440_v9  ;;  %v7446_v12 = vld [vmem:[#allocation7 + $0xc4] ss:$16 sps:$4 sm:$0xff]   ;;  %v7451_v15 = vld [vmem:[#allocation7 + $0xc0] ss:$16 sps:$4 sm:$0xff]   ;;  %v7444_v27 = vld [vmem:[#allocation7 + $0xec] ss:$16 sps:$4 sm:$0xff]   ;;  %v146_v30 = vpack.c.bf16 %v145_v26, %v145_v26 }
  0x73   :  { %258 = vmatpush1.bf16.msra.mxu0 %v7421_v4  ;;  %v7431_v14 = vld [vmem:[#allocation4 + $0x24] ss:$8 sps:$4 sm:$0xff]   ;;  %707 = vmatpush1.bf16.msra.mxu1 %v7445_v11  ;;  %v7433_v17 = vld [vmem:[#allocation4 + $0x20] ss:$8 sps:$4 sm:$0xff]   ;;  %v7434_v18 = vld [vmem:[#allocation4 + $0x14] ss:$8 sps:$4 sm:$0xff]  }
  0x74   :  { %259 = vmatprep.subr.bf16.mxu0 %v7422_v5  ;;  %708 = vmatprep.subr.bf16.mxu1 %v7446_v12  ;;  %v7452_v16 = vld [vmem:[#allocation7 + $0xa4] ss:$16 sps:$4 sm:$0xff]   ;;  %v7457_v19 = vld [vmem:[#allocation7 + $0xa0] ss:$16 sps:$4 sm:$0xff]   ;;  %v7442_v31 = vld [vmem:[#allocation7 + $0xe8] ss:$16 sps:$4 sm:$0xff]  }
  0x75   :  { %v7458_v20 = vld [vmem:[#allocation7 + $0x84] ss:$16 sps:$4 sm:$0xff]   ;;  %v7463_v23 = vld [vmem:[#allocation7 + $0x80] ss:$16 sps:$4 sm:$0xff]   ;;  %v7450_v32 = vld [vmem:[#allocation7 + $0xcc] ss:$16 sps:$4 sm:$0xff]  }
  0x76   :  { %v7436_v21 = vld [vmem:[#allocation4 + $0x10] ss:$8 sps:$4 sm:$0xff]   ;;  %v7437_v22 = vld [vmem:[#allocation4 + $0x4] ss:$8 sps:$4 sm:$0xff]   ;;  %v7439_v25 = vld [vmem:[#allocation4] ss:$8 sps:$4 sm:$0xff]  }
  0x77   :  { %260 = vmatpush1.bf16.msra.mxu0 %v7424_v6  ;;  %709 = vmatpush1.bf16.msra.mxu1 %v7451_v15  ;;  %v7464_v24 = vld [vmem:[#allocation7 + $0x64] ss:$16 sps:$4 sm:$0xff]   ;;  %v7469_v28 = vld [vmem:[#allocation7 + $0x60] ss:$16 sps:$4 sm:$0xff]   ;;  %v7448_v35 = vld [vmem:[#allocation7 + $0xc8] ss:$16 sps:$4 sm:$0xff]  }
  0x78   :  { %261 = vmatprep.subr.bf16.mxu0 %v7425_v7  ;;  %710 = vmatprep.subr.bf16.mxu1 %v7452_v16  ;;  %v7470_v29 = vld [vmem:[#allocation7 + $0x44] ss:$16 sps:$4 sm:$0xff]   ;;  %v7475_v33 = vld [vmem:[#allocation7 + $0x40] ss:$16 sps:$4 sm:$0xff]   ;;  %v7456_v36 = vld [vmem:[#allocation7 + $0xac] ss:$16 sps:$4 sm:$0xff]  }
  0x79   :  { %v7476_v34 = vld [vmem:[#allocation7 + $0x24] ss:$16 sps:$4 sm:$0xff]   ;;  %v7481_v37 = vld [vmem:[#allocation7 + $0x20] ss:$16 sps:$4 sm:$0xff]   ;;  %v7454_v39 = vld [vmem:[#allocation7 + $0xa8] ss:$16 sps:$4 sm:$0xff]  }
  0x7a   :  { %v7482_v38 = vld [vmem:[#allocation7 + $0x4] ss:$16 sps:$4 sm:$0xff]   ;;  %v7462_v40 = vld [vmem:[#allocation7 + $0x8c] ss:$16 sps:$4 sm:$0xff]   ;;  %v7487_v41 = vld [vmem:[#allocation7] ss:$16 sps:$4 sm:$0xff]  }
  0x7b   :  { %262 = vmatpush1.bf16.msra.mxu0 %v7427_v8  ;;  %711 = vmatpush1.bf16.msra.mxu1 %v7457_v19  ;;  %v7488_v42 = vld [vmem:[#allocation7 + $0x1e4] ss:$16 sps:$4 sm:$0xff]   ;;  %v7460_v43 = vld [vmem:[#allocation7 + $0x88] ss:$16 sps:$4 sm:$0xff]   ;;  %v7468_v44 = vld [vmem:[#allocation7 + $0x6c] ss:$16 sps:$4 sm:$0xff]  }
  0x7c   :  { %263 = vmatprep.subr.bf16.mxu0 %v7428_v10  ;;  %712 = vmatprep.subr.bf16.mxu1 %v7458_v20  ;;  %v7493_v45 = vld [vmem:[#allocation7 + $0x1e0] ss:$16 sps:$4 sm:$0xff]   ;;  %v7494_v46 = vld [vmem:[#allocation7 + $0x1c4] ss:$16 sps:$4 sm:$0xff]   ;;  %v7466_v47 = vld [vmem:[#allocation7 + $0x68] ss:$16 sps:$4 sm:$0xff]  }
  0x7d   :  { %v7499_v48 = vld [vmem:[#allocation7 + $0x1c0] ss:$16 sps:$4 sm:$0xff]   ;;  %v7474_v49 = vld [vmem:[#allocation7 + $0x4c] ss:$16 sps:$4 sm:$0xff]   ;;  %v7500_v50 = vld [vmem:[#allocation7 + $0x1a4] ss:$16 sps:$4 sm:$0xff]  }
  0x7e   :  { %v7472_v51 = vld [vmem:[#allocation7 + $0x48] ss:$16 sps:$4 sm:$0xff]   ;;  %v7505_v52 = vld [vmem:[#allocation7 + $0x1a0] ss:$16 sps:$4 sm:$0xff]   ;;  %v7480_v53 = vld [vmem:[#allocation7 + $0x2c] ss:$16 sps:$4 sm:$0xff]  }
  0x7f   :  { %264 = vmatpush1.bf16.msra.mxu0 %v7430_v13  ;;  %713 = vmatpush1.bf16.msra.mxu1 %v7463_v23  ;;  %v7506_v54 = vld [vmem:[#allocation7 + $0x184] ss:$16 sps:$4 sm:$0xff]   ;;  %v7478_v55 = vld [vmem:[#allocation7 + $0x28] ss:$16 sps:$4 sm:$0xff]   ;;  %v7511_v56 = vld [vmem:[#allocation7 + $0x180] ss:$16 sps:$4 sm:$0xff]  }
  0x80   :  { %265 = vmatprep.subr.bf16.mxu0 %v7431_v14  ;;  %714 = vmatprep.subr.bf16.mxu1 %v7464_v24  ;;  %v7486_v57 = vld [vmem:[#allocation7 + $0xc] ss:$16 sps:$4 sm:$0xff]   ;;  %v7512_v58 = vld [vmem:[#allocation7 + $0x164] ss:$16 sps:$4 sm:$0xff]   ;;  %v7484_v59 = vld [vmem:[#allocation7 + $0x8] ss:$16 sps:$4 sm:$0xff]  }
  0x81   :  { %v7517_v60 = vld [vmem:[#allocation7 + $0x160] ss:$16 sps:$4 sm:$0xff]   ;;  %v7492_v61 = vld [vmem:[#allocation7 + $0x1ec] ss:$16 sps:$4 sm:$0xff]   ;;  %v7518_v62 = vld [vmem:[#allocation7 + $0x144] ss:$16 sps:$4 sm:$0xff]  }
  0x82   :  { %v7490_v63 = vld [vmem:[#allocation7 + $0x1e8] ss:$16 sps:$4 sm:$0xff]   ;;  %v7523_v0 = vld [vmem:[#allocation7 + $0x140] ss:$16 sps:$4 sm:$0xff]   ;;  %v7498_v1 = vld [vmem:[#allocation7 + $0x1cc] ss:$16 sps:$4 sm:$0xff]  }
  0x83   :  { %266 = vmatpush1.bf16.msra.mxu0 %v7433_v17  ;;  %715 = vmatpush1.bf16.msra.mxu1 %v7469_v28  ;;  %v7496_v2 = vld [vmem:[#allocation7 + $0x1c8] ss:$16 sps:$4 sm:$0xff]   ;;  %v7504_v3 = vld [vmem:[#allocation7 + $0x1ac] ss:$16 sps:$4 sm:$0xff]   ;;  %v7524_v11 = vld [vmem:[#allocation7 + $0x124] ss:$16 sps:$4 sm:$0xff]  }
  0x84   :  { %267 = vmatprep.subr.bf16.mxu0 %v7434_v18  ;;  %716 = vmatprep.subr.bf16.mxu1 %v7470_v29  ;;  %v7502_v4 = vld [vmem:[#allocation7 + $0x1a8] ss:$16 sps:$4 sm:$0xff]   ;;  %v7510_v5 = vld [vmem:[#allocation7 + $0x18c] ss:$16 sps:$4 sm:$0xff]   ;;  %v7529_v14 = vld [vmem:[#allocation7 + $0x120] ss:$16 sps:$4 sm:$0xff]  }
  0x85   :  { %v7508_v6 = vld [vmem:[#allocation7 + $0x188] ss:$16 sps:$4 sm:$0xff]   ;;  %v7516_v7 = vld [vmem:[#allocation7 + $0x16c] ss:$16 sps:$4 sm:$0xff]   ;;  %v7530_v15 = vld [vmem:[#allocation7 + $0x104] ss:$16 sps:$4 sm:$0xff]  }
  0x86   :  { %v7514_v8 = vld [vmem:[#allocation7 + $0x168] ss:$16 sps:$4 sm:$0xff]   ;;  %v7522_v9 = vld [vmem:[#allocation7 + $0x14c] ss:$16 sps:$4 sm:$0xff]   ;;  %v7535_v18 = vld [vmem:[#allocation7 + $0x100] ss:$16 sps:$4 sm:$0xff]  }
  0x87   :  { %268 = vmatpush1.bf16.msra.mxu0 %v7436_v21  ;;  %717 = vmatpush1.bf16.msra.mxu1 %v7475_v33  ;;  %v7520_v10 = vld [vmem:[#allocation7 + $0x148] ss:$16 sps:$4 sm:$0xff]   ;;  %v7528_v12 = vld [vmem:[#allocation7 + $0x12c] ss:$16 sps:$4 sm:$0xff]  }
  0x88   :  { %269 = vmatprep.subr.bf16.mxu0 %v7437_v22  ;;  %718 = vmatprep.subr.bf16.mxu1 %v7476_v34  ;;  %v7526_v13 = vld [vmem:[#allocation7 + $0x128] ss:$16 sps:$4 sm:$0xff]   ;;  %v7534_v16 = vld [vmem:[#allocation7 + $0x10c] ss:$16 sps:$4 sm:$0xff]  }
  0x89   :  { %v7532_v17 = vld [vmem:[#allocation7 + $0x108] ss:$16 sps:$4 sm:$0xff]  }
  0x8a   :  { %v852_v19 = vld [vmem:[#allocation10 + $0x1c0] sm:$0xff] }
  0x8b   :  { %270 = vmatpush1.bf16.msra.mxu0 %v7439_v25  ;;  %719 = vmatpush1.bf16.msra.mxu1 %v7481_v37  ;;  %v856_v20 = vld [vmem:[#allocation10 + $0x1e0] sm:$0xff] }
  0x8c   :  { %747 = vmatprep.subr.bf16.mxu0 %v7444_v27  ;;  %720 = vmatprep.subr.bf16.mxu1 %v7482_v38  ;;  %v980_v21 = vld [vmem:[#allocation10 + $0x5c0] sm:$0xff]  ;;  %v6687_v22 = vcombine.low %v852_v19, %v856_v20  ;;  %v6688_v23 = vcombine.high %v852_v19, %v856_v20  ;;  %v165_v27 = vlaneseq }
  0x8d   :  { %v984_v24 = vld [vmem:[#allocation10 + $0x5e0] sm:$0xff] }
  0x8e   :  { %288 = vmatmul.mubr.bf16.vlgmr.msra.gmra.mxu0 %v146_v30  ;;  %v6815_v25 = vcombine.low %v980_v21, %v984_v24  ;;  %v6816_v26 = vcombine.high %v980_v21, %v984_v24  ;;  %v7838_v28 = vshrl.u32 %v165_v27, 7  ;;  %v163_v30 = vld [vmem:[#allocation6] sm:$0x3]  ;;  %v808_v19 = vld [vmem:[#allocation10 + $0x60] sm:$0xff] }
  0x8f   :  { %748 = vmatpush1.bf16.msra.mxu0 %v7442_v31  ;;  %721 = vmatpush1.bf16.msra.mxu1 %v7487_v41  ;;  %v932_v20 = vld [vmem:[#allocation10 + $0x440] sm:$0xff] }
  0x90   :  { %749 = vmatprep.subr.bf16.mxu0 %v7450_v32  ;;  %722 = vmatprep.subr.bf16.mxu1 %v7488_v42  ;;  %v7841_v29 = vsub.s32 0, %v7838_v28  ;;  %v7844_v31 = vsub.s32 1, %v7838_v28  ;;  %v848_v42 = vld [vmem:[#allocation10 + $0x1a0] sm:$0xff] }
  0x91   :  { %v936_v21 = vld [vmem:[#allocation10 + $0x460] sm:$0xff] }
  0x92   :  { %v168_v32 = vrot.slane %v163_v30, %v7841_v29  ;;  %v172_v33 = vrot.slane %v163_v30, %v7844_v31  ;;  %v800_v27 = vld [vmem:[#allocation10 + $0x20] sm:$0xff] }
  0x93   :  { %750 = vmatpush1.bf16.msra.mxu0 %v7448_v35  ;;  %723 = vmatpush2.bf16.msra.mxu1 %v7493_v45  ;;  %v924_v30 = vld [vmem:[#allocation10 + $0x400] sm:$0xff] }
  0x94   :  { %751 = vmatprep.subr.bf16.mxu0 %v7456_v36  ;;  %724 = vmatprep.subr.bf16.mxu1 %v7494_v46 }
  0x97   :  { %752 = vmatpush1.bf16.msra.mxu0 %v7454_v39  ;;  %725 = vmatpush2.bf16.msra.mxu1 %v7499_v48 }
  0x98   :  { %753 = vmatprep.subr.bf16.mxu0 %v7462_v40  ;;  %726 = vmatprep.subr.bf16.mxu1 %v7500_v50  ;;  %v844_v40 = vld [vmem:[#allocation10 + $0x180] sm:$0xff] }
  0x99   :  { %v6680_v48 = vcombine.high %v844_v40, %v848_v42  ;;  %v836_v50 = vld [vmem:[#allocation10 + $0x140] sm:$0xff] }
  0x9b   :  { %754 = vmatpush1.bf16.msra.mxu0 %v7460_v43  ;;  %727 = vmatpush2.bf16.msra.mxu1 %v7505_v52  ;;  %v972_v43 = vld [vmem:[#allocation10 + $0x580] sm:$0xff] }
  0x9c   :  { %755 = vmatprep.subr.bf16.mxu0 %v7468_v44  ;;  %728 = vmatprep.subr.bf16.mxu1 %v7506_v54  ;;  %v976_v44 = vld [vmem:[#allocation10 + $0x5a0] sm:$0xff]  ;;  %v6679_v54 = vcombine.low %v844_v40, %v848_v42 }
  0x9d   :  { %v964_v52 = vld [vmem:[#allocation10 + $0x540] sm:$0xff] }
  0x9e   :  { %v1048_v40 = vld [vmem:[#allocation10 + $0x7e0] sm:$0xff] }
  0x9f   :  { %756 = vmatpush1.bf16.msra.mxu0 %v7466_v47  ;;  %729 = vmatpush2.bf16.msra.mxu1 %v7511_v56 }
  0xa0   :  { %757 = vmatprep.subr.bf16.mxu0 %v7474_v49  ;;  %730 = vmatprep.subr.bf16.mxu1 %v7512_v58  ;;  %v6808_v49 = vcombine.high %v972_v43, %v976_v44  ;;  %v828_v58 = vld [vmem:[#allocation10 + $0x100] sm:$0xff] }
  0xa3   :  { %758 = vmatpush1.bf16.msra.mxu0 %v7472_v51  ;;  %731 = vmatpush2.bf16.msra.mxu1 %v7517_v60  ;;  %v840_v51 = vld [vmem:[#allocation10 + $0x160] sm:$0xff] }
  0xa4   :  { %759 = vmatprep.subr.bf16.mxu0 %v7480_v53  ;;  %732 = vmatprep.subr.bf16.mxu1 %v7518_v62  ;;  %v968_v53 = vld [vmem:[#allocation10 + $0x560] sm:$0xff]  ;;  %v6672_v56 = vcombine.high %v836_v50, %v840_v51  ;;  %v6671_v62 = vcombine.low %v836_v50, %v840_v51 }
  0xa5   :  { %v956_v60 = vld [vmem:[#allocation10 + $0x500] sm:$0xff] }
  0xa7   :  { %760 = vmatpush1.bf16.msra.mxu0 %v7478_v55  ;;  %733 = vmatpush2.bf16.msra.mxu1 %v7523_v0  ;;  %v6807_v55 = vcombine.low %v972_v43, %v976_v44 }
  0xa8   :  { %761 = vmatprep.subr.bf16.mxu0 %v7486_v57  ;;  %734 = vmatprep.subr.bf16.mxu1 %v7524_v11  ;;  %v6800_v57 = vcombine.high %v964_v52, %v968_v53  ;;  %v816_v11 = vld [vmem:[#allocation10 + $0xa0] sm:$0xff] }
  0xab   :  { %762 = vmatpush1.bf16.msra.mxu0 %v7484_v59  ;;  %735 = vmatpush2.bf16.msra.mxu1 %v7529_v14  ;;  %v832_v59 = vld [vmem:[#allocation10 + $0x120] sm:$0xff] }
  0xac   :  { %763 = vmatprep.subr.bf16.mxu0 %v7492_v61  ;;  %736 = vmatprep.subr.bf16.mxu1 %v7530_v15  ;;  %v960_v61 = vld [vmem:[#allocation10 + $0x520] sm:$0xff]  ;;  %v6664_v0 = vcombine.high %v828_v58, %v832_v59 }
  0xaf   :  { %764 = vmatpush2.bf16.msra.mxu0 %v7490_v63  ;;  %737 = vmatpush2.bf16.msra.mxu1 %v7535_v18  ;;  %v6799_v63 = vcombine.low %v964_v52, %v968_v53  ;;  %v804_v18 = vld [vmem:[#allocation10 + $0x40] sm:$0xff] }
  0xb0   :  { %765 = vmatprep.subr.bf16.mxu0 %v7498_v1  ;;  %2374 = vmatprep.subr.bf16.mxu1 %v6688_v23  ;;  %v6792_v1 = vcombine.high %v956_v60, %v960_v61  ;;  %v6640_v24 = vcombine.high %v804_v18, %v808_v19  ;;  %v900_v53 = vld [vmem:[#allocation10 + $0x340] sm:$0xff] }
  0xb3   :  { %766 = vmatpush2.bf16.msra.mxu0 %v7496_v2  ;;  %v820_v2 = vld [vmem:[#allocation10 + $0xc0] sm:$0xff] }
  0xb4   :  { %767 = vmatprep.subr.bf16.mxu0 %v7504_v3  ;;  %v824_v3 = vld [vmem:[#allocation10 + $0xe0] sm:$0xff] }
  0xb5   :  { %v6655_v14 = vcombine.low %v820_v2, %v824_v3 }
  0xb7   :  { %768 = vmatpush2.bf16.msra.mxu0 %v7502_v4  ;;  %v948_v4 = vld [vmem:[#allocation10 + $0x4c0] sm:$0xff] }
  0xb8   :  { %769 = vmatprep.subr.bf16.mxu0 %v7510_v5  ;;  %v952_v5 = vld [vmem:[#allocation10 + $0x4e0] sm:$0xff] }
  0xb9   :  { %v6783_v15 = vcombine.low %v948_v4, %v952_v5 }
  0xbb   :  { %770 = vmatpush2.bf16.msra.mxu0 %v7508_v6  ;;  %v6663_v6 = vcombine.low %v828_v58, %v832_v59 }
  0xbc   :  { %771 = vmatprep.subr.bf16.mxu0 %v7516_v7  ;;  %v6791_v7 = vcombine.low %v956_v60, %v960_v61  ;;  %v892_v61 = vld [vmem:[#allocation10 + $0x300] sm:$0xff] }
  0xbf   :  { %772 = vmatpush2.bf16.msra.mxu0 %v7514_v8  ;;  %v6656_v8 = vcombine.high %v820_v2, %v824_v3 }
  0xc0   :  { %773 = vmatprep.subr.bf16.mxu0 %v7522_v9  ;;  %v6784_v9 = vcombine.high %v948_v4, %v952_v5  ;;  %v884_v5 = vld [vmem:[#allocation10 + $0x2c0] sm:$0xff] }
  0xc3   :  { %774 = vmatpush2.bf16.msra.mxu0 %v7520_v10  ;;  %v812_v10 = vld [vmem:[#allocation10 + $0x80] sm:$0xff] }
  0xc4   :  { %775 = vmatprep.subr.bf16.mxu0 %v7528_v12  ;;  %v940_v12 = vld [vmem:[#allocation10 + $0x480] sm:$0xff] }
  0xc7   :  { %776 = vmatpush2.bf16.msra.mxu0 %v7526_v13  ;;  %v944_v13 = vld [vmem:[#allocation10 + $0x4a0] sm:$0xff] }
  0xc8   :  { %777 = vmatprep.subr.bf16.mxu0 %v7534_v16  ;;  %v6648_v16 = vcombine.high %v812_v10, %v816_v11  ;;  %v6775_v23 = vcombine.low %v940_v12, %v944_v13 }
  0xcb   :  { %778 = vmatpush2.bf16.msra.mxu0 %v7532_v17  ;;  %v6776_v17 = vcombine.high %v940_v12, %v944_v13  ;;  %v876_v13 = vld [vmem:[#allocation10 + $0x280] sm:$0xff] }
  0xcc   :  { %2415 = vmatprep.subr.bf16.mxu0 %v6816_v26  ;;  %v796_v26 = vld [vmem:[#allocation10] sm:$0xff] }
 0x14e   :  { %v289_v34 = vpop.f32.mrf.mxu0 }
 0x14f   :  { %v290_v35 = vadd.f32 %v289_v34, %v168_v32  ;;  %v928_v32 = vld [vmem:[#allocation10 + $0x420] sm:$0xff]  ;;  %v6767_v34 = vcombine.low %v932_v20, %v936_v21 }
 0x150   :  { %v291_v36 = vpop.f32.mrf.mxu0  ;;  %v6759_v42 = vcombine.low %v924_v30, %v928_v32 }
 0x151   :  { %v292_v37 = vadd.f32 %v291_v36, %v172_v33  ;;  %v296_v38 = vmax.f32 %v290_v35, 0.0  ;;  %v6639_v33 = vcombine.low %v804_v18, %v808_v19  ;;  %v6632_v35 = vcombine.high %v796_v26, %v800_v27 }
 0x152   :  { %v293_v39 = vpop.f32.mrf.mxu0  ;;  %v6760_v36 = vcombine.high %v924_v30, %v928_v32 }
 0x153   :  { %v297_v41 = vmax.f32 %v292_v37, 0.0  ;;  %v298_v47 = vpack.c.bf16 %v296_v38, %v296_v38  ;;  %v916_v37 = vld [vmem:[#allocation10 + $0x3c0] sm:$0xff] }
 0x154   :  { %v294_v45 = vpop.f32.mrf.mxu0  ;;  %v920_v38 = vld [vmem:[#allocation10 + $0x3e0] sm:$0xff] }
 0x155   :  { %v299_v46 = vpack.c.bf16 %v297_v41, %v297_v41  ;;  %v1044_v39 = vld [vmem:[#allocation10 + $0x7c0] sm:$0xff]  ;;  %v6631_v41 = vcombine.low %v796_v26, %v800_v27  ;;  %v6752_v43 = vcombine.high %v916_v37, %v920_v38 }
 0x156   :  { %v6880_v44 = vcombine.high %v1044_v39, %v1048_v40  ;;  %v908_v45 = vld [vmem:[#allocation10 + $0x380] sm:$0xff]  ;;  %v6879_v50 = vcombine.low %v1044_v39, %v1048_v40 }
 0x157   :  { %738 = vmatprep.mubr.bf16.mxu1 %v299_v46  ;;  %779 = vmatprep.mubr.bf16.mxu0 %v299_v46  ;;  %v912_v46 = vld [vmem:[#allocation10 + $0x3a0] sm:$0xff] }
 0x158   :  { %739 = vmatmul.mubr.bf16.vlgmr.msra.gmra.mxu1 %v298_v47  ;;  %780 = vmatmul.mubr.bf16.vlgmr.msra.gmra.mxu0 %v298_v47  ;;  %v1036_v47 = vld [vmem:[#allocation10 + $0x780] sm:$0xff]  ;;  %v6744_v51 = vcombine.high %v908_v45, %v912_v46 }
 0x159   :  { %2375 = vmatpush1.bf16.msra.mxu1 %v6687_v22  ;;  %2416 = vmatpush1.bf16.msra.mxu0 %v6815_v25  ;;  %v6647_v22 = vcombine.low %v812_v10, %v816_v11  ;;  %v6768_v25 = vcombine.high %v932_v20, %v936_v21  ;;  %v1000_v27 = vld [vmem:[#allocation10 + $0x660] sm:$0xff] }
 0x15a   :  { %2376 = vmatprep.subr.bf16.mxu1 %v6680_v48  ;;  %2417 = vmatprep.subr.bf16.mxu0 %v6808_v49  ;;  %v1040_v48 = vld [vmem:[#allocation10 + $0x7a0] sm:$0xff]  ;;  %v6751_v49 = vcombine.low %v916_v37, %v920_v38 }
 0x15b   :  { %v6872_v52 = vcombine.high %v1036_v47, %v1040_v48  ;;  %v6871_v58 = vcombine.low %v1036_v47, %v1040_v48  ;;  %v992_v38 = vld [vmem:[#allocation10 + $0x620] sm:$0xff] }
 0x15d   :  { %2377 = vmatpush1.bf16.msra.mxu1 %v6679_v54  ;;  %2418 = vmatpush1.bf16.msra.mxu0 %v6807_v55  ;;  %v904_v54 = vld [vmem:[#allocation10 + $0x360] sm:$0xff] }
 0x15e   :  { %2378 = vmatprep.subr.bf16.mxu1 %v6672_v56  ;;  %2419 = vmatprep.subr.bf16.mxu0 %v6800_v57  ;;  %v1028_v55 = vld [vmem:[#allocation10 + $0x740] sm:$0xff]  ;;  %v6743_v57 = vcombine.low %v908_v45, %v912_v46  ;;  %v6736_v59 = vcombine.high %v900_v53, %v904_v54  ;;  %v985_v46 = vld [vmem:[#allocation10 + $0x5e8] sm:$0xff] }
 0x15f   :  { %v1032_v56 = vld [vmem:[#allocation10 + $0x760] sm:$0xff] }
 0x160   :  { %v6864_v60 = vcombine.high %v1028_v55, %v1032_v56  ;;  %v6863_v2 = vcombine.low %v1028_v55, %v1032_v56 }
 0x161   :  { %2379 = vmatpush1.bf16.msra.mxu1 %v6671_v62  ;;  %2420 = vmatpush1.bf16.msra.mxu0 %v6799_v63  ;;  %v896_v62 = vld [vmem:[#allocation10 + $0x320] sm:$0xff] }
 0x162   :  { %2380 = vmatprep.subr.bf16.mxu1 %v6664_v0  ;;  %2421 = vmatprep.subr.bf16.mxu0 %v6792_v1  ;;  %v1020_v63 = vld [vmem:[#allocation10 + $0x700] sm:$0xff]  ;;  %v6735_v1 = vcombine.low %v900_v53, %v904_v54  ;;  %v6728_v3 = vcombine.high %v892_v61, %v896_v62 }
 0x163   :  { %v1024_v0 = vld [vmem:[#allocation10 + $0x720] sm:$0xff] }
 0x164   :  { %v6856_v4 = vcombine.high %v1020_v63, %v1024_v0  ;;  %v6855_v10 = vcombine.low %v1020_v63, %v1024_v0 }
 0x165   :  { %2381 = vmatpush1.bf16.msra.mxu1 %v6663_v6  ;;  %2422 = vmatpush1.bf16.msra.mxu0 %v6791_v7  ;;  %v888_v6 = vld [vmem:[#allocation10 + $0x2e0] sm:$0xff] }
 0x166   :  { %2382 = vmatprep.subr.bf16.mxu1 %v6656_v8  ;;  %2423 = vmatprep.subr.bf16.mxu0 %v6784_v9  ;;  %v1012_v7 = vld [vmem:[#allocation10 + $0x6c0] sm:$0xff]  ;;  %v6727_v9 = vcombine.low %v892_v61, %v896_v62  ;;  %v6720_v11 = vcombine.high %v884_v5, %v888_v6 }
 0x167   :  { %v1016_v8 = vld [vmem:[#allocation10 + $0x6e0] sm:$0xff] }
 0x168   :  { %v6848_v12 = vcombine.high %v1012_v7, %v1016_v8  ;;  %v6847_v18 = vcombine.low %v1012_v7, %v1016_v8  ;;  %v845_v7 = vld [vmem:[#allocation10 + $0x188] sm:$0xff] }
 0x169   :  { %2383 = vmatpush1.bf16.msra.mxu1 %v6655_v14  ;;  %2424 = vmatpush1.bf16.msra.mxu0 %v6783_v15  ;;  %v880_v14 = vld [vmem:[#allocation10 + $0x2a0] sm:$0xff] }
 0x16a   :  { %2384 = vmatprep.subr.bf16.mxu1 %v6648_v16  ;;  %2425 = vmatprep.subr.bf16.mxu0 %v6776_v17  ;;  %v1004_v15 = vld [vmem:[#allocation10 + $0x680] sm:$0xff]  ;;  %v6719_v17 = vcombine.low %v884_v5, %v888_v6  ;;  %v6712_v19 = vcombine.high %v876_v13, %v880_v14  ;;  %v6711_v21 = vcombine.low %v876_v13, %v880_v14 }
 0x16b   :  { %v1008_v16 = vld [vmem:[#allocation10 + $0x6a0] sm:$0xff] }
 0x16c   :  { %v6840_v20 = vcombine.high %v1004_v15, %v1008_v16 }
 0x16d   :  { %2385 = vmatpush1.bf16.msra.mxu1 %v6647_v22  ;;  %2426 = vmatpush1.bf16.msra.mxu0 %v6775_v23  ;;  %v6839_v22 = vcombine.low %v1004_v15, %v1008_v16  ;;  %v868_v23 = vld [vmem:[#allocation10 + $0x240] sm:$0xff] }
 0x16e   :  { %2386 = vmatprep.subr.bf16.mxu1 %v6640_v24  ;;  %2427 = vmatprep.subr.bf16.mxu0 %v6768_v25  ;;  %v872_v24 = vld [vmem:[#allocation10 + $0x260] sm:$0xff] }
 0x16f   :  { %v996_v25 = vld [vmem:[#allocation10 + $0x640] sm:$0xff]  ;;  %v6704_v26 = vcombine.high %v868_v23, %v872_v24  ;;  %v6703_v30 = vcombine.low %v868_v23, %v872_v24 }
 0x170   :  { %v6831_v32 = vcombine.low %v996_v25, %v1000_v27 }
 0x171   :  { %2387 = vmatpush1.bf16.msra.mxu1 %v6639_v33  ;;  %2428 = vmatpush1.bf16.msra.mxu0 %v6767_v34  ;;  %v6832_v33 = vcombine.high %v996_v25, %v1000_v27  ;;  %v860_v34 = vld [vmem:[#allocation10 + $0x200] sm:$0xff]  ;;  %v829_v27 = vld [vmem:[#allocation10 + $0x108] sm:$0xff] }
 0x172   :  { %2388 = vmatprep.subr.bf16.mxu1 %v6632_v35  ;;  %2429 = vmatprep.subr.bf16.mxu0 %v6760_v36  ;;  %v864_v35 = vld [vmem:[#allocation10 + $0x220] sm:$0xff] }
 0x173   :  { %v988_v36 = vld [vmem:[#allocation10 + $0x600] sm:$0xff]  ;;  %v6696_v37 = vcombine.high %v860_v34, %v864_v35  ;;  %v6695_v39 = vcombine.low %v860_v34, %v864_v35 }
 0x174   :  { %v6823_v40 = vcombine.low %v988_v36, %v992_v38 }
 0x175   :  { %2389 = vmatpush1.bf16.msra.mxu1 %v6631_v41  ;;  %2430 = vmatpush1.bf16.msra.mxu0 %v6759_v42  ;;  %v6824_v41 = vcombine.high %v988_v36, %v992_v38  ;;  %v853_v42 = vld [vmem:[#allocation10 + $0x1c8] sm:$0xff] }
 0x176   :  { %2390 = vmatprep.subr.bf16.mxu1 %v6752_v43  ;;  %2431 = vmatprep.subr.bf16.mxu0 %v6880_v44  ;;  %v857_v43 = vld [vmem:[#allocation10 + $0x1e8] sm:$0xff] }
 0x177   :  { %v981_v44 = vld [vmem:[#allocation10 + $0x5c8] sm:$0xff]  ;;  %v6690_v45 = vcombine.high %v853_v42, %v857_v43  ;;  %v6689_v47 = vcombine.low %v853_v42, %v857_v43 }
 0x178   :  { %v6817_v48 = vcombine.low %v981_v44, %v985_v46  ;;  %v821_v38 = vld [vmem:[#allocation10 + $0xc8] sm:$0xff] }
 0x179   :  { %2391 = vmatpush2.bf16.msra.mxu1 %v6751_v49  ;;  %2432 = vmatpush2.bf16.msra.mxu0 %v6879_v50  ;;  %v6818_v49 = vcombine.high %v981_v44, %v985_v46  ;;  %v7849_v50 = vsub.s32 2, %v7838_v28  ;;  %v813_v46 = vld [vmem:[#allocation10 + $0x88] sm:$0xff] }
 0x17a   :  { %2392 = vmatprep.subr.bf16.mxu1 %v6744_v51  ;;  %2433 = vmatprep.subr.bf16.mxu0 %v6872_v52  ;;  %v364_v51 = vld [vmem:[#allocation9] sm:$0xf]  ;;  %v7852_v52 = vsub.s32 3, %v7838_v28 }
 0x17b   :  { %v369_v53 = vrot.slane %v364_v51, %v7841_v29  ;;  %v377_v54 = vrot.slane %v364_v51, %v7849_v50  ;;  %v373_v55 = vrot.slane %v364_v51, %v7844_v31 }
 0x17c   :  { %v381_v56 = vrot.slane %v364_v51, %v7852_v52 }
 0x17d   :  { %2393 = vmatpush2.bf16.msra.mxu1 %v6743_v57  ;;  %2434 = vmatpush2.bf16.msra.mxu0 %v6871_v58 }
 0x17e   :  { %2394 = vmatprep.subr.bf16.mxu1 %v6736_v59  ;;  %2435 = vmatprep.subr.bf16.mxu0 %v6864_v60 }
 0x181   :  { %2395 = vmatpush2.bf16.msra.mxu1 %v6735_v1  ;;  %2436 = vmatpush2.bf16.msra.mxu0 %v6863_v2 }
 0x182   :  { %2396 = vmatprep.subr.bf16.mxu1 %v6728_v3  ;;  %2437 = vmatprep.subr.bf16.mxu0 %v6856_v4 }
 0x185   :  { %2397 = vmatpush2.bf16.msra.mxu1 %v6727_v9  ;;  %2438 = vmatpush2.bf16.msra.mxu0 %v6855_v10  ;;  %v849_v10 = vld [vmem:[#allocation10 + $0x1a8] sm:$0xff] }
 0x186   :  { %2398 = vmatprep.subr.bf16.mxu1 %v6720_v11  ;;  %2439 = vmatprep.subr.bf16.mxu0 %v6848_v12  ;;  %v973_v11 = vld [vmem:[#allocation10 + $0x588] sm:$0xff]  ;;  %v6681_v23 = vcombine.low %v845_v7, %v849_v10 }
 0x187   :  { %v977_v12 = vld [vmem:[#allocation10 + $0x5a8] sm:$0xff] }
 0x188   :  { %v6809_v24 = vcombine.low %v973_v11, %v977_v12 }
 0x189   :  { %2399 = vmatpush2.bf16.msra.mxu1 %v6719_v17  ;;  %2440 = vmatpush2.bf16.msra.mxu0 %v6847_v18  ;;  %v837_v17 = vld [vmem:[#allocation10 + $0x148] sm:$0xff]  ;;  %v6682_v18 = vcombine.high %v845_v7, %v849_v10 }
 0x18a   :  { %2400 = vmatprep.subr.bf16.mxu1 %v6712_v19  ;;  %2441 = vmatprep.subr.bf16.mxu0 %v6840_v20  ;;  %v6810_v19 = vcombine.high %v973_v11, %v977_v12  ;;  %v841_v20 = vld [vmem:[#allocation10 + $0x168] sm:$0xff] }
 0x18b   :  { %v6674_v25 = vcombine.high %v837_v17, %v841_v20  ;;  %v6673_v34 = vcombine.low %v837_v17, %v841_v20  ;;  %v1045_v10 = vld [vmem:[#allocation10 + $0x7c8] sm:$0xff] }
 0x18c   :  { %v1049_v11 = vld [vmem:[#allocation10 + $0x7e8] sm:$0xff] }
 0x18d   :  { %2401 = vmatpush2.bf16.msra.mxu1 %v6711_v21  ;;  %2442 = vmatpush2.bf16.msra.mxu0 %v6839_v22  ;;  %v965_v21 = vld [vmem:[#allocation10 + $0x548] sm:$0xff] }
 0x18e   :  { %2402 = vmatprep.subr.bf16.mxu1 %v6704_v26  ;;  %2443 = vmatprep.subr.bf16.mxu0 %v6832_v33  ;;  %v969_v22 = vld [vmem:[#allocation10 + $0x568] sm:$0xff] }
 0x18f   :  { %v6802_v26 = vcombine.high %v965_v21, %v969_v22  ;;  %v961_v33 = vld [vmem:[#allocation10 + $0x528] sm:$0xff]  ;;  %v6801_v35 = vcombine.low %v965_v21, %v969_v22 }
 0x190   :  { %v909_v20 = vld [vmem:[#allocation10 + $0x388] sm:$0xff] }
 0x191   :  { %2403 = vmatpush2.bf16.msra.mxu1 %v6703_v30  ;;  %2444 = vmatpush2.bf16.msra.mxu0 %v6831_v32  ;;  %v833_v30 = vld [vmem:[#allocation10 + $0x128] sm:$0xff] }
 0x192   :  { %2404 = vmatprep.subr.bf16.mxu1 %v6696_v37  ;;  %2445 = vmatprep.subr.bf16.mxu0 %v6824_v41  ;;  %v957_v32 = vld [vmem:[#allocation10 + $0x508] sm:$0xff]  ;;  %v6666_v36 = vcombine.high %v829_v27, %v833_v30  ;;  %v6665_v42 = vcombine.low %v829_v27, %v833_v30 }
 0x193   :  { %v6794_v37 = vcombine.high %v957_v32, %v961_v33  ;;  %v953_v41 = vld [vmem:[#allocation10 + $0x4e8] sm:$0xff]  ;;  %v6793_v43 = vcombine.low %v957_v32, %v961_v33 }
 0x194   :  { %v913_v21 = vld [vmem:[#allocation10 + $0x3a8] sm:$0xff] }
 0x195   :  { %2405 = vmatpush2.bf16.msra.mxu1 %v6695_v39  ;;  %2446 = vmatpush2.bf16.msra.mxu0 %v6823_v40  ;;  %v825_v39 = vld [vmem:[#allocation10 + $0xe8] sm:$0xff] }
 0x196   :  { %2456 = vmatprep.subr.bf16.mxu1 %v6690_v45  ;;  %2497 = vmatprep.subr.bf16.mxu0 %v6818_v49  ;;  %v949_v40 = vld [vmem:[#allocation10 + $0x4c8] sm:$0xff]  ;;  %v6658_v44 = vcombine.high %v821_v38, %v825_v39  ;;  %v6657_v51 = vcombine.low %v821_v38, %v825_v39 }
 0x197   :  { %v6786_v45 = vcombine.high %v949_v40, %v953_v41  ;;  %v945_v49 = vld [vmem:[#allocation10 + $0x4a8] sm:$0xff] }
 0x198   :  { %v1037_v22 = vld [vmem:[#allocation10 + $0x788] sm:$0xff] }
 0x199   :  { %v901_v30 = vld [vmem:[#allocation10 + $0x348] sm:$0xff] }
 0x19a   :  { %v905_v32 = vld [vmem:[#allocation10 + $0x368] sm:$0xff] }
 0x19b   :  { %v1029_v33 = vld [vmem:[#allocation10 + $0x748] sm:$0xff] }
 0x19c   :  { %v893_v39 = vld [vmem:[#allocation10 + $0x308] sm:$0xff] }
 0x218   :  { %v740_v57 = vpop.f32.mrf.mxu1  ;;  %v781_v58 = vpop.f32.mrf.mxu0 }
 0x219   :  { %v741_v59 = vadd.f32 %v740_v57, %v369_v53  ;;  %v782_v60 = vadd.f32 %v781_v58, %v377_v54  ;;  %v6785_v53 = vcombine.low %v949_v40, %v953_v41  ;;  %v809_v57 = vld [vmem:[#allocation10 + $0x68] sm:$0xff] }
 0x21a   :  { %v742_v61 = vpop.f32.mrf.mxu1  ;;  %v783_v62 = vpop.f32.mrf.mxu0  ;;  %v933_v58 = vld [vmem:[#allocation10 + $0x448] sm:$0xff] }
 0x21b   :  { %v743_v63 = vadd.f32 %v742_v61, %v373_v55  ;;  %v784_v0 = vadd.f32 %v783_v62, %v381_v56  ;;  %v788_v1 = vmax.f32 %v741_v59, 0.0  ;;  %v790_v2 = vmax.f32 %v782_v60, 0.0  ;;  %v805_v56 = vld [vmem:[#allocation10 + $0x48] sm:$0xff] }
 0x21c   :  { %v744_v3 = vpop.f32.mrf.mxu1  ;;  %v785_v4 = vpop.f32.mrf.mxu0  ;;  %v937_v59 = vld [vmem:[#allocation10 + $0x468] sm:$0xff]  ;;  %v6642_v62 = vcombine.high %v805_v56, %v809_v57 }
 0x21d   :  { %v789_v5 = vmax.f32 %v743_v63, 0.0  ;;  %v791_v6 = vmax.f32 %v784_v0, 0.0  ;;  %v7862_v15 = vpack.c.bf16 %v788_v1, %v788_v1  ;;  %v7864_v16 = vpack.c.bf16 %v790_v2, %v790_v2  ;;  %v797_v0 = vld [vmem:[#allocation10 + $0x8] sm:$0xff] }
 0x21e   :  { %v745_v8 = vpop.f32.mrf.mxu1  ;;  %v786_v9 = vpop.f32.mrf.mxu0  ;;  %v6770_v63 = vcombine.high %v933_v58, %v937_v59  ;;  %v801_v1 = vld [vmem:[#allocation10 + $0x28] sm:$0xff]  ;;  %v6641_v4 = vcombine.low %v805_v56, %v809_v57 }
 0x21f   :  { %v7858_v13 = vpack.c.bf16 %v789_v5, %v789_v5  ;;  %v7860_v14 = vpack.c.bf16 %v791_v6, %v791_v6  ;;  %v925_v2 = vld [vmem:[#allocation10 + $0x408] sm:$0xff]  ;;  %v6769_v5 = vcombine.low %v933_v58, %v937_v59  ;;  %v6634_v6 = vcombine.high %v797_v0, %v801_v1 }
 0x220   :  { %v929_v3 = vld [vmem:[#allocation10 + $0x428] sm:$0xff]  ;;  %v6633_v12 = vcombine.low %v797_v0, %v801_v1 }
 0x221   :  { %2406 = vmatprep.mubr.bf16.mxu1 %v7858_v13  ;;  %2447 = vmatprep.mubr.bf16.mxu0 %v7860_v14  ;;  %v6762_v7 = vcombine.high %v925_v2, %v929_v3  ;;  %v917_v8 = vld [vmem:[#allocation10 + $0x3c8] sm:$0xff]  ;;  %v6761_v17 = vcombine.low %v925_v2, %v929_v3 }
 0x222   :  { %2407 = vmatmul.mubr.bf16.vlgmr.msra.gmra.mxu1 %v7862_v15  ;;  %2448 = vmatmul.mubr.bf16.vlgmr.msra.gmra.mxu0 %v7864_v16  ;;  %v921_v9 = vld [vmem:[#allocation10 + $0x3e8] sm:$0xff] }
 0x223   :  { %2457 = vmatpush1.bf16.msra.mxu1 %v6689_v47  ;;  %2498 = vmatpush1.bf16.msra.mxu0 %v6817_v48  ;;  %v817_v47 = vld [vmem:[#allocation10 + $0xa8] sm:$0xff] }
 0x224   :  { %2488 = vmatprep.mubr.bf16.mxu1 %v7858_v13  ;;  %2529 = vmatprep.mubr.bf16.mxu0 %v7860_v14  ;;  %v941_v48 = vld [vmem:[#allocation10 + $0x488] sm:$0xff]  ;;  %v6650_v54 = vcombine.high %v813_v46, %v817_v47  ;;  %v6649_v60 = vcombine.low %v813_v46, %v817_v47 }
 0x225   :  { %2458 = vmatprep.subr.bf16.mxu1 %v6682_v18  ;;  %2499 = vmatprep.subr.bf16.mxu0 %v6810_v19  ;;  %v6778_v55 = vcombine.high %v941_v48, %v945_v49  ;;  %v6777_v61 = vcombine.low %v941_v48, %v945_v49  ;;  %v6754_v18 = vcombine.high %v917_v8, %v921_v9  ;;  %v897_v40 = vld [vmem:[#allocation10 + $0x328] sm:$0xff] }
 0x226   :  { %v6882_v19 = vcombine.high %v1045_v10, %v1049_v11  ;;  %v1021_v41 = vld [vmem:[#allocation10 + $0x708] sm:$0xff] }
 0x227   :  { %2459 = vmatpush1.bf16.msra.mxu1 %v6681_v23  ;;  %2500 = vmatpush1.bf16.msra.mxu0 %v6809_v24  ;;  %v1041_v23 = vld [vmem:[#allocation10 + $0x7a8] sm:$0xff]  ;;  %v6753_v24 = vcombine.low %v917_v8, %v921_v9 }
 0x228   :  { %2460 = vmatprep.subr.bf16.mxu1 %v6674_v25  ;;  %2501 = vmatprep.subr.bf16.mxu0 %v6802_v26  ;;  %v6881_v25 = vcombine.low %v1045_v10, %v1049_v11  ;;  %v6746_v26 = vcombine.high %v909_v20, %v913_v21  ;;  %v6874_v27 = vcombine.high %v1037_v22, %v1041_v23  ;;  %v885_v47 = vld [vmem:[#allocation10 + $0x2c8] sm:$0xff] }
 0x229   :  { %v889_v48 = vld [vmem:[#allocation10 + $0x2e8] sm:$0xff] }
 0x22a   :  { %v1013_v49 = vld [vmem:[#allocation10 + $0x6c8] sm:$0xff] }
 0x22b   :  { %2461 = vmatpush1.bf16.msra.mxu1 %v6673_v34  ;;  %2502 = vmatpush1.bf16.msra.mxu0 %v6801_v35  ;;  %v1033_v34 = vld [vmem:[#allocation10 + $0x768] sm:$0xff]  ;;  %v6745_v35 = vcombine.low %v909_v20, %v913_v21  ;;  %v854_v21 = vld [vmem:[#allocation10 + $0x1d0] sm:$0xff] }
 0x22c   :  { %2462 = vmatprep.subr.bf16.mxu1 %v6666_v36  ;;  %2503 = vmatprep.subr.bf16.mxu0 %v6794_v37  ;;  %v6873_v36 = vcombine.low %v1037_v22, %v1041_v23  ;;  %v6738_v37 = vcombine.high %v901_v30, %v905_v32  ;;  %v6866_v38 = vcombine.high %v1029_v33, %v1033_v34  ;;  %v877_v57 = vld [vmem:[#allocation10 + $0x288] sm:$0xff]  ;;  %v858_v22 = vld [vmem:[#allocation10 + $0x1f0] sm:$0xff] }
 0x22d   :  { %v881_v58 = vld [vmem:[#allocation10 + $0x2a8] sm:$0xff]  ;;  %v982_v23 = vld [vmem:[#allocation10 + $0x5d0] sm:$0xff] }
 0x22e   :  { %v1005_v59 = vld [vmem:[#allocation10 + $0x688] sm:$0xff] }
 0x22f   :  { %2463 = vmatpush1.bf16.msra.mxu1 %v6665_v42  ;;  %2504 = vmatpush1.bf16.msra.mxu0 %v6793_v43  ;;  %v1025_v42 = vld [vmem:[#allocation10 + $0x728] sm:$0xff]  ;;  %v6737_v43 = vcombine.low %v901_v30, %v905_v32  ;;  %v846_v32 = vld [vmem:[#allocation10 + $0x190] sm:$0xff] }
 0x230   :  { %2464 = vmatprep.subr.bf16.mxu1 %v6658_v44  ;;  %2505 = vmatprep.subr.bf16.mxu0 %v6786_v45  ;;  %v6865_v44 = vcombine.low %v1029_v33, %v1033_v34  ;;  %v6730_v45 = vcombine.high %v893_v39, %v897_v40  ;;  %v6858_v46 = vcombine.high %v1021_v41, %v1025_v42  ;;  %v869_v1 = vld [vmem:[#allocation10 + $0x248] sm:$0xff]  ;;  %v850_v33 = vld [vmem:[#allocation10 + $0x1b0] sm:$0xff] }
 0x231   :  { %v873_v2 = vld [vmem:[#allocation10 + $0x268] sm:$0xff]  ;;  %v974_v34 = vld [vmem:[#allocation10 + $0x590] sm:$0xff] }
 0x232   :  { %v997_v3 = vld [vmem:[#allocation10 + $0x648] sm:$0xff] }
 0x233   :  { %2465 = vmatpush1.bf16.msra.mxu1 %v6657_v51  ;;  %2506 = vmatpush1.bf16.msra.mxu0 %v6785_v53  ;;  %v1017_v51 = vld [vmem:[#allocation10 + $0x6e8] sm:$0xff]  ;;  %v6729_v53 = vcombine.low %v893_v39, %v897_v40  ;;  %v838_v40 = vld [vmem:[#allocation10 + $0x150] sm:$0xff] }
 0x234   :  { %2466 = vmatprep.subr.bf16.mxu1 %v6650_v54  ;;  %2507 = vmatprep.subr.bf16.mxu0 %v6778_v55  ;;  %v6857_v54 = vcombine.low %v1021_v41, %v1025_v42  ;;  %v6722_v55 = vcombine.high %v885_v47, %v889_v48  ;;  %v6850_v56 = vcombine.high %v1013_v49, %v1017_v51  ;;  %v861_v9 = vld [vmem:[#allocation10 + $0x208] sm:$0xff]  ;;  %v842_v41 = vld [vmem:[#allocation10 + $0x170] sm:$0xff] }
 0x235   :  { %v865_v10 = vld [vmem:[#allocation10 + $0x228] sm:$0xff]  ;;  %v966_v42 = vld [vmem:[#allocation10 + $0x550] sm:$0xff] }
 0x236   :  { %v989_v11 = vld [vmem:[#allocation10 + $0x608] sm:$0xff] }
 0x237   :  { %2467 = vmatpush1.bf16.msra.mxu1 %v6649_v60  ;;  %2508 = vmatpush1.bf16.msra.mxu0 %v6777_v61  ;;  %v1009_v60 = vld [vmem:[#allocation10 + $0x6a8] sm:$0xff]  ;;  %v6721_v61 = vcombine.low %v885_v47, %v889_v48  ;;  %v830_v48 = vld [vmem:[#allocation10 + $0x110] sm:$0xff] }
 0x238   :  { %2468 = vmatprep.subr.bf16.mxu1 %v6642_v62  ;;  %2509 = vmatprep.subr.bf16.mxu0 %v6770_v63  ;;  %v6849_v62 = vcombine.low %v1013_v49, %v1017_v51  ;;  %v6714_v63 = vcombine.high %v877_v57, %v881_v58  ;;  %v6842_v0 = vcombine.high %v1005_v59, %v1009_v60  ;;  %v834_v49 = vld [vmem:[#allocation10 + $0x130] sm:$0xff] }
 0x239   :  { %v958_v51 = vld [vmem:[#allocation10 + $0x510] sm:$0xff] }
 0x23b   :  { %2469 = vmatpush1.bf16.msra.mxu1 %v6641_v4  ;;  %2510 = vmatpush1.bf16.msra.mxu0 %v6769_v5  ;;  %v1001_v4 = vld [vmem:[#allocation10 + $0x668] sm:$0xff]  ;;  %v6713_v5 = vcombine.low %v877_v57, %v881_v58  ;;  %v822_v58 = vld [vmem:[#allocation10 + $0xd0] sm:$0xff] }
 0x23c   :  { %2470 = vmatprep.subr.bf16.mxu1 %v6634_v6  ;;  %2511 = vmatprep.subr.bf16.mxu0 %v6762_v7  ;;  %v6841_v6 = vcombine.low %v1005_v59, %v1009_v60  ;;  %v6706_v7 = vcombine.high %v869_v1, %v873_v2  ;;  %v6834_v8 = vcombine.high %v997_v3, %v1001_v4  ;;  %v826_v59 = vld [vmem:[#allocation10 + $0xf0] sm:$0xff] }
 0x23d   :  { %v950_v60 = vld [vmem:[#allocation10 + $0x4d0] sm:$0xff] }
 0x23f   :  { %2471 = vmatpush1.bf16.msra.mxu1 %v6633_v12  ;;  %2512 = vmatpush1.bf16.msra.mxu0 %v6761_v17  ;;  %v993_v12 = vld [vmem:[#allocation10 + $0x628] sm:$0xff]  ;;  %v6705_v17 = vcombine.low %v869_v1, %v873_v2  ;;  %v814_v2 = vld [vmem:[#allocation10 + $0x90] sm:$0xff] }
 0x240   :  { %2472 = vmatprep.subr.bf16.mxu1 %v6754_v18  ;;  %2513 = vmatprep.subr.bf16.mxu0 %v6882_v19  ;;  %v6833_v18 = vcombine.low %v997_v3, %v1001_v4  ;;  %v6698_v19 = vcombine.high %v861_v9, %v865_v10  ;;  %v6826_v20 = vcombine.high %v989_v11, %v993_v12  ;;  %v818_v3 = vld [vmem:[#allocation10 + $0xb0] sm:$0xff] }
 0x241   :  { %v942_v4 = vld [vmem:[#allocation10 + $0x490] sm:$0xff] }
 0x243   :  { %2473 = vmatpush2.bf16.msra.mxu1 %v6753_v24  ;;  %2514 = vmatpush2.bf16.msra.mxu0 %v6881_v25  ;;  %v986_v24 = vld [vmem:[#allocation10 + $0x5f0] sm:$0xff]  ;;  %v6697_v25 = vcombine.low %v861_v9, %v865_v10 }
 0x244   :  { %2474 = vmatprep.subr.bf16.mxu1 %v6746_v26  ;;  %2515 = vmatprep.subr.bf16.mxu0 %v6874_v27  ;;  %v6825_v26 = vcombine.low %v989_v11, %v993_v12  ;;  %v6692_v27 = vcombine.high %v854_v21, %v858_v22  ;;  %v6820_v30 = vcombine.high %v982_v23, %v986_v24  ;;  %v806_v10 = vld [vmem:[#allocation10 + $0x50] sm:$0xff] }
 0x245   :  { %v810_v11 = vld [vmem:[#allocation10 + $0x70] sm:$0xff] }
 0x246   :  { %v934_v12 = vld [vmem:[#allocation10 + $0x450] sm:$0xff] }
 0x247   :  { %2475 = vmatpush2.bf16.msra.mxu1 %v6745_v35  ;;  %2516 = vmatpush2.bf16.msra.mxu0 %v6873_v36  ;;  %v978_v35 = vld [vmem:[#allocation10 + $0x5b0] sm:$0xff]  ;;  %v6691_v36 = vcombine.low %v854_v21, %v858_v22 }
 0x248   :  { %2476 = vmatprep.subr.bf16.mxu1 %v6738_v37  ;;  %2517 = vmatprep.subr.bf16.mxu0 %v6866_v38  ;;  %v6819_v37 = vcombine.low %v982_v23, %v986_v24  ;;  %v6684_v38 = vcombine.high %v846_v32, %v850_v33  ;;  %v6812_v39 = vcombine.high %v974_v34, %v978_v35  ;;  %v798_v22 = vld [vmem:[#allocation10 + $0x10] sm:$0xff] }
 0x249   :  { %v802_v23 = vld [vmem:[#allocation10 + $0x30] sm:$0xff] }
 0x24a   :  { %v926_v24 = vld [vmem:[#allocation10 + $0x410] sm:$0xff] }
 0x24b   :  { %2477 = vmatpush2.bf16.msra.mxu1 %v6737_v43  ;;  %2518 = vmatpush2.bf16.msra.mxu0 %v6865_v44  ;;  %v970_v43 = vld [vmem:[#allocation10 + $0x570] sm:$0xff]  ;;  %v6683_v44 = vcombine.low %v846_v32, %v850_v33 }
 0x24c   :  { %2478 = vmatprep.subr.bf16.mxu1 %v6730_v45  ;;  %2519 = vmatprep.subr.bf16.mxu0 %v6858_v46  ;;  %v6811_v45 = vcombine.low %v974_v34, %v978_v35  ;;  %v6676_v46 = vcombine.high %v838_v40, %v842_v41  ;;  %v6804_v47 = vcombine.high %v966_v42, %v970_v43  ;;  %v918_v33 = vld [vmem:[#allocation10 + $0x3d0] sm:$0xff] }
 0x24d   :  { %v922_v34 = vld [vmem:[#allocation10 + $0x3f0] sm:$0xff] }
 0x24e   :  { %v1046_v35 = vld [vmem:[#allocation10 + $0x7d0] sm:$0xff] }
 0x24f   :  { %2479 = vmatpush2.bf16.msra.mxu1 %v6729_v53  ;;  %2520 = vmatpush2.bf16.msra.mxu0 %v6857_v54  ;;  %v962_v53 = vld [vmem:[#allocation10 + $0x530] sm:$0xff]  ;;  %v6675_v54 = vcombine.low %v838_v40, %v842_v41 }
 0x250   :  { %2480 = vmatprep.subr.bf16.mxu1 %v6722_v55  ;;  %2521 = vmatprep.subr.bf16.mxu0 %v6850_v56  ;;  %v6803_v55 = vcombine.low %v966_v42, %v970_v43  ;;  %v6668_v56 = vcombine.high %v830_v48, %v834_v49  ;;  %v6796_v57 = vcombine.high %v958_v51, %v962_v53  ;;  %v910_v41 = vld [vmem:[#allocation10 + $0x390] sm:$0xff] }
 0x251   :  { %v914_v42 = vld [vmem:[#allocation10 + $0x3b0] sm:$0xff] }
 0x252   :  { %v1038_v43 = vld [vmem:[#allocation10 + $0x790] sm:$0xff] }
 0x253   :  { %2481 = vmatpush2.bf16.msra.mxu1 %v6721_v61  ;;  %2522 = vmatpush2.bf16.msra.mxu0 %v6849_v62  ;;  %v954_v61 = vld [vmem:[#allocation10 + $0x4f0] sm:$0xff]  ;;  %v6667_v62 = vcombine.low %v830_v48, %v834_v49 }
 0x254   :  { %2482 = vmatprep.subr.bf16.mxu1 %v6714_v63  ;;  %2523 = vmatprep.subr.bf16.mxu0 %v6842_v0  ;;  %v6795_v63 = vcombine.low %v958_v51, %v962_v53  ;;  %v6660_v0 = vcombine.high %v822_v58, %v826_v59  ;;  %v6788_v1 = vcombine.high %v950_v60, %v954_v61  ;;  %v902_v49 = vld [vmem:[#allocation10 + $0x350] sm:$0xff] }
 0x255   :  { %v906_v51 = vld [vmem:[#allocation10 + $0x370] sm:$0xff] }
 0x256   :  { %v1030_v53 = vld [vmem:[#allocation10 + $0x750] sm:$0xff] }
 0x257   :  { %2483 = vmatpush2.bf16.msra.mxu1 %v6713_v5  ;;  %2524 = vmatpush2.bf16.msra.mxu0 %v6841_v6  ;;  %v946_v5 = vld [vmem:[#allocation10 + $0x4b0] sm:$0xff]  ;;  %v6659_v6 = vcombine.low %v822_v58, %v826_v59 }
 0x258   :  { %2484 = vmatprep.subr.bf16.mxu1 %v6706_v7  ;;  %2525 = vmatprep.subr.bf16.mxu0 %v6834_v8  ;;  %v6787_v7 = vcombine.low %v950_v60, %v954_v61  ;;  %v6652_v8 = vcombine.high %v814_v2, %v818_v3  ;;  %v6780_v9 = vcombine.high %v942_v4, %v946_v5  ;;  %v894_v59 = vld [vmem:[#allocation10 + $0x310] sm:$0xff] }
 0x259   :  { %v898_v60 = vld [vmem:[#allocation10 + $0x330] sm:$0xff] }
 0x25a   :  { %v1022_v61 = vld [vmem:[#allocation10 + $0x710] sm:$0xff] }
 0x25b   :  { %2485 = vmatpush2.bf16.msra.mxu1 %v6705_v17  ;;  %2526 = vmatpush2.bf16.msra.mxu0 %v6833_v18  ;;  %v938_v17 = vld [vmem:[#allocation10 + $0x470] sm:$0xff]  ;;  %v6651_v18 = vcombine.low %v814_v2, %v818_v3 }
 0x25c   :  { %2486 = vmatprep.subr.bf16.mxu1 %v6698_v19  ;;  %2527 = vmatprep.subr.bf16.mxu0 %v6826_v20  ;;  %v6779_v19 = vcombine.low %v942_v4, %v946_v5  ;;  %v6644_v20 = vcombine.high %v806_v10, %v810_v11  ;;  %v6772_v21 = vcombine.high %v934_v12, %v938_v17  ;;  %v886_v3 = vld [vmem:[#allocation10 + $0x2d0] sm:$0xff] }
 0x25d   :  { %v890_v4 = vld [vmem:[#allocation10 + $0x2f0] sm:$0xff] }
 0x25e   :  { %v1014_v5 = vld [vmem:[#allocation10 + $0x6d0] sm:$0xff] }
 0x25f   :  { %2487 = vmatpush2.bf16.msra.mxu1 %v6697_v25  ;;  %2528 = vmatpush2.bf16.msra.mxu0 %v6825_v26  ;;  %v930_v25 = vld [vmem:[#allocation10 + $0x430] sm:$0xff]  ;;  %v6643_v26 = vcombine.low %v806_v10, %v810_v11 }
 0x260   :  { %2538 = vmatprep.subr.bf16.mxu1 %v6692_v27  ;;  %2579 = vmatprep.subr.bf16.mxu0 %v6820_v30  ;;  %v6771_v27 = vcombine.low %v934_v12, %v938_v17  ;;  %v6636_v30 = vcombine.high %v798_v22, %v802_v23  ;;  %v6764_v32 = vcombine.high %v926_v24, %v930_v25  ;;  %v878_v11 = vld [vmem:[#allocation10 + $0x290] sm:$0xff] }
 0x261   :  { %v882_v12 = vld [vmem:[#allocation10 + $0x2b0] sm:$0xff] }
 0x262   :  { %2489 = vmatmul.mubr.bf16.vlgmr.msra.gmra.mxu1 %v7862_v15  ;;  %2530 = vmatmul.mubr.bf16.vlgmr.msra.gmra.mxu0 %v7864_v16  ;;  %v1006_v17 = vld [vmem:[#allocation10 + $0x690] sm:$0xff] }
 0x263   :  { %2539 = vmatpush1.bf16.msra.mxu1 %v6691_v36  ;;  %2570 = vmatprep.mubr.bf16.mxu1 %v7858_v13  ;;  %v1050_v36 = vld [vmem:[#allocation10 + $0x7f0] sm:$0xff] }
 0x264   :  { %2580 = vmatpush1.bf16.msra.mxu0 %v6819_v37  ;;  %2611 = vmatprep.mubr.bf16.mxu0 %v7860_v14  ;;  %v6635_v37 = vcombine.low %v798_v22, %v802_v23  ;;  %v6884_v40 = vcombine.high %v1046_v35, %v1050_v36  ;;  %v870_v23 = vld [vmem:[#allocation10 + $0x250] sm:$0xff] }
 0x265   :  { %2540 = vmatprep.subr.bf16.mxu1 %v6684_v38  ;;  %2581 = vmatprep.subr.bf16.mxu0 %v6812_v39  ;;  %v6763_v38 = vcombine.low %v926_v24, %v930_v25  ;;  %v6756_v39 = vcombine.high %v918_v33, %v922_v34  ;;  %v874_v24 = vld [vmem:[#allocation10 + $0x270] sm:$0xff] }
 0x266   :  { %v998_v25 = vld [vmem:[#allocation10 + $0x650] sm:$0xff] }
 0x267   :  { %2541 = vmatpush1.bf16.msra.mxu1 %v6683_v44  ;;  %v1042_v44 = vld [vmem:[#allocation10 + $0x7b0] sm:$0xff] }
 0x268   :  { %2582 = vmatpush1.bf16.msra.mxu0 %v6811_v45  ;;  %2542 = vmatprep.subr.bf16.mxu1 %v6676_v46  ;;  %v6755_v45 = vcombine.low %v918_v33, %v922_v34  ;;  %v6883_v46 = vcombine.low %v1046_v35, %v1050_v36  ;;  %v6876_v48 = vcombine.high %v1038_v43, %v1042_v44  ;;  %v862_v34 = vld [vmem:[#allocation10 + $0x210] sm:$0xff] }
 0x269   :  { %2583 = vmatprep.subr.bf16.mxu0 %v6804_v47  ;;  %v6748_v47 = vcombine.high %v910_v41, %v914_v42  ;;  %v866_v35 = vld [vmem:[#allocation10 + $0x230] sm:$0xff] }
 0x26a   :  { %v990_v36 = vld [vmem:[#allocation10 + $0x610] sm:$0xff] }
 0x26b   :  { %2543 = vmatpush1.bf16.msra.mxu1 %v6675_v54  ;;  %v1034_v54 = vld [vmem:[#allocation10 + $0x770] sm:$0xff] }
 0x26c   :  { %2584 = vmatpush1.bf16.msra.mxu0 %v6803_v55  ;;  %2544 = vmatprep.subr.bf16.mxu1 %v6668_v56  ;;  %v6747_v55 = vcombine.low %v910_v41, %v914_v42  ;;  %v6875_v56 = vcombine.low %v1038_v43, %v1042_v44  ;;  %v6868_v58 = vcombine.high %v1030_v53, %v1034_v54  ;;  %v855_v42 = vld [vmem:[#allocation10 + $0x1d8] sm:$0xff] }
 0x26d   :  { %2585 = vmatprep.subr.bf16.mxu0 %v6796_v57  ;;  %v6740_v57 = vcombine.high %v902_v49, %v906_v51  ;;  %v859_v43 = vld [vmem:[#allocation10 + $0x1f8] sm:$0xff] }
 0x26e   :  { %v983_v44 = vld [vmem:[#allocation10 + $0x5d8] sm:$0xff] }
 0x26f   :  { %2545 = vmatpush1.bf16.msra.mxu1 %v6667_v62  ;;  %v1026_v62 = vld [vmem:[#allocation10 + $0x730] sm:$0xff] }
 0x270   :  { %2586 = vmatpush1.bf16.msra.mxu0 %v6795_v63  ;;  %2546 = vmatprep.subr.bf16.mxu1 %v6660_v0  ;;  %v6739_v63 = vcombine.low %v902_v49, %v906_v51  ;;  %v6867_v0 = vcombine.low %v1030_v53, %v1034_v54  ;;  %v6860_v2 = vcombine.high %v1022_v61, %v1026_v62  ;;  %v847_v51 = vld [vmem:[#allocation10 + $0x198] sm:$0xff] }
 0x271   :  { %2587 = vmatprep.subr.bf16.mxu0 %v6788_v1  ;;  %v6732_v1 = vcombine.high %v894_v59, %v898_v60  ;;  %v851_v53 = vld [vmem:[#allocation10 + $0x1b8] sm:$0xff]  ;;  %v6693_v54 = vcombine.low %v855_v42, %v859_v43 }
 0x273   :  { %2547 = vmatpush1.bf16.msra.mxu1 %v6659_v6  ;;  %v1018_v6 = vld [vmem:[#allocation10 + $0x6f0] sm:$0xff] }
 0x274   :  { %2588 = vmatpush1.bf16.msra.mxu0 %v6787_v7  ;;  %2548 = vmatprep.subr.bf16.mxu1 %v6652_v8  ;;  %v6731_v7 = vcombine.low %v894_v59, %v898_v60  ;;  %v6859_v8 = vcombine.low %v1022_v61, %v1026_v62  ;;  %v6852_v10 = vcombine.high %v1014_v5, %v1018_v6  ;;  %v839_v59 = vld [vmem:[#allocation10 + $0x158] sm:$0xff] }
 0x275   :  { %2589 = vmatprep.subr.bf16.mxu0 %v6780_v9  ;;  %v6724_v9 = vcombine.high %v886_v3, %v890_v4  ;;  %v843_v60 = vld [vmem:[#allocation10 + $0x178] sm:$0xff] }
 0x276   :  { %v967_v62 = vld [vmem:[#allocation10 + $0x558] sm:$0xff] }
 0x277   :  { %2549 = vmatpush1.bf16.msra.mxu1 %v6651_v18  ;;  %v1010_v18 = vld [vmem:[#allocation10 + $0x6b0] sm:$0xff] }
 0x278   :  { %2590 = vmatpush1.bf16.msra.mxu0 %v6779_v19  ;;  %2550 = vmatprep.subr.bf16.mxu1 %v6644_v20  ;;  %v6723_v19 = vcombine.low %v886_v3, %v890_v4  ;;  %v6851_v20 = vcombine.low %v1014_v5, %v1018_v6  ;;  %v6844_v22 = vcombine.high %v1006_v17, %v1010_v18  ;;  %v831_v4 = vld [vmem:[#allocation10 + $0x118] sm:$0xff] }
 0x279   :  { %2591 = vmatprep.subr.bf16.mxu0 %v6772_v21  ;;  %v6716_v21 = vcombine.high %v878_v11, %v882_v12  ;;  %v835_v5 = vld [vmem:[#allocation10 + $0x138] sm:$0xff] }
 0x27a   :  { %v959_v6 = vld [vmem:[#allocation10 + $0x518] sm:$0xff] }
 0x27b   :  { %2551 = vmatpush1.bf16.msra.mxu1 %v6643_v26  ;;  %v1002_v26 = vld [vmem:[#allocation10 + $0x670] sm:$0xff] }
 0x27c   :  { %2592 = vmatpush1.bf16.msra.mxu0 %v6771_v27  ;;  %2552 = vmatprep.subr.bf16.mxu1 %v6636_v30  ;;  %v6715_v27 = vcombine.low %v878_v11, %v882_v12  ;;  %v6843_v30 = vcombine.low %v1006_v17, %v1010_v18  ;;  %v6836_v33 = vcombine.high %v998_v25, %v1002_v26  ;;  %v823_v11 = vld [vmem:[#allocation10 + $0xd8] sm:$0xff] }
 0x27d   :  { %2593 = vmatprep.subr.bf16.mxu0 %v6764_v32  ;;  %v6708_v32 = vcombine.high %v870_v23, %v874_v24  ;;  %v827_v12 = vld [vmem:[#allocation10 + $0xf8] sm:$0xff] }
 0x27e   :  { %v951_v17 = vld [vmem:[#allocation10 + $0x4d8] sm:$0xff] }
 0x27f   :  { %2553 = vmatpush1.bf16.msra.mxu1 %v6635_v37  ;;  %v994_v37 = vld [vmem:[#allocation10 + $0x630] sm:$0xff]  ;;  %v955_v18 = vld [vmem:[#allocation10 + $0x4f8] sm:$0xff] }
 0x280   :  { %2594 = vmatpush1.bf16.msra.mxu0 %v6763_v38  ;;  %2554 = vmatprep.subr.bf16.mxu1 %v6756_v39  ;;  %v6707_v38 = vcombine.low %v870_v23, %v874_v24  ;;  %v6835_v39 = vcombine.low %v998_v25, %v1002_v26  ;;  %v6828_v41 = vcombine.high %v990_v36, %v994_v37  ;;  %v819_v23 = vld [vmem:[#allocation10 + $0xb8] sm:$0xff] }
 0x281   :  { %2595 = vmatprep.subr.bf16.mxu0 %v6884_v40  ;;  %v6700_v40 = vcombine.high %v862_v34, %v866_v35  ;;  %v943_v24 = vld [vmem:[#allocation10 + $0x498] sm:$0xff]  ;;  %v6661_v26 = vcombine.low %v823_v11, %v827_v12 }
 0x282   :  { %v947_v25 = vld [vmem:[#allocation10 + $0x4b8] sm:$0xff] }
 0x283   :  { %2555 = vmatpush2.bf16.msra.mxu1 %v6755_v45  ;;  %v987_v45 = vld [vmem:[#allocation10 + $0x5f8] sm:$0xff] }
 0x284   :  { %2596 = vmatpush2.bf16.msra.mxu0 %v6883_v46  ;;  %2556 = vmatprep.subr.bf16.mxu1 %v6748_v47  ;;  %v6699_v46 = vcombine.low %v862_v34, %v866_v35  ;;  %v6827_v47 = vcombine.low %v990_v36, %v994_v37  ;;  %v6822_v49 = vcombine.high %v983_v44, %v987_v45  ;;  %v811_v34 = vld [vmem:[#allocation10 + $0x78] sm:$0xff] }
 0x285   :  { %2597 = vmatprep.subr.bf16.mxu0 %v6876_v48  ;;  %v6694_v48 = vcombine.high %v855_v42, %v859_v43  ;;  %v935_v35 = vld [vmem:[#allocation10 + $0x458] sm:$0xff] }
 0x286   :  { %v939_v36 = vld [vmem:[#allocation10 + $0x478] sm:$0xff] }
 0x287   :  { %2557 = vmatpush2.bf16.msra.mxu1 %v6747_v55  ;;  %v975_v55 = vld [vmem:[#allocation10 + $0x598] sm:$0xff] }
 0x288   :  { %2598 = vmatpush2.bf16.msra.mxu0 %v6875_v56  ;;  %2558 = vmatprep.subr.bf16.mxu1 %v6740_v57  ;;  %v979_v56 = vld [vmem:[#allocation10 + $0x5b8] sm:$0xff]  ;;  %v6821_v57 = vcombine.low %v983_v44, %v987_v45 }
 0x289   :  { %2599 = vmatprep.subr.bf16.mxu0 %v6868_v58  ;;  %v6686_v58 = vcombine.high %v847_v51, %v851_v53  ;;  %v6814_v61 = vcombine.high %v975_v55, %v979_v56  ;;  %v803_v42 = vld [vmem:[#allocation10 + $0x38] sm:$0xff] }
 0x28a   :  { %v927_v43 = vld [vmem:[#allocation10 + $0x418] sm:$0xff] }
 0x28b   :  { %2559 = vmatpush2.bf16.msra.mxu1 %v6739_v63  ;;  %v971_v63 = vld [vmem:[#allocation10 + $0x578] sm:$0xff] }
 0x28c   :  { %2600 = vmatpush2.bf16.msra.mxu0 %v6867_v0  ;;  %2560 = vmatprep.subr.bf16.mxu1 %v6732_v1  ;;  %v6685_v0 = vcombine.low %v847_v51, %v851_v53  ;;  %v6813_v1 = vcombine.low %v975_v55, %v979_v56  ;;  %v6806_v3 = vcombine.high %v967_v62, %v971_v63  ;;  %v931_v44 = vld [vmem:[#allocation10 + $0x438] sm:$0xff] }
 0x28d   :  { %2601 = vmatprep.subr.bf16.mxu0 %v6860_v2  ;;  %v6678_v2 = vcombine.high %v839_v59, %v843_v60  ;;  %v923_v51 = vld [vmem:[#allocation10 + $0x3f8] sm:$0xff]  ;;  %v6765_v56 = vcombine.low %v927_v43, %v931_v44 }
 0x28e   :  { %v1047_v53 = vld [vmem:[#allocation10 + $0x7d8] sm:$0xff] }
 0x28f   :  { %2561 = vmatpush2.bf16.msra.mxu1 %v6731_v7  ;;  %v963_v7 = vld [vmem:[#allocation10 + $0x538] sm:$0xff] }
 0x290   :  { %2602 = vmatpush2.bf16.msra.mxu0 %v6859_v8  ;;  %2562 = vmatprep.subr.bf16.mxu1 %v6724_v9  ;;  %v6677_v8 = vcombine.low %v839_v59, %v843_v60  ;;  %v6805_v9 = vcombine.low %v967_v62, %v971_v63  ;;  %v911_v59 = vld [vmem:[#allocation10 + $0x398] sm:$0xff] }
 0x291   :  { %2603 = vmatprep.subr.bf16.mxu0 %v6852_v10  ;;  %v6670_v10 = vcombine.high %v831_v4, %v835_v5  ;;  %v915_v60 = vld [vmem:[#allocation10 + $0x3b8] sm:$0xff] }
 0x292   :  { %v1043_v62 = vld [vmem:[#allocation10 + $0x7b8] sm:$0xff] }
 0x293   :  { %2563 = vmatpush2.bf16.msra.mxu1 %v6723_v19  ;;  %v6797_v19 = vcombine.low %v959_v6, %v963_v7 }
 0x294   :  { %2604 = vmatpush2.bf16.msra.mxu0 %v6851_v20  ;;  %2564 = vmatprep.subr.bf16.mxu1 %v6716_v21  ;;  %v6662_v20 = vcombine.high %v823_v11, %v827_v12  ;;  %v6790_v21 = vcombine.high %v951_v17, %v955_v18  ;;  %v899_v11 = vld [vmem:[#allocation10 + $0x338] sm:$0xff] }
 0x295   :  { %2605 = vmatprep.subr.bf16.mxu0 %v6844_v22  ;;  %v815_v22 = vld [vmem:[#allocation10 + $0x98] sm:$0xff] }
 0x296   :  { %v6653_v37 = vcombine.low %v815_v22, %v819_v23  ;;  %v1023_v12 = vld [vmem:[#allocation10 + $0x718] sm:$0xff] }
 0x297   :  { %2565 = vmatpush2.bf16.msra.mxu1 %v6715_v27  ;;  %v6789_v27 = vcombine.low %v951_v17, %v955_v18  ;;  %v1027_v17 = vld [vmem:[#allocation10 + $0x738] sm:$0xff] }
 0x298   :  { %2606 = vmatpush2.bf16.msra.mxu0 %v6843_v30  ;;  %2566 = vmatprep.subr.bf16.mxu1 %v6708_v32  ;;  %v6654_v30 = vcombine.high %v815_v22, %v819_v23  ;;  %v6782_v32 = vcombine.high %v943_v24, %v947_v25  ;;  %v891_v22 = vld [vmem:[#allocation10 + $0x2f8] sm:$0xff] }
 0x299   :  { %2607 = vmatprep.subr.bf16.mxu0 %v6836_v33  ;;  %v807_v33 = vld [vmem:[#allocation10 + $0x58] sm:$0xff] }
 0x29a   :  { %v6645_v45 = vcombine.low %v807_v33, %v811_v34  ;;  %v1015_v23 = vld [vmem:[#allocation10 + $0x6d8] sm:$0xff] }
 0x29b   :  { %2567 = vmatpush2.bf16.msra.mxu1 %v6707_v38  ;;  %v6781_v38 = vcombine.low %v943_v24, %v947_v25  ;;  %v1019_v24 = vld [vmem:[#allocation10 + $0x6f8] sm:$0xff] }
 0x29c   :  { %2608 = vmatpush2.bf16.msra.mxu0 %v6835_v39  ;;  %2568 = vmatprep.subr.bf16.mxu1 %v6700_v40  ;;  %v6646_v39 = vcombine.high %v807_v33, %v811_v34  ;;  %v6774_v40 = vcombine.high %v935_v35, %v939_v36  ;;  %v883_v33 = vld [vmem:[#allocation10 + $0x2b8] sm:$0xff] }
 0x29d   :  { %2609 = vmatprep.subr.bf16.mxu0 %v6828_v41  ;;  %v799_v41 = vld [vmem:[#allocation10 + $0x18] sm:$0xff] }
 0x29e   :  { %v6637_v55 = vcombine.low %v799_v41, %v803_v42  ;;  %v1007_v34 = vld [vmem:[#allocation10 + $0x698] sm:$0xff] }
 0x29f   :  { %2569 = vmatpush2.bf16.msra.mxu1 %v6699_v46  ;;  %v6773_v46 = vcombine.low %v935_v35, %v939_v36  ;;  %v1011_v35 = vld [vmem:[#allocation10 + $0x6b8] sm:$0xff] }
 0x2a0   :  { %2610 = vmatpush2.bf16.msra.mxu0 %v6827_v47  ;;  %2620 = vmatprep.subr.bf16.mxu1 %v6694_v48  ;;  %v6638_v47 = vcombine.high %v799_v41, %v803_v42  ;;  %v6766_v48 = vcombine.high %v927_v43, %v931_v44  ;;  %v875_v41 = vld [vmem:[#allocation10 + $0x278] sm:$0xff] }
 0x2a1   :  { %2661 = vmatprep.subr.bf16.mxu0 %v6822_v49  ;;  %v919_v49 = vld [vmem:[#allocation10 + $0x3d8] sm:$0xff] }
 0x2a2   :  { %2571 = vmatmul.mubr.bf16.vlgmr.msra.gmra.mxu1 %v7862_v15  ;;  %v6757_v63 = vcombine.low %v919_v49, %v923_v51  ;;  %v999_v42 = vld [vmem:[#allocation10 + $0x658] sm:$0xff] }
 0x2a3   :  { %2612 = vmatmul.mubr.bf16.vlgmr.msra.gmra.mxu0 %v7864_v16  ;;  %2621 = vmatpush1.bf16.msra.mxu1 %v6693_v54  ;;  %v1051_v54 = vld [vmem:[#allocation10 + $0x7f8] sm:$0xff] }
 0x2a4   :  { %2652 = vmatprep.mubr.bf16.mxu1 %v7858_v13  ;;  %2662 = vmatpush1.bf16.msra.mxu0 %v6821_v57  ;;  %v6798_v13 = vcombine.high %v959_v6, %v963_v7  ;;  %v6758_v57 = vcombine.high %v919_v49, %v923_v51  ;;  %v1035_v6 = vld [vmem:[#allocation10 + $0x778] sm:$0xff]  ;;  %v6749_v7 = vcombine.low %v911_v59, %v915_v60 }
 0x2a5   :  { %2693 = vmatprep.mubr.bf16.mxu0 %v7860_v14  ;;  %2622 = vmatprep.subr.bf16.mxu1 %v6686_v58  ;;  %v6669_v14 = vcombine.low %v831_v4, %v835_v5  ;;  %v6886_v58 = vcombine.high %v1047_v53, %v1051_v54  ;;  %v907_v4 = vld [vmem:[#allocation10 + $0x378] sm:$0xff] }
 0x2a6   :  { %2663 = vmatprep.subr.bf16.mxu0 %v6814_v61  ;;  %v1039_v61 = vld [vmem:[#allocation10 + $0x798] sm:$0xff] }
 0x2a7   :  { %2623 = vmatpush1.bf16.msra.mxu1 %v6685_v0  ;;  %v6885_v0 = vcombine.low %v1047_v53, %v1051_v54  ;;  %v1031_v5 = vld [vmem:[#allocation10 + $0x758] sm:$0xff] }
 0x2a8   :  { %2664 = vmatpush1.bf16.msra.mxu0 %v6813_v1  ;;  %2624 = vmatprep.subr.bf16.mxu1 %v6678_v2  ;;  %v6750_v1 = vcombine.high %v911_v59, %v915_v60  ;;  %v6878_v2 = vcombine.high %v1039_v61, %v1043_v62  ;;  %v1003_v43 = vld [vmem:[#allocation10 + $0x678] sm:$0xff]  ;;  %v2778_v59 = vld [vmem:[#allocation13 + $0x1e0] sm:$0xff] }
 0x2a9   :  { %2665 = vmatprep.subr.bf16.mxu0 %v6806_v3  ;;  %v903_v3 = vld [vmem:[#allocation10 + $0x358] sm:$0xff]  ;;  %v2902_v60 = vld [vmem:[#allocation13 + $0x5c0] sm:$0xff] }
 0x2aa   :  { %v6741_v18 = vcombine.low %v903_v3, %v907_v4  ;;  %v867_v49 = vld [vmem:[#allocation10 + $0x238] sm:$0xff] }
 0x2ab   :  { %2625 = vmatpush1.bf16.msra.mxu1 %v6677_v8  ;;  %v6877_v8 = vcombine.low %v1039_v61, %v1043_v62  ;;  %v991_v51 = vld [vmem:[#allocation10 + $0x618] sm:$0xff]  ;;  %v2906_v61 = vld [vmem:[#allocation13 + $0x5e0] sm:$0xff] }
 0x2ac   :  { %2666 = vmatpush1.bf16.msra.mxu0 %v6805_v9  ;;  %2626 = vmatprep.subr.bf16.mxu1 %v6670_v10  ;;  %v6742_v9 = vcombine.high %v903_v3, %v907_v4  ;;  %v6870_v10 = vcombine.high %v1031_v5, %v1035_v6  ;;  %v995_v53 = vld [vmem:[#allocation10 + $0x638] sm:$0xff]  ;;  %v7072_v3 = vcombine.high %v2902_v60, %v2906_v61  ;;  %v2894_v4 = vld [vmem:[#allocation13 + $0x580] sm:$0xff] }
 0x2ad   :  { %2667 = vmatprep.subr.bf16.mxu0 %v6798_v13  ;;  %v895_v13 = vld [vmem:[#allocation10 + $0x318] sm:$0xff] }
 0x2ae   :  { %v6733_v25 = vcombine.low %v895_v13, %v899_v11 }
 0x2af   :  { %2627 = vmatpush1.bf16.msra.mxu1 %v6669_v14  ;;  %v6869_v14 = vcombine.low %v1031_v5, %v1035_v6  ;;  %v2898_v5 = vld [vmem:[#allocation13 + $0x5a0] sm:$0xff] }
 0x2b0   :  { %2668 = vmatpush1.bf16.msra.mxu0 %v6797_v19  ;;  %2628 = vmatprep.subr.bf16.mxu1 %v6662_v20  ;;  %v6734_v19 = vcombine.high %v895_v13, %v899_v11  ;;  %v6862_v20 = vcombine.high %v1023_v12, %v1027_v17  ;;  %v2758_v13 = vld [vmem:[#allocation13 + $0x140] sm:$0xff] }
 0x2b1   :  { %2669 = vmatprep.subr.bf16.mxu0 %v6790_v21  ;;  %v887_v21 = vld [vmem:[#allocation10 + $0x2d8] sm:$0xff]  ;;  %v2762_v11 = vld [vmem:[#allocation13 + $0x160] sm:$0xff] }
 0x2b2   :  { %v6725_v36 = vcombine.low %v887_v21, %v891_v22 }
 0x2b3   :  { %2629 = vmatpush1.bf16.msra.mxu1 %v6661_v26  ;;  %v6861_v26 = vcombine.low %v1023_v12, %v1027_v17  ;;  %v7064_v12 = vcombine.high %v2894_v4, %v2898_v5 }
 0x2b4   :  { %2670 = vmatpush1.bf16.msra.mxu0 %v6789_v27  ;;  %2630 = vmatprep.subr.bf16.mxu1 %v6654_v30  ;;  %v6726_v27 = vcombine.high %v887_v21, %v891_v22  ;;  %v6854_v30 = vcombine.high %v1015_v23, %v1019_v24 }
 0x2b5   :  { %2671 = vmatprep.subr.bf16.mxu0 %v6782_v32  ;;  %v879_v32 = vld [vmem:[#allocation10 + $0x298] sm:$0xff] }
 0x2b6   :  { %v6717_v44 = vcombine.low %v879_v32, %v883_v33 }
 0x2b7   :  { %2631 = vmatpush1.bf16.msra.mxu1 %v6653_v37  ;;  %v6853_v37 = vcombine.low %v1015_v23, %v1019_v24  ;;  %v6928_v23 = vcombine.high %v2758_v13, %v2762_v11  ;;  %v7063_v24 = vcombine.low %v2894_v4, %v2898_v5  ;;  %v2718_v4 = vld [vmem:[#allocation13] sm:$0xff] }
 0x2b8   :  { %2672 = vmatpush1.bf16.msra.mxu0 %v6781_v38  ;;  %2632 = vmatprep.subr.bf16.mxu1 %v6646_v39  ;;  %v6718_v38 = vcombine.high %v879_v32, %v883_v33  ;;  %v6846_v39 = vcombine.high %v1007_v34, %v1011_v35  ;;  %v2878_v33 = vld [vmem:[#allocation13 + $0x500] sm:$0xff] }
 0x2b9   :  { %2673 = vmatprep.subr.bf16.mxu0 %v6774_v40  ;;  %v871_v40 = vld [vmem:[#allocation10 + $0x258] sm:$0xff]  ;;  %v2722_v5 = vld [vmem:[#allocation13 + $0x20] sm:$0xff] }
 0x2ba   :  { %v6709_v54 = vcombine.low %v871_v40, %v875_v41 }
 0x2bb   :  { %2633 = vmatpush1.bf16.msra.mxu1 %v6645_v45  ;;  %v6845_v45 = vcombine.low %v1007_v34, %v1011_v35  ;;  %v2882_v34 = vld [vmem:[#allocation13 + $0x520] sm:$0xff] }
 0x2bc   :  { %2674 = vmatpush1.bf16.msra.mxu0 %v6773_v46  ;;  %2634 = vmatprep.subr.bf16.mxu1 %v6638_v47  ;;  %v6710_v46 = vcombine.high %v871_v40, %v875_v41  ;;  %v6838_v47 = vcombine.high %v999_v42, %v1003_v43  ;;  %v2742_v41 = vld [vmem:[#allocation13 + $0xc0] sm:$0xff] }
 0x2bd   :  { %2675 = vmatprep.subr.bf16.mxu0 %v6766_v48  ;;  %v863_v48 = vld [vmem:[#allocation10 + $0x218] sm:$0xff] }
 0x2be   :  { %v6701_v62 = vcombine.low %v863_v48, %v867_v49 }
 0x2bf   :  { %2635 = vmatpush1.bf16.msra.mxu1 %v6637_v55  ;;  %v6837_v55 = vcombine.low %v999_v42, %v1003_v43  ;;  %v2746_v42 = vld [vmem:[#allocation13 + $0xe0] sm:$0xff]  ;;  %v7048_v43 = vcombine.high %v2878_v33, %v2882_v34 }
 0x2c0   :  { %2676 = vmatpush1.bf16.msra.mxu0 %v6765_v56  ;;  %2636 = vmatprep.subr.bf16.mxu1 %v6758_v57  ;;  %v6702_v56 = vcombine.high %v863_v48, %v867_v49  ;;  %v6830_v57 = vcombine.high %v991_v51, %v995_v53  ;;  %v6912_v48 = vcombine.high %v2742_v41, %v2746_v42 }
 0x2c1   :  { %2677 = vmatprep.subr.bf16.mxu0 %v6886_v58  ;;  %v2774_v58 = vld [vmem:[#allocation13 + $0x1c0] sm:$0xff]  ;;  %v7047_v49 = vcombine.low %v2878_v33, %v2882_v34 }
 0x2c2   :  { %v6943_v6 = vcombine.low %v2774_v58, %v2778_v59 }
 0x2c3   :  { %2637 = vmatpush2.bf16.msra.mxu1 %v6757_v63  ;;  %v6829_v63 = vcombine.low %v991_v51, %v995_v53  ;;  %v2734_v51 = vld [vmem:[#allocation13 + $0x80] sm:$0xff] }
 0x2c4   :  { %2678 = vmatpush2.bf16.msra.mxu0 %v6885_v0  ;;  %2638 = vmatprep.subr.bf16.mxu1 %v6750_v1  ;;  %v6944_v0 = vcombine.high %v2774_v58, %v2778_v59  ;;  %v2766_v1 = vld [vmem:[#allocation13 + $0x180] sm:$0xff] }
 0x2c5   :  { %2679 = vmatprep.subr.bf16.mxu0 %v6878_v2  ;;  %v2770_v2 = vld [vmem:[#allocation13 + $0x1a0] sm:$0xff] }
 0x2c6   :  { %v2738_v53 = vld [vmem:[#allocation13 + $0xa0] sm:$0xff] }
 0x2c7   :  { %2639 = vmatpush2.bf16.msra.mxu1 %v6749_v7  ;;  %v7880_v7 = vld [vmem:[#allocation12] sm:$0xff]  ;;  %v6904_v58 = vcombine.high %v2734_v51, %v2738_v53 }
 0x2c8   :  { %2680 = vmatpush2.bf16.msra.mxu0 %v6877_v8  ;;  %2640 = vmatprep.subr.bf16.mxu1 %v6742_v9  ;;  %v6936_v8 = vcombine.high %v2766_v1, %v2770_v2  ;;  %v7071_v9 = vcombine.low %v2902_v60, %v2906_v61  ;;  %v2726_v60 = vld [vmem:[#allocation13 + $0x40] sm:$0xff] }
 0x2c9   :  { %2681 = vmatprep.subr.bf16.mxu0 %v6870_v10  ;;  %v1061_v10 = vrot.slane %v7880_v7, %v7844_v31  ;;  %v2730_v61 = vld [vmem:[#allocation13 + $0x60] sm:$0xff] }
 0x2cb   :  { %2641 = vmatpush2.bf16.msra.mxu1 %v6741_v18 }
 0x2cc   :  { %2682 = vmatpush2.bf16.msra.mxu0 %v6869_v14  ;;  %2642 = vmatprep.subr.bf16.mxu1 %v6734_v19  ;;  %v2886_v14 = vld [vmem:[#allocation13 + $0x540] sm:$0xff] }
 0x2cd   :  { %2683 = vmatprep.subr.bf16.mxu0 %v6862_v20  ;;  %v2890_v19 = vld [vmem:[#allocation13 + $0x560] sm:$0xff]  ;;  %v6935_v20 = vcombine.low %v2766_v1, %v2770_v2  ;;  %v6903_v1 = vcombine.low %v2734_v51, %v2738_v53  ;;  %v6896_v2 = vcombine.high %v2726_v60, %v2730_v61 }
 0x2ce   :  { %v2806_v53 = vld [vmem:[#allocation13 + $0x2c0] sm:$0xff] }
 0x2cf   :  { %2643 = vmatpush2.bf16.msra.mxu1 %v6733_v25 }
 0x2d0   :  { %2684 = vmatpush2.bf16.msra.mxu0 %v6861_v26  ;;  %2644 = vmatprep.subr.bf16.mxu1 %v6726_v27  ;;  %v2750_v26 = vld [vmem:[#allocation13 + $0x100] sm:$0xff] }
 0x2d1   :  { %2685 = vmatprep.subr.bf16.mxu0 %v6854_v30  ;;  %v2754_v27 = vld [vmem:[#allocation13 + $0x120] sm:$0xff] }
 0x2d3   :  { %2645 = vmatpush2.bf16.msra.mxu1 %v6725_v36 }
 0x2d4   :  { %2686 = vmatpush2.bf16.msra.mxu0 %v6853_v37  ;;  %2646 = vmatprep.subr.bf16.mxu1 %v6718_v38  ;;  %v6920_v38 = vcombine.high %v2750_v26, %v2754_v27 }
 0x2d5   :  { %2687 = vmatprep.subr.bf16.mxu0 %v6846_v39  ;;  %v7055_v39 = vcombine.low %v2886_v14, %v2890_v19 }
 0x2d7   :  { %2647 = vmatpush2.bf16.msra.mxu1 %v6717_v44  ;;  %v2870_v44 = vld [vmem:[#allocation13 + $0x4c0] sm:$0xff] }
 0x2d8   :  { %2688 = vmatpush2.bf16.msra.mxu0 %v6845_v45  ;;  %2648 = vmatprep.subr.bf16.mxu1 %v6710_v46  ;;  %v2874_v45 = vld [vmem:[#allocation13 + $0x4e0] sm:$0xff] }
 0x2d9   :  { %2689 = vmatprep.subr.bf16.mxu0 %v6838_v47  ;;  %v6919_v47 = vcombine.low %v2750_v26, %v2754_v27  ;;  %v7039_v59 = vcombine.low %v2870_v44, %v2874_v45  ;;  %v2834_v26 = vld [vmem:[#allocation13 + $0x3a0] sm:$0xff] }
 0x2db   :  { %2649 = vmatpush2.bf16.msra.mxu1 %v6709_v54  ;;  %v7040_v54 = vcombine.high %v2870_v44, %v2874_v45  ;;  %v2942_v45 = vld [vmem:[#allocation13 + $0x700] sm:$0xff] }
 0x2dc   :  { %2690 = vmatpush2.bf16.msra.mxu0 %v6837_v55  ;;  %2650 = vmatprep.subr.bf16.mxu1 %v6702_v56  ;;  %v2862_v55 = vld [vmem:[#allocation13 + $0x480] sm:$0xff] }
 0x2dd   :  { %2691 = vmatprep.subr.bf16.mxu0 %v6830_v57  ;;  %v2866_v56 = vld [vmem:[#allocation13 + $0x4a0] sm:$0xff]  ;;  %v6911_v57 = vcombine.low %v2742_v41, %v2746_v42 }
 0x2de   :  { %v2814_v42 = vld [vmem:[#allocation13 + $0x300] sm:$0xff] }
 0x2df   :  { %2651 = vmatpush2.bf16.msra.mxu1 %v6701_v62  ;;  %v7032_v62 = vcombine.high %v2862_v55, %v2866_v56 }
 0x2e0   :  { %2692 = vmatpush2.bf16.msra.mxu0 %v6829_v63  ;;  %5832 = vmatprep.subr.bf16.mxu1 %v6944_v0  ;;  %v2854_v63 = vld [vmem:[#allocation13 + $0x440] sm:$0xff] }
 0x2e1   :  { %5873 = vmatprep.subr.bf16.mxu0 %v7072_v3  ;;  %v2858_v0 = vld [vmem:[#allocation13 + $0x460] sm:$0xff]  ;;  %v7031_v3 = vcombine.low %v2862_v55, %v2866_v56 }
 0x2e2   :  { %2653 = vmatmul.mubr.bf16.vlgmr.msra.gmra.mxu1 %v7862_v15  ;;  %v7885_v17 = vpop.f32.mrf.mxu1  ;;  %v7887_v18 = vpop.f32.mrf.mxu0  ;;  %v7056_v15 = vcombine.high %v2886_v14, %v2890_v19  ;;  %v2842_v14 = vld [vmem:[#allocation13 + $0x3e0] sm:$0xff] }
 0x2e3   :  { %2694 = vmatmul.mubr.bf16.vlgmr.msra.gmra.mxu0 %v7864_v16  ;;  %5833 = vmatpush1.bf16.msra.mxu1 %v6943_v6  ;;  %v6927_v16 = vcombine.low %v2758_v13, %v2762_v11  ;;  %v7024_v6 = vcombine.high %v2854_v63, %v2858_v0  ;;  %v6888_v13 = vcombine.high %v2718_v4, %v2722_v5  ;;  %v2934_v56 = vld [vmem:[#allocation13 + $0x6c0] sm:$0xff] }
 0x2e4   :  { %v2410_v21 = vpop.f32.mrf.mxu1  ;;  %v2451_v22 = vpop.f32.mrf.mxu0  ;;  %5834 = vmatprep.subr.bf16.mxu1 %v6936_v8  ;;  %5874 = vmatpush1.bf16.msra.mxu0 %v7071_v9  ;;  %v2846_v8 = vld [vmem:[#allocation13 + $0x400] sm:$0xff]  ;;  %v7023_v11 = vcombine.low %v2854_v63, %v2858_v0 }
 0x2e5   :  { %v2411_v25 = vadd.f32 %v2410_v21, %v1061_v10  ;;  %5875 = vmatprep.subr.bf16.mxu0 %v7064_v12  ;;  %v2850_v9 = vld [vmem:[#allocation13 + $0x420] sm:$0xff]  ;;  %v6895_v10 = vcombine.low %v2726_v60, %v2730_v61 }
 0x2e6   :  { %v2412_v30 = vpop.f32.mrf.mxu1  ;;  %v2453_v32 = vpop.f32.mrf.mxu0  ;;  %v2838_v12 = vld [vmem:[#allocation13 + $0x3c0] sm:$0xff]  ;;  %v7016_v19 = vcombine.high %v2846_v8, %v2850_v9 }
 0x2e7   :  { %v2452_v35 = vadd.f32 %v2451_v22, %v2411_v25  ;;  %5835 = vmatpush1.bf16.msra.mxu1 %v6935_v20  ;;  %v2966_v20 = vld [vmem:[#allocation13 + $0x7c0] sm:$0xff]  ;;  %v6887_v22 = vcombine.low %v2718_v4, %v2722_v5  ;;  %v7007_v32 = vcombine.low %v2838_v12, %v2842_v14 }
 0x2e8   :  { %v2413_v36 = vpop.f32.mrf.mxu1  ;;  %v2454_v37 = vpop.f32.mrf.mxu0  ;;  %5836 = vmatprep.subr.bf16.mxu1 %v6928_v23  ;;  %5876 = vmatpush1.bf16.msra.mxu0 %v7063_v24  ;;  %v2970_v21 = vld [vmem:[#allocation13 + $0x7e0] sm:$0xff]  ;;  %v7008_v23 = vcombine.high %v2838_v12, %v2842_v14  ;;  %v7015_v24 = vcombine.low %v2846_v8, %v2850_v9 }
 0x2e9   :  { %v2703_v40 = vmax.f32 %v2452_v35, 0.0  ;;  %5877 = vmatprep.subr.bf16.mxu0 %v7056_v15  ;;  %v2830_v25 = vld [vmem:[#allocation13 + $0x380] sm:$0xff]  ;;  %v7136_v27 = vcombine.high %v2966_v20, %v2970_v21  ;;  %v7135_v34 = vcombine.low %v2966_v20, %v2970_v21 }
 0x2ea   :  { %v2958_v15 = vld [vmem:[#allocation13 + $0x780] sm:$0xff]  ;;  %v7000_v33 = vcombine.high %v2830_v25, %v2834_v26 }
 0x2eb   :  { %v7890_v46 = vpack.c.bf16 %v2703_v40, %v2703_v40  ;;  %5837 = vmatpush1.bf16.msra.mxu1 %v6927_v16  ;;  %v2962_v30 = vld [vmem:[#allocation13 + $0x7a0] sm:$0xff] }
 0x2ec   :  { %5838 = vmatprep.subr.bf16.mxu1 %v6920_v38  ;;  %5878 = vmatpush1.bf16.msra.mxu0 %v7055_v39  ;;  %v2822_v35 = vld [vmem:[#allocation13 + $0x340] sm:$0xff]  ;;  %v7128_v36 = vcombine.high %v2958_v15, %v2962_v30  ;;  %v6999_v39 = vcombine.low %v2830_v25, %v2834_v26  ;;  %v7127_v41 = vcombine.low %v2958_v15, %v2962_v30 }
 0x2ed   :  { %5864 = vmatprep.mubr.bf16.mxu1 %v7890_v46  ;;  %5879 = vmatprep.subr.bf16.mxu0 %v7048_v43  ;;  %v2826_v16 = vld [vmem:[#allocation13 + $0x360] sm:$0xff] }
 0x2ee   :  { %v2950_v37 = vld [vmem:[#allocation13 + $0x740] sm:$0xff]  ;;  %v6992_v40 = vcombine.high %v2822_v35, %v2826_v16 }
 0x2ef   :  { %5839 = vmatpush1.bf16.msra.mxu1 %v6919_v47  ;;  %v2954_v38 = vld [vmem:[#allocation13 + $0x760] sm:$0xff] }
 0x2f0   :  { %5840 = vmatprep.subr.bf16.mxu1 %v6912_v48  ;;  %5880 = vmatpush1.bf16.msra.mxu0 %v7047_v49  ;;  %v2818_v43 = vld [vmem:[#allocation13 + $0x320] sm:$0xff]  ;;  %v7120_v44 = vcombine.high %v2950_v37, %v2954_v38  ;;  %v6991_v48 = vcombine.low %v2822_v35, %v2826_v16  ;;  %v7119_v51 = vcombine.low %v2950_v37, %v2954_v38 }
 0x2f1   :  { %5881 = vmatprep.subr.bf16.mxu0 %v7040_v54  ;;  %v2946_v47 = vld [vmem:[#allocation13 + $0x720] sm:$0xff]  ;;  %v6984_v49 = vcombine.high %v2814_v42, %v2818_v43 }
 0x2f2   :  { %v2810_v54 = vld [vmem:[#allocation13 + $0x2e0] sm:$0xff]  ;;  %v7112_v55 = vcombine.high %v2942_v45, %v2946_v47  ;;  %v7111_v60 = vcombine.low %v2942_v45, %v2946_v47 }
 0x2f3   :  { %5841 = vmatpush1.bf16.msra.mxu1 %v6911_v57  ;;  %v2938_v57 = vld [vmem:[#allocation13 + $0x6e0] sm:$0xff] }
 0x2f4   :  { %5842 = vmatprep.subr.bf16.mxu1 %v6904_v58  ;;  %5882 = vmatpush1.bf16.msra.mxu0 %v7039_v59  ;;  %v6983_v58 = vcombine.low %v2814_v42, %v2818_v43  ;;  %v6976_v59 = vcombine.high %v2806_v53, %v2810_v54  ;;  %v2798_v61 = vld [vmem:[#allocation13 + $0x280] sm:$0xff]  ;;  %v7104_v63 = vcombine.high %v2934_v56, %v2938_v57 }
 0x2f5   :  { %5883 = vmatprep.subr.bf16.mxu0 %v7032_v62  ;;  %v2802_v62 = vld [vmem:[#allocation13 + $0x2a0] sm:$0xff]  ;;  %v7103_v5 = vcombine.low %v2934_v56, %v2938_v57 }
 0x2f6   :  { %v2926_v0 = vld [vmem:[#allocation13 + $0x680] sm:$0xff]  ;;  %v6968_v4 = vcombine.high %v2798_v61, %v2802_v62 }
 0x2f7   :  { %5843 = vmatpush1.bf16.msra.mxu1 %v6903_v1  ;;  %v2930_v1 = vld [vmem:[#allocation13 + $0x6a0] sm:$0xff] }
 0x2f8   :  { %5844 = vmatprep.subr.bf16.mxu1 %v6896_v2  ;;  %5884 = vmatpush1.bf16.msra.mxu0 %v7031_v3  ;;  %v6975_v2 = vcombine.low %v2806_v53, %v2810_v54  ;;  %v1057_v3 = vrot.slane %v7880_v7, %v7841_v29  ;;  %v2794_v8 = vld [vmem:[#allocation13 + $0x260] sm:$0xff]  ;;  %v7096_v9 = vcombine.high %v2926_v0, %v2930_v1 }
 0x2f9   :  { %5885 = vmatprep.subr.bf16.mxu0 %v7024_v6  ;;  %v2790_v6 = vld [vmem:[#allocation13 + $0x240] sm:$0xff] }
 0x2fa   :  { %v2409_v12 = vadd.f32 %v7885_v17, %v1057_v3  ;;  %v6960_v14 = vcombine.high %v2790_v6, %v2794_v8  ;;  %v2782_v20 = vld [vmem:[#allocation13 + $0x200] sm:$0xff]  ;;  %v6959_v25 = vcombine.low %v2790_v6, %v2794_v8 }
 0x2fb   :  { %5845 = vmatpush1.bf16.msra.mxu1 %v6895_v10  ;;  %v2918_v10 = vld [vmem:[#allocation13 + $0x640] sm:$0xff] }
 0x2fc   :  { %5846 = vmatprep.subr.bf16.mxu1 %v6888_v13  ;;  %5886 = vmatpush1.bf16.msra.mxu0 %v7023_v11  ;;  %v2922_v13 = vld [vmem:[#allocation13 + $0x660] sm:$0xff]  ;;  %v6967_v11 = vcombine.low %v2798_v61, %v2802_v62  ;;  %v2450_v26 = vadd.f32 %v7887_v18, %v2409_v12 }
 0x2fd   :  { %5887 = vmatprep.subr.bf16.mxu0 %v7016_v19  ;;  %v7095_v19 = vcombine.low %v2926_v0, %v2930_v1  ;;  %v2786_v21 = vld [vmem:[#allocation13 + $0x220] sm:$0xff]  ;;  %v7087_v15 = vcombine.low %v2918_v10, %v2922_v13 }
 0x2fe   :  { %v3030_v30 = vld [vmem:[#allocation13 + $0x9c0] sm:$0xff]  ;;  %v6951_v35 = vcombine.low %v2782_v20, %v2786_v21  ;;  %v2702_v16 = vmax.f32 %v2450_v26, 0.0 }
 0x2ff   :  { %5847 = vmatpush1.bf16.msra.mxu1 %v6887_v22  ;;  %v7088_v22 = vcombine.high %v2918_v10, %v2922_v13  ;;  %v3022_v18 = vld [vmem:[#allocation13 + $0x980] sm:$0xff] }
 0x300   :  { %5848 = vmatprep.subr.bf16.mxu1 %v7008_v23  ;;  %5888 = vmatpush1.bf16.msra.mxu0 %v7015_v24  ;;  %v2910_v23 = vld [vmem:[#allocation13 + $0x600] sm:$0xff]  ;;  %v7905_v42 = vpack.c.bf16 %v2702_v16, %v2702_v16 }
 0x301   :  { %5889 = vmatprep.subr.bf16.mxu0 %v7136_v27  ;;  %v2914_v24 = vld [vmem:[#allocation13 + $0x620] sm:$0xff]  ;;  %v6952_v27 = vcombine.high %v2782_v20, %v2786_v21 }
 0x302   :  { %v7080_v17 = vcombine.high %v2910_v23, %v2914_v24  ;;  %v3026_v38 = vld [vmem:[#allocation13 + $0x9a0] sm:$0xff] }
 0x303   :  { %5849 = vmatpush2.bf16.msra.mxu1 %v7007_v32  ;;  %v3034_v32 = vld [vmem:[#allocation13 + $0x9e0] sm:$0xff]  ;;  %v7192_v43 = vcombine.high %v3022_v18, %v3026_v38  ;;  %v7191_v53 = vcombine.low %v3022_v18, %v3026_v38 }
 0x304   :  { %5850 = vmatprep.subr.bf16.mxu1 %v7000_v33  ;;  %5890 = vmatpush2.bf16.msra.mxu0 %v7135_v34  ;;  %v7897_v33 = vld [vmem:[#allocation13 + $0xdc0] sm:$0xff]  ;;  %v7200_v37 = vcombine.high %v3030_v30, %v3034_v32 }
 0x305   :  { %5891 = vmatprep.subr.bf16.mxu0 %v7128_v36  ;;  %v7899_v34 = vld [vmem:[#allocation13 + $0xde0] sm:$0xff]  ;;  %v7079_v36 = vcombine.low %v2910_v23, %v2914_v24  ;;  %v7918_v23 = vld [vmem:[#allocation13 + $0x5e8] sm:$0xff] }
 0x306   :  { %v3014_v45 = vld [vmem:[#allocation13 + $0x940] sm:$0xff]  ;;  %v7327_v12 = vcombine.low %v7897_v33, %v7899_v34 }
 0x307   :  { %5851 = vmatpush2.bf16.msra.mxu1 %v6999_v39  ;;  %v7328_v39 = vcombine.high %v7897_v33, %v7899_v34  ;;  %v3018_v47 = vld [vmem:[#allocation13 + $0x960] sm:$0xff] }
 0x308   :  { %5852 = vmatprep.subr.bf16.mxu1 %v6992_v40  ;;  %5892 = vmatpush2.bf16.msra.mxu0 %v7127_v41  ;;  %v1065_v40 = vrot.slane %v7880_v7, %v7849_v50  ;;  %v7199_v41 = vcombine.low %v3030_v30, %v3034_v32  ;;  %v7184_v56 = vcombine.high %v3014_v45, %v3018_v47  ;;  %v3002_v8 = vld [vmem:[#allocation13 + $0x8e0] sm:$0xff] }
 0x309   :  { %5893 = vmatprep.subr.bf16.mxu0 %v7120_v44  ;;  %v1069_v44 = vrot.slane %v7880_v7, %v7852_v52  ;;  %v7183_v0 = vcombine.low %v3014_v45, %v3018_v47  ;;  %v3154_v10 = vld [vmem:[#allocation13 + $0xda0] sm:$0xff] }
 0x30a   :  { %v2990_v20 = vld [vmem:[#allocation13 + $0x880] sm:$0xff] }
 0x30b   :  { %5853 = vmatpush2.bf16.msra.mxu1 %v6991_v48  ;;  %v2994_v24 = vld [vmem:[#allocation13 + $0x8a0] sm:$0xff] }
 0x30c   :  { %5854 = vmatprep.subr.bf16.mxu1 %v6984_v49  ;;  %5894 = vmatpush2.bf16.msra.mxu0 %v7119_v51  ;;  %v3146_v26 = vld [vmem:[#allocation13 + $0xd60] sm:$0xff]  ;;  %v7160_v30 = vcombine.high %v2990_v20, %v2994_v24 }
 0x30d   :  { %5895 = vmatprep.subr.bf16.mxu0 %v7112_v55  ;;  %v2982_v32 = vld [vmem:[#allocation13 + $0x840] sm:$0xff] }
 0x30e   :  { %v2986_v34 = vld [vmem:[#allocation13 + $0x860] sm:$0xff] }
 0x30f   :  { %5855 = vmatpush2.bf16.msra.mxu1 %v6983_v58  ;;  %v3138_v16 = vld [vmem:[#allocation13 + $0xd20] sm:$0xff]  ;;  %v7152_v18 = vcombine.high %v2982_v32, %v2986_v34 }
 0x310   :  { %5856 = vmatprep.subr.bf16.mxu1 %v6976_v59  ;;  %5896 = vmatpush2.bf16.msra.mxu0 %v7111_v60  ;;  %v3006_v59 = vld [vmem:[#allocation13 + $0x900] sm:$0xff] }
 0x311   :  { %5897 = vmatprep.subr.bf16.mxu0 %v7104_v63  ;;  %v3010_v60 = vld [vmem:[#allocation13 + $0x920] sm:$0xff] }
 0x312   :  { %v2974_v38 = vld [vmem:[#allocation13 + $0x800] sm:$0xff] }
 0x313   :  { %5857 = vmatpush2.bf16.msra.mxu1 %v6975_v2 }
 0x314   :  { %5858 = vmatprep.subr.bf16.mxu1 %v6968_v4  ;;  %5898 = vmatpush2.bf16.msra.mxu0 %v7103_v5  ;;  %v7176_v4 = vcombine.high %v3006_v59, %v3010_v60  ;;  %v2998_v5 = vld [vmem:[#allocation13 + $0x8c0] sm:$0xff] }
 0x315   :  { %5899 = vmatprep.subr.bf16.mxu0 %v7096_v9  ;;  %v3150_v9 = vld [vmem:[#allocation13 + $0xd80] sm:$0xff] }
 0x316   :  { %v7320_v21 = vcombine.high %v3150_v9, %v3154_v10 }
 0x317   :  { %5859 = vmatpush2.bf16.msra.mxu1 %v6967_v11  ;;  %v7175_v11 = vcombine.low %v3006_v59, %v3010_v60  ;;  %v3090_v60 = vld [vmem:[#allocation13 + $0xba0] sm:$0xff] }
 0x318   :  { %5860 = vmatprep.subr.bf16.mxu1 %v6960_v14  ;;  %5900 = vmatpush2.bf16.msra.mxu0 %v7095_v19  ;;  %v7168_v19 = vcombine.high %v2998_v5, %v3002_v8 }
 0x319   :  { %5901 = vmatprep.subr.bf16.mxu0 %v7088_v22  ;;  %v7916_v22 = vld [vmem:[#allocation13 + $0x5c8] sm:$0xff] }
 0x31b   :  { %5861 = vmatpush2.bf16.msra.mxu1 %v6959_v25  ;;  %v3142_v25 = vld [vmem:[#allocation13 + $0xd40] sm:$0xff] }
 0x31c   :  { %5862 = vmatprep.subr.bf16.mxu1 %v6952_v27  ;;  %5902 = vmatpush2.bf16.msra.mxu0 %v7087_v15  ;;  %v7073_v27 = vcombine.low %v7916_v22, %v7918_v23  ;;  %v7167_v15 = vcombine.low %v2998_v5, %v3002_v8  ;;  %v7312_v33 = vcombine.high %v3142_v25, %v3146_v26  ;;  %v3102_v5 = vld [vmem:[#allocation13 + $0xc00] sm:$0xff] }
 0x31d   :  { %5903 = vmatprep.subr.bf16.mxu0 %v7080_v17  ;;  %v7319_v17 = vcombine.low %v3150_v9, %v3154_v10 }
 0x31f   :  { %5863 = vmatpush2.bf16.msra.mxu1 %v6951_v35  ;;  %v3134_v35 = vld [vmem:[#allocation13 + $0xd00] sm:$0xff] }
 0x320   :  { %5904 = vmatpush2.bf16.msra.mxu0 %v7079_v36  ;;  %5914 = vmatprep.subr.bf16.mxu1 %v7200_v37  ;;  %v7159_v36 = vcombine.low %v2990_v20, %v2994_v24  ;;  %v7311_v37 = vcombine.low %v3142_v25, %v3146_v26  ;;  %v7303_v45 = vcombine.low %v3134_v35, %v3138_v16  ;;  %v3222_v20 = vld [vmem:[#allocation13 + $0xfc0] sm:$0xff] }
 0x321   :  { %5955 = vmatprep.subr.bf16.mxu0 %v7328_v39  ;;  %v7304_v39 = vcombine.high %v3134_v35, %v3138_v16 }
 0x322   :  { %v2490_v48 = vpop.f32.mrf.mxu1  ;;  %v2531_v49 = vpop.f32.mrf.mxu0  ;;  %5865 = vmatmul.mubr.bf16.vlgmr.msra.gmra.mxu1 %v7905_v42 }
 0x323   :  { %v2491_v51 = vadd.f32 %v2490_v48, %v1065_v40  ;;  %5915 = vmatpush1.bf16.msra.mxu1 %v7199_v41  ;;  %v2978_v40 = vld [vmem:[#allocation13 + $0x820] sm:$0xff] }
 0x324   :  { %v2492_v54 = vpop.f32.mrf.mxu1  ;;  %v2533_v55 = vpop.f32.mrf.mxu0  ;;  %5916 = vmatprep.subr.bf16.mxu1 %v7192_v43  ;;  %v3126_v41 = vld [vmem:[#allocation13 + $0xcc0] sm:$0xff]  ;;  %v7144_v47 = vcombine.high %v2974_v38, %v2978_v40 }
 0x325   :  { %v2532_v57 = vadd.f32 %v2531_v49, %v2491_v51  ;;  %v2493_v58 = vadd.f32 %v2492_v54, %v1069_v44  ;;  %v3130_v43 = vld [vmem:[#allocation13 + $0xce0] sm:$0xff]  ;;  %v7151_v44 = vcombine.low %v2982_v32, %v2986_v34 }
 0x326   :  { %v2494_v61 = vpop.f32.mrf.mxu1  ;;  %v2535_v62 = vpop.f32.mrf.mxu0  ;;  %v3094_v48 = vld [vmem:[#allocation13 + $0xbc0] sm:$0xff]  ;;  %v7296_v49 = vcombine.high %v3126_v41, %v3130_v43 }
 0x327   :  { %v2534_v63 = vadd.f32 %v2533_v55, %v2493_v58  ;;  %5917 = vmatpush1.bf16.msra.mxu1 %v7191_v53  ;;  %v2704_v1 = vmax.f32 %v2532_v57, 0.0  ;;  %v3098_v51 = vld [vmem:[#allocation13 + $0xbe0] sm:$0xff]  ;;  %v7143_v55 = vcombine.low %v2974_v38, %v2978_v40 }
 0x328   :  { %v2495_v2 = vpop.f32.mrf.mxu1  ;;  %v2536_v3 = vpop.f32.mrf.mxu0  ;;  %5918 = vmatprep.subr.bf16.mxu1 %v7184_v56  ;;  %v3118_v53 = vld [vmem:[#allocation13 + $0xc80] sm:$0xff]  ;;  %v7295_v56 = vcombine.low %v3126_v41, %v3130_v43  ;;  %v7264_v57 = vcombine.high %v3094_v48, %v3098_v51 }
 0x329   :  { %v2705_v6 = vmax.f32 %v2534_v63, 0.0  ;;  %v7914_v14 = vpack.c.bf16 %v2704_v1, %v2704_v1  ;;  %v3122_v54 = vld [vmem:[#allocation13 + $0xca0] sm:$0xff]  ;;  %v7263_v63 = vcombine.low %v3094_v48, %v3098_v51 }
 0x32a   :  { %v3086_v58 = vld [vmem:[#allocation13 + $0xb80] sm:$0xff]  ;;  %v7288_v59 = vcombine.high %v3118_v53, %v3122_v54 }
 0x32b   :  { %v7910_v13 = vpack.c.bf16 %v2705_v6, %v2705_v6  ;;  %5919 = vmatpush1.bf16.msra.mxu1 %v7183_v0  ;;  %v3110_v61 = vld [vmem:[#allocation13 + $0xc40] sm:$0xff]  ;;  %v7287_v0 = vcombine.low %v3118_v53, %v3122_v54  ;;  %v7256_v1 = vcombine.high %v3086_v58, %v3090_v60  ;;  %v7255_v8 = vcombine.low %v3086_v58, %v3090_v60 }
 0x32c   :  { %5920 = vmatprep.subr.bf16.mxu1 %v7176_v4  ;;  %v3114_v62 = vld [vmem:[#allocation13 + $0xc60] sm:$0xff] }
 0x32d   :  { %5905 = vmatprep.mubr.bf16.mxu0 %v7910_v13  ;;  %v3078_v2 = vld [vmem:[#allocation13 + $0xb40] sm:$0xff]  ;;  %v7280_v3 = vcombine.high %v3110_v61, %v3114_v62  ;;  %v7279_v9 = vcombine.low %v3110_v61, %v3114_v62 }
 0x32e   :  { %5906 = vmatmul.mubr.bf16.vlgmr.msra.gmra.mxu0 %v7914_v14  ;;  %v3082_v4 = vld [vmem:[#allocation13 + $0xb60] sm:$0xff] }
 0x32f   :  { %5921 = vmatpush1.bf16.msra.mxu1 %v7175_v11  ;;  %5956 = vmatpush1.bf16.msra.mxu0 %v7327_v12  ;;  %v3106_v6 = vld [vmem:[#allocation13 + $0xc20] sm:$0xff]  ;;  %v7248_v10 = vcombine.high %v3078_v2, %v3082_v4  ;;  %v7247_v24 = vcombine.low %v3078_v2, %v3082_v4  ;;  %v1072_v4 = vsub.s32 4, %v7838_v28 }
 0x330   :  { %5922 = vmatprep.subr.bf16.mxu1 %v7168_v19  ;;  %5957 = vmatprep.subr.bf16.mxu0 %v7320_v21  ;;  %v3070_v11 = vld [vmem:[#allocation13 + $0xb00] sm:$0xff]  ;;  %v7272_v12 = vcombine.high %v3102_v5, %v3106_v6  ;;  %v7271_v25 = vcombine.low %v3102_v5, %v3106_v6 }
 0x331   :  { %v3074_v19 = vld [vmem:[#allocation13 + $0xb20] sm:$0xff] }
 0x332   :  { %v3226_v21 = vld [vmem:[#allocation13 + $0xfe0] sm:$0xff]  ;;  %v7240_v26 = vcombine.high %v3070_v11, %v3074_v19  ;;  %v7239_v34 = vcombine.low %v3070_v11, %v3074_v19  ;;  %v1073_v19 = vrot.slane %v7880_v7, %v1072_v4 }
 0x333   :  { %5923 = vmatpush1.bf16.msra.mxu1 %v7167_v15  ;;  %5958 = vmatpush1.bf16.msra.mxu0 %v7319_v17  ;;  %v3062_v15 = vld [vmem:[#allocation13 + $0xac0] sm:$0xff]  ;;  %v7392_v17 = vcombine.high %v3222_v20, %v3226_v21  ;;  %v7391_v35 = vcombine.low %v3222_v20, %v3226_v21 }
 0x334   :  { %5924 = vmatprep.subr.bf16.mxu1 %v7160_v30  ;;  %5959 = vmatprep.subr.bf16.mxu0 %v7312_v33  ;;  %v3066_v30 = vld [vmem:[#allocation13 + $0xae0] sm:$0xff] }
 0x335   :  { %v3214_v32 = vld [vmem:[#allocation13 + $0xf80] sm:$0xff]  ;;  %v7232_v16 = vcombine.high %v3062_v15, %v3066_v30  ;;  %v7231_v40 = vcombine.low %v3062_v15, %v3066_v30 }
 0x336   :  { %v3218_v33 = vld [vmem:[#allocation13 + $0xfa0] sm:$0xff] }
 0x337   :  { %5925 = vmatpush1.bf16.msra.mxu1 %v7159_v36  ;;  %5960 = vmatpush1.bf16.msra.mxu0 %v7311_v37  ;;  %v3054_v36 = vld [vmem:[#allocation13 + $0xa80] sm:$0xff]  ;;  %v7384_v37 = vcombine.high %v3214_v32, %v3218_v33  ;;  %v7383_v41 = vcombine.low %v3214_v32, %v3218_v33 }
 0x338   :  { %5926 = vmatprep.subr.bf16.mxu1 %v7152_v18  ;;  %5961 = vmatprep.subr.bf16.mxu0 %v7304_v39  ;;  %v3058_v18 = vld [vmem:[#allocation13 + $0xaa0] sm:$0xff] }
 0x339   :  { %v3206_v38 = vld [vmem:[#allocation13 + $0xf40] sm:$0xff]  ;;  %v7224_v43 = vcombine.high %v3054_v36, %v3058_v18  ;;  %v7223_v51 = vcombine.low %v3054_v36, %v3058_v18 }
 0x33a   :  { %v3210_v39 = vld [vmem:[#allocation13 + $0xf60] sm:$0xff] }
 0x33b   :  { %5927 = vmatpush1.bf16.msra.mxu1 %v7151_v44  ;;  %5962 = vmatpush1.bf16.msra.mxu0 %v7303_v45  ;;  %v3046_v44 = vld [vmem:[#allocation13 + $0xa40] sm:$0xff]  ;;  %v7376_v45 = vcombine.high %v3206_v38, %v3210_v39  ;;  %v7375_v53 = vcombine.low %v3206_v38, %v3210_v39 }
 0x33c   :  { %5928 = vmatprep.subr.bf16.mxu1 %v7144_v47  ;;  %5963 = vmatprep.subr.bf16.mxu0 %v7296_v49  ;;  %v3050_v47 = vld [vmem:[#allocation13 + $0xa60] sm:$0xff] }
 0x33d   :  { %v3198_v48 = vld [vmem:[#allocation13 + $0xf00] sm:$0xff]  ;;  %v7216_v54 = vcombine.high %v3046_v44, %v3050_v47  ;;  %v7215_v60 = vcombine.low %v3046_v44, %v3050_v47  ;;  %v2771_v47 = vld [vmem:[#allocation13 + $0x1a8] sm:$0xff] }
 0x33e   :  { %v3202_v49 = vld [vmem:[#allocation13 + $0xf20] sm:$0xff] }
 0x33f   :  { %5929 = vmatpush1.bf16.msra.mxu1 %v7143_v55  ;;  %5964 = vmatpush1.bf16.msra.mxu0 %v7295_v56  ;;  %v3038_v55 = vld [vmem:[#allocation13 + $0xa00] sm:$0xff]  ;;  %v7368_v56 = vcombine.high %v3198_v48, %v3202_v49  ;;  %v7367_v61 = vcombine.low %v3198_v48, %v3202_v49 }
 0x340   :  { %5930 = vmatprep.subr.bf16.mxu1 %v7264_v57  ;;  %5965 = vmatprep.subr.bf16.mxu0 %v7288_v59  ;;  %v3042_v57 = vld [vmem:[#allocation13 + $0xa20] sm:$0xff] }
 0x341   :  { %v3190_v58 = vld [vmem:[#allocation13 + $0xec0] sm:$0xff]  ;;  %v7208_v62 = vcombine.high %v3038_v55, %v3042_v57  ;;  %v7207_v5 = vcombine.low %v3038_v55, %v3042_v57  ;;  %v2763_v55 = vld [vmem:[#allocation13 + $0x168] sm:$0xff] }
 0x342   :  { %v3194_v59 = vld [vmem:[#allocation13 + $0xee0] sm:$0xff] }
 0x343   :  { %5931 = vmatpush2.bf16.msra.mxu1 %v7263_v63  ;;  %5966 = vmatpush1.bf16.msra.mxu0 %v7287_v0  ;;  %v2775_v63 = vld [vmem:[#allocation13 + $0x1c8] sm:$0xff]  ;;  %v7360_v0 = vcombine.high %v3190_v58, %v3194_v59  ;;  %v3182_v2 = vld [vmem:[#allocation13 + $0xe80] sm:$0xff]  ;;  %v7359_v6 = vcombine.low %v3190_v58, %v3194_v59 }
 0x344   :  { %5932 = vmatprep.subr.bf16.mxu1 %v7256_v1  ;;  %5967 = vmatprep.subr.bf16.mxu0 %v7280_v3  ;;  %v2779_v1 = vld [vmem:[#allocation13 + $0x1e8] sm:$0xff]  ;;  %v3186_v3 = vld [vmem:[#allocation13 + $0xea0] sm:$0xff] }
 0x345   :  { %v3174_v11 = vld [vmem:[#allocation13 + $0xe40] sm:$0xff]  ;;  %v7351_v20 = vcombine.low %v3182_v2, %v3186_v3  ;;  %v6945_v49 = vcombine.low %v2775_v63, %v2779_v1  ;;  %v2751_v58 = vld [vmem:[#allocation13 + $0x108] sm:$0xff] }
 0x346   :  { %v2755_v59 = vld [vmem:[#allocation13 + $0x128] sm:$0xff] }
 0x347   :  { %5933 = vmatpush2.bf16.msra.mxu1 %v7255_v8  ;;  %5968 = vmatpush1.bf16.msra.mxu0 %v7279_v9  ;;  %v6946_v8 = vcombine.high %v2775_v63, %v2779_v1  ;;  %v7352_v9 = vcombine.high %v3182_v2, %v3186_v3  ;;  %v2747_v63 = vld [vmem:[#allocation13 + $0xe8] sm:$0xff] }
 0x348   :  { %5934 = vmatprep.subr.bf16.mxu1 %v7248_v10  ;;  %5969 = vmatprep.subr.bf16.mxu0 %v7272_v12  ;;  %v1076_v10 = vsub.s32 5, %v7838_v28  ;;  %v3178_v12 = vld [vmem:[#allocation13 + $0xe60] sm:$0xff]  ;;  %v2735_v2 = vld [vmem:[#allocation13 + $0x88] sm:$0xff] }
 0x349   :  { %v7344_v21 = vcombine.high %v3174_v11, %v3178_v12  ;;  %v7343_v32 = vcombine.low %v3174_v11, %v3178_v12  ;;  %v2739_v3 = vld [vmem:[#allocation13 + $0xa8] sm:$0xff] }
 0x34a   :  { %v6905_v11 = vcombine.low %v2735_v2, %v2739_v3 }
 0x34b   :  { %5935 = vmatpush2.bf16.msra.mxu1 %v7247_v24  ;;  %5970 = vmatpush1.bf16.msra.mxu0 %v7271_v25  ;;  %v1077_v24 = vrot.slane %v7880_v7, %v1076_v10  ;;  %v3166_v25 = vld [vmem:[#allocation13 + $0xe00] sm:$0xff] }
 0x34c   :  { %5936 = vmatprep.subr.bf16.mxu1 %v7240_v26  ;;  %5971 = vmatprep.subr.bf16.mxu0 %v7392_v17  ;;  %v3170_v26 = vld [vmem:[#allocation13 + $0xe20] sm:$0xff] }
 0x34d   :  { %v7335_v39 = vcombine.low %v3166_v25, %v3170_v26 }
 0x34f   :  { %5937 = vmatpush2.bf16.msra.mxu1 %v7239_v34  ;;  %5972 = vmatpush2.bf16.msra.mxu0 %v7391_v35  ;;  %v7336_v34 = vcombine.high %v3166_v25, %v3170_v26  ;;  %v2839_v25 = vld [vmem:[#allocation13 + $0x3c8] sm:$0xff] }
 0x350   :  { %5938 = vmatprep.subr.bf16.mxu1 %v7232_v16  ;;  %5973 = vmatprep.subr.bf16.mxu0 %v7384_v37  ;;  %v2843_v26 = vld [vmem:[#allocation13 + $0x3e8] sm:$0xff] }
 0x353   :  { %5939 = vmatpush2.bf16.msra.mxu1 %v7231_v40  ;;  %5974 = vmatpush2.bf16.msra.mxu0 %v7383_v41  ;;  %v7074_v41 = vcombine.high %v7916_v22, %v7918_v23 }
 0x354   :  { %5940 = vmatprep.subr.bf16.mxu1 %v7224_v43  ;;  %5975 = vmatprep.subr.bf16.mxu0 %v7376_v45  ;;  %v2767_v45 = vld [vmem:[#allocation13 + $0x188] sm:$0xff] }
 0x357   :  { %5941 = vmatpush2.bf16.msra.mxu1 %v7223_v51  ;;  %5976 = vmatpush2.bf16.msra.mxu0 %v7375_v53  ;;  %v6938_v53 = vcombine.high %v2767_v45, %v2771_v47 }
 0x358   :  { %5942 = vmatprep.subr.bf16.mxu1 %v7216_v54  ;;  %5977 = vmatprep.subr.bf16.mxu0 %v7368_v56  ;;  %v2759_v54 = vld [vmem:[#allocation13 + $0x148] sm:$0xff]  ;;  %v6937_v56 = vcombine.low %v2767_v45, %v2771_v47 }
 0x359   :  { %v6930_v57 = vcombine.high %v2759_v54, %v2763_v55  ;;  %v2799_v45 = vld [vmem:[#allocation13 + $0x288] sm:$0xff] }
 0x35a   :  { %v2803_v47 = vld [vmem:[#allocation13 + $0x2a8] sm:$0xff] }
 0x35b   :  { %5943 = vmatpush2.bf16.msra.mxu1 %v7215_v60  ;;  %5978 = vmatpush2.bf16.msra.mxu0 %v7367_v61  ;;  %v6929_v60 = vcombine.low %v2759_v54, %v2763_v55  ;;  %v6922_v61 = vcombine.high %v2751_v58, %v2755_v59  ;;  %v6970_v54 = vcombine.high %v2799_v45, %v2803_v47  ;;  %v1084_v55 = vsub.s32 7, %v7838_v28 }
 0x35c   :  { %5944 = vmatprep.subr.bf16.mxu1 %v7208_v62  ;;  %5979 = vmatprep.subr.bf16.mxu0 %v7360_v0  ;;  %v2743_v62 = vld [vmem:[#allocation13 + $0xc8] sm:$0xff]  ;;  %v6921_v0 = vcombine.low %v2751_v58, %v2755_v59  ;;  %v6969_v58 = vcombine.low %v2799_v45, %v2803_v47  ;;  %v7552_v59 = vld [vmem:[#allocation12] sm:$0xff] }
 0x35d   :  { %v6914_v1 = vcombine.high %v2743_v62, %v2747_v63 }
 0x35f   :  { %5945 = vmatpush2.bf16.msra.mxu1 %v7207_v5  ;;  %5980 = vmatpush2.bf16.msra.mxu0 %v7359_v6  ;;  %v6913_v5 = vcombine.low %v2743_v62, %v2747_v63  ;;  %v6906_v6 = vcombine.high %v2735_v2, %v2739_v3  ;;  %v1085_v62 = vrot.slane %v7552_v59, %v1084_v55  ;;  %v2783_v63 = vld [vmem:[#allocation13 + $0x208] sm:$0xff] }
 0x360   :  { %5996 = vmatprep.subr.bf16.mxu1 %v6946_v8  ;;  %5981 = vmatprep.subr.bf16.mxu0 %v7352_v9  ;;  %v2727_v8 = vld [vmem:[#allocation13 + $0x48] sm:$0xff] }
 0x361   :  { %v2731_v9 = vld [vmem:[#allocation13 + $0x68] sm:$0xff] }
 0x362   :  { %v2572_v15 = vpop.f32.mrf.mxu1  ;;  %v6898_v12 = vcombine.high %v2727_v8, %v2731_v9 }
 0x363   :  { %v2573_v17 = vadd.f32 %v2572_v15, %v1073_v19  ;;  %v2613_v30 = vpop.f32.mrf.mxu0  ;;  %5982 = vmatpush2.bf16.msra.mxu0 %v7351_v20  ;;  %v2719_v19 = vld [vmem:[#allocation13 + $0x8] sm:$0xff] }
 0x364   :  { %v2574_v33 = vpop.f32.mrf.mxu1  ;;  %5983 = vmatprep.subr.bf16.mxu0 %v7344_v21  ;;  %v2723_v20 = vld [vmem:[#allocation13 + $0x28] sm:$0xff]  ;;  %v6897_v21 = vcombine.low %v2727_v8, %v2731_v9 }
 0x365   :  { %v2614_v35 = vadd.f32 %v2613_v30, %v2573_v17  ;;  %v2575_v16 = vadd.f32 %v2574_v33, %v1077_v24  ;;  %v2615_v36 = vpop.f32.mrf.mxu0  ;;  %v6890_v24 = vcombine.high %v2719_v19, %v2723_v20  ;;  %v6889_v15 = vcombine.low %v2719_v19, %v2723_v20  ;;  %v2831_v30 = vld [vmem:[#allocation13 + $0x388] sm:$0xff] }
 0x366   :  { %v2576_v37 = vpop.f32.mrf.mxu1  ;;  %v7010_v17 = vcombine.high %v2839_v25, %v2843_v26  ;;  %v7009_v33 = vcombine.low %v2839_v25, %v2843_v26  ;;  %v3031_v19 = vld [vmem:[#allocation13 + $0x9c8] sm:$0xff] }
 0x367   :  { %v2616_v18 = vadd.f32 %v2615_v36, %v2575_v16  ;;  %v2617_v38 = vpop.f32.mrf.mxu0  ;;  %5984 = vmatpush2.bf16.msra.mxu0 %v7343_v32  ;;  %v2706_v40 = vmax.f32 %v2614_v35, 0.0  ;;  %v2835_v32 = vld [vmem:[#allocation13 + $0x3a8] sm:$0xff] }
 0x368   :  { %v2577_v7 = vpop.f32.mrf.mxu1  ;;  %5985 = vmatprep.subr.bf16.mxu0 %v7336_v34  ;;  %v7002_v34 = vcombine.high %v2831_v30, %v2835_v32  ;;  %v2823_v35 = vld [vmem:[#allocation13 + $0x348] sm:$0xff]  ;;  %v7001_v36 = vcombine.low %v2831_v30, %v2835_v32 }
 0x369   :  { %v2707_v43 = vmax.f32 %v2616_v18, 0.0  ;;  %v2618_v44 = vpop.f32.mrf.mxu0  ;;  %v7936_v51 = vpack.c.bf16 %v2706_v40, %v2706_v40  ;;  %v2827_v16 = vld [vmem:[#allocation13 + $0x368] sm:$0xff] }
 0x36a   :  { %v6994_v37 = vcombine.high %v2823_v35, %v2827_v16  ;;  %v2815_v18 = vld [vmem:[#allocation13 + $0x308] sm:$0xff] }
 0x36b   :  { %v7934_v48 = vpack.c.bf16 %v2707_v43, %v2707_v43  ;;  %5986 = vmatpush2.bf16.msra.mxu0 %v7335_v39  ;;  %v2819_v38 = vld [vmem:[#allocation13 + $0x328] sm:$0xff]  ;;  %v6993_v39 = vcombine.low %v2823_v35, %v2827_v16 }
 0x36c   :  { %6037 = vmatprep.subr.bf16.mxu0 %v7074_v41  ;;  %v6986_v40 = vcombine.high %v2815_v18, %v2819_v38  ;;  %v2807_v7 = vld [vmem:[#allocation13 + $0x2c8] sm:$0xff]  ;;  %v6985_v43 = vcombine.low %v2815_v18, %v2819_v38 }
 0x36d   :  { %5946 = vmatprep.mubr.bf16.mxu1 %v7934_v48  ;;  %v2811_v41 = vld [vmem:[#allocation13 + $0x2e8] sm:$0xff] }
 0x36e   :  { %5947 = vmatmul.mubr.bf16.vlgmr.msra.gmra.mxu1 %v7936_v51  ;;  %v6978_v44 = vcombine.high %v2807_v7, %v2811_v41  ;;  %v3035_v20 = vld [vmem:[#allocation13 + $0x9e8] sm:$0xff] }
 0x36f   :  { %5997 = vmatpush1.bf16.msra.mxu1 %v6945_v49  ;;  %6028 = vmatprep.mubr.bf16.mxu1 %v7890_v46  ;;  %v6977_v49 = vcombine.low %v2807_v7, %v2811_v41  ;;  %v7202_v30 = vcombine.high %v3031_v19, %v3035_v20  ;;  %v2899_v35 = vld [vmem:[#allocation13 + $0x5a8] sm:$0xff]  ;;  %v7201_v18 = vcombine.low %v3031_v19, %v3035_v20 }
 0x370   :  { %5998 = vmatprep.subr.bf16.mxu1 %v6938_v53  ;;  %v1080_v53 = vsub.s32 6, %v7838_v28  ;;  %v3023_v16 = vld [vmem:[#allocation13 + $0x988] sm:$0xff] }
 0x371   :  { %v2891_v41 = vld [vmem:[#allocation13 + $0x568] sm:$0xff] }
 0x373   :  { %5999 = vmatpush1.bf16.msra.mxu1 %v6937_v56  ;;  %v2791_v56 = vld [vmem:[#allocation13 + $0x248] sm:$0xff] }
 0x374   :  { %6000 = vmatprep.subr.bf16.mxu1 %v6930_v57  ;;  %v2795_v57 = vld [vmem:[#allocation13 + $0x268] sm:$0xff] }
 0x377   :  { %6001 = vmatpush1.bf16.msra.mxu1 %v6929_v60  ;;  %v1081_v60 = vrot.slane %v7552_v59, %v1080_v53  ;;  %v3011_v59 = vld [vmem:[#allocation13 + $0x928] sm:$0xff] }
 0x378   :  { %6002 = vmatprep.subr.bf16.mxu1 %v6922_v61  ;;  %v6962_v61 = vcombine.high %v2791_v56, %v2795_v57 }
 0x37b   :  { %6003 = vmatpush1.bf16.msra.mxu1 %v6921_v0  ;;  %v2787_v0 = vld [vmem:[#allocation13 + $0x228] sm:$0xff] }
 0x37c   :  { %6004 = vmatprep.subr.bf16.mxu1 %v6914_v1  ;;  %v6954_v8 = vcombine.high %v2783_v63, %v2787_v0  ;;  %v6953_v26 = vcombine.low %v2783_v63, %v2787_v0  ;;  %v2999_v63 = vld [vmem:[#allocation13 + $0x8c8] sm:$0xff] }
 0x37d   :  { %v3003_v0 = vld [vmem:[#allocation13 + $0x8e8] sm:$0xff] }
 0x37e   :  { %v7169_v19 = vcombine.low %v2999_v63, %v3003_v0 }
 0x37f   :  { %6005 = vmatpush1.bf16.msra.mxu1 %v6913_v5  ;;  %v6961_v5 = vcombine.low %v2791_v56, %v2795_v57  ;;  %v2879_v56 = vld [vmem:[#allocation13 + $0x508] sm:$0xff] }
 0x380   :  { %6006 = vmatprep.subr.bf16.mxu1 %v6906_v6  ;;  %v2883_v57 = vld [vmem:[#allocation13 + $0x528] sm:$0xff] }
 0x381   :  { %v7050_v23 = vcombine.high %v2879_v56, %v2883_v57 }
 0x383   :  { %6007 = vmatpush1.bf16.msra.mxu1 %v6905_v11 }
 0x384   :  { %6008 = vmatprep.subr.bf16.mxu1 %v6898_v12 }
 0x387   :  { %6009 = vmatpush1.bf16.msra.mxu1 %v6897_v21 }
 0x388   :  { %6010 = vmatprep.subr.bf16.mxu1 %v6890_v24 }
 0x38b   :  { %6011 = vmatpush1.bf16.msra.mxu1 %v6889_v15 }
 0x38c   :  { %6012 = vmatprep.subr.bf16.mxu1 %v7010_v17 }
 0x38f   :  { %6013 = vmatpush2.bf16.msra.mxu1 %v7009_v33 }
 0x390   :  { %6014 = vmatprep.subr.bf16.mxu1 %v7002_v34  ;;  %v2895_v34 = vld [vmem:[#allocation13 + $0x588] sm:$0xff] }
 0x391   :  { %v7065_v45 = vcombine.low %v2895_v34, %v2899_v35 }
 0x393   :  { %6015 = vmatpush2.bf16.msra.mxu1 %v7001_v36  ;;  %v3027_v36 = vld [vmem:[#allocation13 + $0x9a8] sm:$0xff] }
 0x394   :  { %6016 = vmatprep.subr.bf16.mxu1 %v6994_v37  ;;  %v7194_v7 = vcombine.high %v3023_v16, %v3027_v36  ;;  %v7193_v47 = vcombine.low %v3023_v16, %v3027_v36  ;;  %v2975_v16 = vld [vmem:[#allocation13 + $0x808] sm:$0xff] }
 0x395   :  { %v2979_v36 = vld [vmem:[#allocation13 + $0x828] sm:$0xff] }
 0x397   :  { %6017 = vmatpush2.bf16.msra.mxu1 %v6993_v39  ;;  %v2887_v39 = vld [vmem:[#allocation13 + $0x548] sm:$0xff] }
 0x398   :  { %6018 = vmatprep.subr.bf16.mxu1 %v6986_v40  ;;  %v7066_v40 = vcombine.high %v2895_v34, %v2899_v35  ;;  %v2847_v34 = vld [vmem:[#allocation13 + $0x408] sm:$0xff] }
 0x399   :  { %v2851_v35 = vld [vmem:[#allocation13 + $0x428] sm:$0xff] }
 0x39b   :  { %6019 = vmatpush2.bf16.msra.mxu1 %v6985_v43  ;;  %v3015_v43 = vld [vmem:[#allocation13 + $0x948] sm:$0xff] }
 0x39c   :  { %6020 = vmatprep.subr.bf16.mxu1 %v6978_v44  ;;  %v3019_v44 = vld [vmem:[#allocation13 + $0x968] sm:$0xff] }
 0x39d   :  { %v7185_v22 = vcombine.low %v3015_v43, %v3019_v44 }
 0x39f   :  { %6021 = vmatpush2.bf16.msra.mxu1 %v6977_v49  ;;  %v7058_v49 = vcombine.high %v2887_v39, %v2891_v41 }
 0x3a0   :  { %6022 = vmatprep.subr.bf16.mxu1 %v6970_v54  ;;  %v7186_v54 = vcombine.high %v3015_v43, %v3019_v44  ;;  %v2971_v43 = vld [vmem:[#allocation13 + $0x7e8] sm:$0xff] }
 0x3a1   :  { %v3095_v44 = vld [vmem:[#allocation13 + $0xbc8] sm:$0xff] }
 0x3a2   :  { %v2654_v1 = vpop.f32.mrf.mxu1 }
 0x3a3   :  { %v2655_v2 = vadd.f32 %v2654_v1, %v1081_v60  ;;  %v2695_v3 = vpop.f32.mrf.mxu0  ;;  %6023 = vmatpush2.bf16.msra.mxu1 %v6969_v58  ;;  %v3007_v58 = vld [vmem:[#allocation13 + $0x908] sm:$0xff]  ;;  %v7057_v60 = vcombine.low %v2887_v39, %v2891_v41  ;;  %v7049_v1 = vcombine.low %v2879_v56, %v2883_v57 }
 0x3a4   :  { %v2656_v6 = vpop.f32.mrf.mxu1  ;;  %6024 = vmatprep.subr.bf16.mxu1 %v6962_v61  ;;  %v2871_v61 = vld [vmem:[#allocation13 + $0x4c8] sm:$0xff] }
 0x3a5   :  { %v2696_v9 = vadd.f32 %v2695_v3, %v2655_v2  ;;  %v2657_v11 = vadd.f32 %v2656_v6, %v1085_v62  ;;  %v2697_v12 = vpop.f32.mrf.mxu0  ;;  %v2875_v62 = vld [vmem:[#allocation13 + $0x4e8] sm:$0xff]  ;;  %v7177_v2 = vcombine.low %v3007_v58, %v3011_v59 }
 0x3a6   :  { %v2658_v21 = vpop.f32.mrf.mxu1  ;;  %v7042_v3 = vcombine.high %v2871_v61, %v2875_v62  ;;  %v2863_v6 = vld [vmem:[#allocation13 + $0x488] sm:$0xff] }
 0x3a7   :  { %v2698_v24 = vadd.f32 %v2697_v12, %v2657_v11  ;;  %v2699_v25 = vpop.f32.mrf.mxu0  ;;  %6025 = vmatpush2.bf16.msra.mxu1 %v6961_v5  ;;  %v2708_v15 = vmax.f32 %v2696_v9, 0.0  ;;  %v7170_v5 = vcombine.high %v2999_v63, %v3003_v0  ;;  %v2991_v9 = vld [vmem:[#allocation13 + $0x888] sm:$0xff]  ;;  %v7041_v12 = vcombine.low %v2871_v61, %v2875_v62 }
 0x3a8   :  { %v2659_v17 = vpop.f32.mrf.mxu1  ;;  %6026 = vmatprep.subr.bf16.mxu1 %v6954_v8  ;;  %v2867_v8 = vld [vmem:[#allocation13 + $0x4a8] sm:$0xff] }
 0x3a9   :  { %v2709_v32 = vmax.f32 %v2698_v24, 0.0  ;;  %v2700_v33 = vpop.f32.mrf.mxu0  ;;  %v7949_v38 = vpack.c.bf16 %v2708_v15, %v2708_v15  ;;  %v2995_v11 = vld [vmem:[#allocation13 + $0x8a8] sm:$0xff]  ;;  %v7034_v20 = vcombine.high %v2863_v6, %v2867_v8  ;;  %v7033_v17 = vcombine.low %v2863_v6, %v2867_v8 }
 0x3aa   :  { %v7162_v21 = vcombine.high %v2991_v9, %v2995_v11  ;;  %v2855_v24 = vld [vmem:[#allocation13 + $0x448] sm:$0xff] }
 0x3ab   :  { %v7947_v37 = vpack.c.bf16 %v2709_v32, %v2709_v32  ;;  %6027 = vmatpush2.bf16.msra.mxu1 %v6953_v26  ;;  %v2859_v25 = vld [vmem:[#allocation13 + $0x468] sm:$0xff] }
 0x3ac   :  { %6078 = vmatprep.subr.bf16.mxu1 %v7202_v30  ;;  %v2983_v26 = vld [vmem:[#allocation13 + $0x848] sm:$0xff]  ;;  %v7161_v30 = vcombine.low %v2991_v9, %v2995_v11  ;;  %v7026_v32 = vcombine.high %v2855_v24, %v2859_v25 }
 0x3ad   :  { %5987 = vmatprep.mubr.bf16.mxu0 %v7947_v37  ;;  %v2987_v15 = vld [vmem:[#allocation13 + $0x868] sm:$0xff] }
 0x3ae   :  { %6029 = vmatmul.mubr.bf16.vlgmr.msra.gmra.mxu1 %v7905_v42  ;;  %5988 = vmatmul.mubr.bf16.vlgmr.msra.gmra.mxu0 %v7949_v38  ;;  %v7154_v33 = vcombine.high %v2983_v26, %v2987_v15  ;;  %v7153_v39 = vcombine.low %v2983_v26, %v2987_v15  ;;  %v2967_v41 = vld [vmem:[#allocation13 + $0x7c8] sm:$0xff] }
 0x3af   :  { %6038 = vmatpush1.bf16.msra.mxu0 %v7073_v27  ;;  %6079 = vmatpush1.bf16.msra.mxu1 %v7201_v18  ;;  %v7178_v27 = vcombine.high %v3007_v58, %v3011_v59  ;;  %v7025_v18 = vcombine.low %v2855_v24, %v2859_v25  ;;  %v2959_v57 = vld [vmem:[#allocation13 + $0x788] sm:$0xff] }
 0x3b0   :  { %6110 = vmatprep.mubr.bf16.mxu1 %v7934_v48  ;;  %6069 = vmatprep.mubr.bf16.mxu0 %v7910_v13  ;;  %v2963_v58 = vld [vmem:[#allocation13 + $0x7a8] sm:$0xff] }
 0x3b1   :  { %6039 = vmatprep.subr.bf16.mxu0 %v7066_v40  ;;  %6080 = vmatprep.subr.bf16.mxu1 %v7194_v7  ;;  %v7018_v40 = vcombine.high %v2847_v34, %v2851_v35  ;;  %v7146_v7 = vcombine.high %v2975_v16, %v2979_v36  ;;  %v3087_v59 = vld [vmem:[#allocation13 + $0xb88] sm:$0xff] }
 0x3b2   :  { %v2951_v62 = vld [vmem:[#allocation13 + $0x748] sm:$0xff] }
 0x3b3   :  { %6040 = vmatpush1.bf16.msra.mxu0 %v7065_v45  ;;  %6081 = vmatpush1.bf16.msra.mxu1 %v7193_v47  ;;  %v3099_v45 = vld [vmem:[#allocation13 + $0xbe8] sm:$0xff]  ;;  %v7017_v47 = vcombine.low %v2847_v34, %v2851_v35 }
 0x3b4   :  { %6041 = vmatprep.subr.bf16.mxu0 %v7058_v49  ;;  %6082 = vmatprep.subr.bf16.mxu1 %v7186_v54  ;;  %v7145_v49 = vcombine.low %v2975_v16, %v2979_v36  ;;  %v7138_v54 = vcombine.high %v2967_v41, %v2971_v43  ;;  %v7266_v56 = vcombine.high %v3095_v44, %v3099_v45  ;;  %v2955_v63 = vld [vmem:[#allocation13 + $0x768] sm:$0xff] }
 0x3b5   :  { %v3079_v0 = vld [vmem:[#allocation13 + $0xb48] sm:$0xff] }
 0x3b6   :  { %v2943_v8 = vld [vmem:[#allocation13 + $0x708] sm:$0xff] }
 0x3b7   :  { %6042 = vmatpush1.bf16.msra.mxu0 %v7057_v60  ;;  %6083 = vmatpush1.bf16.msra.mxu1 %v7185_v22  ;;  %v3091_v60 = vld [vmem:[#allocation13 + $0xba8] sm:$0xff]  ;;  %v7137_v22 = vcombine.low %v2967_v41, %v2971_v43 }
 0x3b8   :  { %6043 = vmatprep.subr.bf16.mxu0 %v7050_v23  ;;  %6084 = vmatprep.subr.bf16.mxu1 %v7178_v27  ;;  %v7265_v23 = vcombine.low %v3095_v44, %v3099_v45  ;;  %v7130_v27 = vcombine.high %v2959_v57, %v2963_v58  ;;  %v7258_v61 = vcombine.high %v3087_v59, %v3091_v60  ;;  %v2947_v9 = vld [vmem:[#allocation13 + $0x728] sm:$0xff] }
 0x3b9   :  { %v3071_v11 = vld [vmem:[#allocation13 + $0xb08] sm:$0xff] }
 0x3ba   :  { %v2935_v25 = vld [vmem:[#allocation13 + $0x6c8] sm:$0xff] }
 0x3bb   :  { %6044 = vmatpush1.bf16.msra.mxu0 %v7049_v1  ;;  %6085 = vmatpush1.bf16.msra.mxu1 %v7177_v2  ;;  %v3083_v1 = vld [vmem:[#allocation13 + $0xb68] sm:$0xff]  ;;  %v7129_v2 = vcombine.low %v2959_v57, %v2963_v58 }
 0x3bc   :  { %6045 = vmatprep.subr.bf16.mxu0 %v7042_v3  ;;  %6086 = vmatprep.subr.bf16.mxu1 %v7170_v5  ;;  %v7257_v3 = vcombine.low %v3087_v59, %v3091_v60  ;;  %v7122_v5 = vcombine.high %v2951_v62, %v2955_v63  ;;  %v7250_v6 = vcombine.high %v3079_v0, %v3083_v1  ;;  %v2939_v26 = vld [vmem:[#allocation13 + $0x6e8] sm:$0xff] }
 0x3bd   :  { %v3063_v15 = vld [vmem:[#allocation13 + $0xac8] sm:$0xff] }
 0x3be   :  { %v2927_v35 = vld [vmem:[#allocation13 + $0x688] sm:$0xff] }
 0x3bf   :  { %6046 = vmatpush1.bf16.msra.mxu0 %v7041_v12  ;;  %6087 = vmatpush1.bf16.msra.mxu1 %v7169_v19  ;;  %v3075_v12 = vld [vmem:[#allocation13 + $0xb28] sm:$0xff]  ;;  %v7121_v19 = vcombine.low %v2951_v62, %v2955_v63 }
 0x3c0   :  { %6047 = vmatprep.subr.bf16.mxu0 %v7034_v20  ;;  %6088 = vmatprep.subr.bf16.mxu1 %v7162_v21  ;;  %v7249_v20 = vcombine.low %v3079_v0, %v3083_v1  ;;  %v7114_v21 = vcombine.high %v2943_v8, %v2947_v9  ;;  %v7242_v24 = vcombine.high %v3071_v11, %v3075_v12  ;;  %v2931_v16 = vld [vmem:[#allocation13 + $0x6a8] sm:$0xff] }
 0x3c1   :  { %v3055_v36 = vld [vmem:[#allocation13 + $0xa88] sm:$0xff] }
 0x3c2   :  { %v2919_v43 = vld [vmem:[#allocation13 + $0x648] sm:$0xff] }
 0x3c3   :  { %6048 = vmatpush1.bf16.msra.mxu0 %v7033_v17  ;;  %6089 = vmatpush1.bf16.msra.mxu1 %v7161_v30  ;;  %v3067_v17 = vld [vmem:[#allocation13 + $0xae8] sm:$0xff]  ;;  %v7113_v30 = vcombine.low %v2943_v8, %v2947_v9 }
 0x3c4   :  { %6049 = vmatprep.subr.bf16.mxu0 %v7026_v32  ;;  %6090 = vmatprep.subr.bf16.mxu1 %v7154_v33  ;;  %v7241_v32 = vcombine.low %v3071_v11, %v3075_v12  ;;  %v7106_v33 = vcombine.high %v2935_v25, %v2939_v26  ;;  %v7234_v34 = vcombine.high %v3063_v15, %v3067_v17  ;;  %v2923_v44 = vld [vmem:[#allocation13 + $0x668] sm:$0xff] }
 0x3c5   :  { %v3047_v45 = vld [vmem:[#allocation13 + $0xa48] sm:$0xff] }
 0x3c6   :  { %v2911_v58 = vld [vmem:[#allocation13 + $0x608] sm:$0xff] }
 0x3c7   :  { %6050 = vmatpush1.bf16.msra.mxu0 %v7025_v18  ;;  %6091 = vmatpush1.bf16.msra.mxu1 %v7153_v39  ;;  %v3059_v18 = vld [vmem:[#allocation13 + $0xaa8] sm:$0xff]  ;;  %v7105_v39 = vcombine.low %v2935_v25, %v2939_v26  ;;  %v2768_v26 = vld [vmem:[#allocation13 + $0x190] sm:$0xff] }
 0x3c8   :  { %6051 = vmatprep.subr.bf16.mxu0 %v7018_v40  ;;  %6092 = vmatprep.subr.bf16.mxu1 %v7146_v7  ;;  %v7233_v40 = vcombine.low %v3063_v15, %v3067_v17  ;;  %v7098_v7 = vcombine.high %v2927_v35, %v2931_v16  ;;  %v7226_v41 = vcombine.high %v3055_v36, %v3059_v18  ;;  %v2915_v59 = vld [vmem:[#allocation13 + $0x628] sm:$0xff]  ;;  %v2772_v15 = vld [vmem:[#allocation13 + $0x1b0] sm:$0xff] }
 0x3c9   :  { %v3039_v60 = vld [vmem:[#allocation13 + $0xa08] sm:$0xff]  ;;  %v7082_v63 = vcombine.high %v2911_v58, %v2915_v59  ;;  %v7081_v9 = vcombine.low %v2911_v58, %v2915_v59  ;;  %v2756_v58 = vld [vmem:[#allocation13 + $0x130] sm:$0xff] }
 0x3ca   :  { %v3159_v1 = vld [vmem:[#allocation13 + $0xdc8] sm:$0xff] }
 0x3cb   :  { %6052 = vmatpush1.bf16.msra.mxu0 %v7017_v47  ;;  %6093 = vmatpush1.bf16.msra.mxu1 %v7145_v49  ;;  %v3051_v47 = vld [vmem:[#allocation13 + $0xa68] sm:$0xff]  ;;  %v7097_v49 = vcombine.low %v2927_v35, %v2931_v16  ;;  %v6940_v35 = vcombine.high %v2768_v26, %v2772_v15 }
 0x3cc   :  { %6053 = vmatprep.subr.bf16.mxu0 %v7138_v54  ;;  %6094 = vmatprep.subr.bf16.mxu1 %v7266_v56  ;;  %v7225_v54 = vcombine.low %v3055_v36, %v3059_v18  ;;  %v7090_v56 = vcombine.high %v2919_v43, %v2923_v44  ;;  %v7218_v57 = vcombine.high %v3047_v45, %v3051_v47  ;;  %v3155_v25 = vld [vmem:[#allocation13 + $0xda8] sm:$0xff]  ;;  %v2760_v18 = vld [vmem:[#allocation13 + $0x150] sm:$0xff] }
 0x3cd   :  { %v3143_v16 = vld [vmem:[#allocation13 + $0xd48] sm:$0xff] }
 0x3ce   :  { %v3147_v36 = vld [vmem:[#allocation13 + $0xd68] sm:$0xff] }
 0x3cf   :  { %6054 = vmatpush2.bf16.msra.mxu0 %v7137_v22  ;;  %6095 = vmatpush2.bf16.msra.mxu1 %v7265_v23  ;;  %v3043_v22 = vld [vmem:[#allocation13 + $0xa28] sm:$0xff]  ;;  %v7313_v59 = vcombine.low %v3143_v16, %v3147_v36 }
 0x3d0   :  { %6055 = vmatprep.subr.bf16.mxu0 %v7130_v27  ;;  %6096 = vmatprep.subr.bf16.mxu1 %v7258_v61  ;;  %v7089_v27 = vcombine.low %v2919_v43, %v2923_v44  ;;  %v7217_v61 = vcombine.low %v3047_v45, %v3051_v47  ;;  %v7210_v0 = vcombine.high %v3039_v60, %v3043_v22 }
 0x3d1   :  { %v7209_v11 = vcombine.low %v3039_v60, %v3043_v22  ;;  %v6939_v43 = vcombine.low %v2768_v26, %v2772_v15  ;;  %v7314_v44 = vcombine.high %v3143_v16, %v3147_v36  ;;  %v2728_v26 = vld [vmem:[#allocation13 + $0x50] sm:$0xff] }
 0x3d2   :  { %v2732_v15 = vld [vmem:[#allocation13 + $0x70] sm:$0xff] }
 0x3d3   :  { %6056 = vmatpush2.bf16.msra.mxu0 %v7129_v2  ;;  %6097 = vmatpush2.bf16.msra.mxu1 %v7257_v3  ;;  %v3163_v2 = vld [vmem:[#allocation13 + $0xde8] sm:$0xff]  ;;  %v2776_v3 = vld [vmem:[#allocation13 + $0x1d0] sm:$0xff] }
 0x3d4   :  { %6057 = vmatprep.subr.bf16.mxu0 %v7122_v5  ;;  %6098 = vmatprep.subr.bf16.mxu1 %v7250_v6  ;;  %v2780_v5 = vld [vmem:[#allocation13 + $0x1f0] sm:$0xff]  ;;  %v3230_v6 = vld [vmem:[#allocation15] sm:$0xff] }
 0x3d5   :  { %v3239_v17 = vrot.slane %v3230_v6, %v7844_v31  ;;  %v2720_v16 = vld [vmem:[#allocation13 + $0x10] sm:$0xff] }
 0x3d6   :  { %v2724_v36 = vld [vmem:[#allocation13 + $0x30] sm:$0xff] }
 0x3d7   :  { %6058 = vmatpush2.bf16.msra.mxu0 %v7121_v19  ;;  %6099 = vmatpush2.bf16.msra.mxu1 %v7249_v20  ;;  %v7330_v19 = vcombine.high %v3159_v1, %v3163_v2  ;;  %v6948_v20 = vcombine.high %v2776_v3, %v2780_v5 }
 0x3d8   :  { %6059 = vmatprep.subr.bf16.mxu0 %v7114_v21  ;;  %6100 = vmatprep.subr.bf16.mxu1 %v7242_v24  ;;  %v3235_v21 = vrot.slane %v3230_v6, %v7841_v29  ;;  %v3151_v24 = vld [vmem:[#allocation13 + $0xd88] sm:$0xff] }
 0x3d9   :  { %v3119_v6 = vld [vmem:[#allocation13 + $0xc88] sm:$0xff] }
 0x3db   :  { %6060 = vmatpush2.bf16.msra.mxu0 %v7113_v30  ;;  %6101 = vmatpush2.bf16.msra.mxu1 %v7241_v32  ;;  %v7329_v30 = vcombine.low %v3159_v1, %v3163_v2  ;;  %v6947_v32 = vcombine.low %v2776_v3, %v2780_v5 }
 0x3dc   :  { %6061 = vmatprep.subr.bf16.mxu0 %v7106_v33  ;;  %6102 = vmatprep.subr.bf16.mxu1 %v7234_v34  ;;  %v7322_v34 = vcombine.high %v3151_v24, %v3155_v25 }
 0x3df   :  { %6062 = vmatpush2.bf16.msra.mxu0 %v7105_v39  ;;  %6103 = vmatpush2.bf16.msra.mxu1 %v7233_v40  ;;  %v2764_v39 = vld [vmem:[#allocation13 + $0x170] sm:$0xff] }
 0x3e0   :  { %6063 = vmatprep.subr.bf16.mxu0 %v7098_v7  ;;  %6104 = vmatprep.subr.bf16.mxu1 %v7226_v41  ;;  %v7321_v7 = vcombine.low %v3151_v24, %v3155_v25  ;;  %v6932_v47 = vcombine.high %v2760_v18, %v2764_v39  ;;  %v6931_v22 = vcombine.low %v2760_v18, %v2764_v39  ;;  %v3111_v24 = vld [vmem:[#allocation13 + $0xc48] sm:$0xff] }
 0x3e1   :  { %v3115_v25 = vld [vmem:[#allocation13 + $0xc68] sm:$0xff]  ;;  %v6899_v18 = vcombine.low %v2728_v26, %v2732_v15 }
 0x3e2   :  { %v5866_v23 = vpop.f32.mrf.mxu1 }
 0x3e3   :  { %6064 = vmatpush2.bf16.msra.mxu0 %v7097_v49  ;;  %6105 = vmatpush2.bf16.msra.mxu1 %v7225_v54  ;;  %v5867_v33 = vadd.f32 %v5866_v23, %v3235_v21  ;;  %v3135_v49 = vld [vmem:[#allocation13 + $0xd08] sm:$0xff] }
 0x3e4   :  { %v5868_v62 = vpop.f32.mrf.mxu1  ;;  %6065 = vmatprep.subr.bf16.mxu0 %v7090_v56  ;;  %6106 = vmatprep.subr.bf16.mxu1 %v7218_v57  ;;  %v3139_v54 = vld [vmem:[#allocation13 + $0xd28] sm:$0xff]  ;;  %v2752_v57 = vld [vmem:[#allocation13 + $0x110] sm:$0xff] }
 0x3e5   :  { %v5869_v40 = vadd.f32 %v5868_v62, %v3239_v17  ;;  %v7306_v23 = vcombine.high %v3135_v49, %v3139_v54  ;;  %v3131_v62 = vld [vmem:[#allocation13 + $0xce8] sm:$0xff]  ;;  %v7305_v1 = vcombine.low %v3135_v49, %v3139_v54  ;;  %v6923_v2 = vcombine.low %v2752_v57, %v2756_v58 }
 0x3e6   :  { %v5870_v8 = vpop.f32.mrf.mxu1  ;;  %v6891_v49 = vcombine.low %v2720_v16, %v2724_v36 }
 0x3e7   :  { %6066 = vmatpush2.bf16.msra.mxu0 %v7089_v27  ;;  %6107 = vmatpush2.bf16.msra.mxu1 %v7217_v61  ;;  %v6924_v27 = vcombine.high %v2752_v57, %v2756_v58  ;;  %v3127_v61 = vld [vmem:[#allocation13 + $0xcc8] sm:$0xff] }
 0x3e8   :  { %v5871_v12 = vpop.f32.mrf.mxu1  ;;  %6067 = vmatprep.subr.bf16.mxu0 %v7082_v63  ;;  %6108 = vmatprep.subr.bf16.mxu1 %v7210_v0  ;;  %v2744_v63 = vld [vmem:[#allocation13 + $0xd0] sm:$0xff]  ;;  %v7298_v3 = vcombine.high %v3127_v61, %v3131_v62  ;;  %v3123_v8 = vld [vmem:[#allocation13 + $0xca8] sm:$0xff] }
 0x3e9   :  { %v2748_v0 = vld [vmem:[#allocation13 + $0xf0] sm:$0xff]  ;;  %v7297_v12 = vcombine.low %v3127_v61, %v3131_v62  ;;  %v7289_v17 = vcombine.low %v3119_v6, %v3123_v8  ;;  %v3215_v57 = vld [vmem:[#allocation13 + $0xf88] sm:$0xff] }
 0x3ea   :  { %v6916_v5 = vcombine.high %v2744_v63, %v2748_v0  ;;  %v3219_v58 = vld [vmem:[#allocation13 + $0xfa8] sm:$0xff] }
 0x3eb   :  { %6068 = vmatpush2.bf16.msra.mxu0 %v7081_v9  ;;  %6109 = vmatpush2.bf16.msra.mxu1 %v7209_v11  ;;  %v2736_v9 = vld [vmem:[#allocation13 + $0x90] sm:$0xff]  ;;  %v3207_v62 = vld [vmem:[#allocation13 + $0xf48] sm:$0xff] }
 0x3ec   :  { %6119 = vmatprep.subr.bf16.mxu0 %v7330_v19  ;;  %6160 = vmatprep.subr.bf16.mxu1 %v6948_v20  ;;  %v2740_v11 = vld [vmem:[#allocation13 + $0xb0] sm:$0xff]  ;;  %v6915_v19 = vcombine.low %v2744_v63, %v2748_v0  ;;  %v7290_v20 = vcombine.high %v3119_v6, %v3123_v8  ;;  %v3211_v63 = vld [vmem:[#allocation13 + $0xf68] sm:$0xff] }
 0x3ed   :  { %v6908_v21 = vcombine.high %v2736_v9, %v2740_v11  ;;  %v2824_v0 = vld [vmem:[#allocation13 + $0x350] sm:$0xff]  ;;  %v3199_v8 = vld [vmem:[#allocation13 + $0xf08] sm:$0xff] }
 0x3ee   :  { %6070 = vmatmul.mubr.bf16.vlgmr.msra.gmra.mxu0 %v7914_v14  ;;  %6111 = vmatmul.mubr.bf16.vlgmr.msra.gmra.mxu1 %v7936_v51  ;;  %v5907_v29 = vpop.f32.mrf.mxu0 }
 0x3ef   :  { %v7963_v31 = vadd.f32 %v5907_v29, %v5867_v33  ;;  %6120 = vmatpush1.bf16.msra.mxu0 %v7329_v30  ;;  %6151 = vmatprep.mubr.bf16.mxu0 %v7947_v37  ;;  %v6907_v30 = vcombine.low %v2736_v9, %v2740_v11  ;;  %v6900_v33 = vcombine.high %v2728_v26, %v2732_v15  ;;  %v3203_v9 = vld [vmem:[#allocation13 + $0xf28] sm:$0xff]  ;;  %v2816_v11 = vld [vmem:[#allocation13 + $0x310] sm:$0xff] }
 0x3f0   :  { %6161 = vmatpush1.bf16.msra.mxu1 %v6947_v32  ;;  %6192 = vmatprep.mubr.bf16.mxu1 %v7890_v46  ;;  %v5909_v41 = vpop.f32.mrf.mxu0  ;;  %v7282_v32 = vcombine.high %v3111_v24, %v3115_v25  ;;  %v7281_v29 = vcombine.low %v3111_v24, %v3115_v25  ;;  %v3191_v25 = vld [vmem:[#allocation13 + $0xec8] sm:$0xff]  ;;  %v2808_v15 = vld [vmem:[#allocation13 + $0x2d0] sm:$0xff] }
 0x3f1   :  { %v7967_v45 = vadd.f32 %v5909_v41, %v5869_v40  ;;  %6121 = vmatprep.subr.bf16.mxu0 %v7322_v34  ;;  %6162 = vmatprep.subr.bf16.mxu1 %v6940_v35  ;;  %v3103_v34 = vld [vmem:[#allocation13 + $0xc08] sm:$0xff]  ;;  %v6892_v40 = vcombine.high %v2720_v16, %v2724_v36  ;;  %v2800_v36 = vld [vmem:[#allocation13 + $0x290] sm:$0xff] }
 0x3f2   :  { %v5911_v56 = vpop.f32.mrf.mxu0  ;;  %v3107_v35 = vld [vmem:[#allocation13 + $0xc28] sm:$0xff] }
 0x3f3   :  { %6122 = vmatpush1.bf16.msra.mxu0 %v7321_v7  ;;  %v7274_v39 = vcombine.high %v3103_v34, %v3107_v35  ;;  %v3223_v7 = vld [vmem:[#allocation13 + $0xfc8] sm:$0xff] }
 0x3f4   :  { %6163 = vmatpush1.bf16.msra.mxu1 %v6939_v43  ;;  %v5912_v60 = vpop.f32.mrf.mxu0  ;;  %6123 = vmatprep.subr.bf16.mxu0 %v7314_v44  ;;  %v3227_v41 = vld [vmem:[#allocation13 + $0xfe8] sm:$0xff]  ;;  %v2840_v43 = vld [vmem:[#allocation13 + $0x3d0] sm:$0xff] }
 0x3f5   :  { %6164 = vmatprep.subr.bf16.mxu1 %v6932_v47  ;;  %v2844_v44 = vld [vmem:[#allocation13 + $0x3f0] sm:$0xff]  ;;  %v7273_v47 = vcombine.low %v3103_v34, %v3107_v35  ;;  %v7394_v54 = vcombine.high %v3223_v7, %v3227_v41  ;;  %v3195_v26 = vld [vmem:[#allocation13 + $0xee8] sm:$0xff] }
 0x3f6   :  { %v7012_v56 = vcombine.high %v2840_v43, %v2844_v44  ;;  %v2836_v60 = vld [vmem:[#allocation13 + $0x3b0] sm:$0xff]  ;;  %v3183_v35 = vld [vmem:[#allocation13 + $0xe88] sm:$0xff] }
 0x3f7   :  { %6124 = vmatpush1.bf16.msra.mxu0 %v7313_v59  ;;  %v2832_v59 = vld [vmem:[#allocation13 + $0x390] sm:$0xff]  ;;  %v3187_v16 = vld [vmem:[#allocation13 + $0xea8] sm:$0xff] }
 0x3f8   :  { %6165 = vmatpush1.bf16.msra.mxu1 %v6931_v22  ;;  %6125 = vmatprep.subr.bf16.mxu0 %v7306_v23  ;;  %v7393_v22 = vcombine.low %v3223_v7, %v3227_v41  ;;  %v7011_v23 = vcombine.low %v2840_v43, %v2844_v44  ;;  %v7004_v61 = vcombine.high %v2832_v59, %v2836_v60  ;;  %v3175_v41 = vld [vmem:[#allocation13 + $0xe48] sm:$0xff]  ;;  %v2792_v44 = vld [vmem:[#allocation13 + $0x250] sm:$0xff] }
 0x3f9   :  { %6166 = vmatprep.subr.bf16.mxu1 %v6924_v27  ;;  %v7386_v27 = vcombine.high %v3215_v57, %v3219_v58  ;;  %v3179_v43 = vld [vmem:[#allocation13 + $0xe68] sm:$0xff] }
 0x3fb   :  { %6126 = vmatpush1.bf16.msra.mxu0 %v7305_v1  ;;  %v2828_v1 = vld [vmem:[#allocation13 + $0x370] sm:$0xff] }
 0x3fc   :  { %6167 = vmatpush1.bf16.msra.mxu1 %v6923_v2  ;;  %6127 = vmatprep.subr.bf16.mxu0 %v7298_v3  ;;  %v7385_v2 = vcombine.low %v3215_v57, %v3219_v58  ;;  %v7003_v3 = vcombine.low %v2832_v59, %v2836_v60  ;;  %v6996_v6 = vcombine.high %v2824_v0, %v2828_v1  ;;  %v3167_v58 = vld [vmem:[#allocation13 + $0xe08] sm:$0xff]  ;;  %v2784_v60 = vld [vmem:[#allocation13 + $0x210] sm:$0xff] }
 0x3fd   :  { %6168 = vmatprep.subr.bf16.mxu1 %v6916_v5  ;;  %v7378_v5 = vcombine.high %v3207_v62, %v3211_v63  ;;  %v3171_v59 = vld [vmem:[#allocation13 + $0xe28] sm:$0xff] }
 0x3ff   :  { %6128 = vmatpush1.bf16.msra.mxu0 %v7297_v12  ;;  %v2820_v12 = vld [vmem:[#allocation13 + $0x330] sm:$0xff] }
 0x400   :  { %6169 = vmatpush1.bf16.msra.mxu1 %v6915_v19  ;;  %6129 = vmatprep.subr.bf16.mxu0 %v7290_v20  ;;  %v7377_v19 = vcombine.low %v3207_v62, %v3211_v63  ;;  %v6995_v20 = vcombine.low %v2824_v0, %v2828_v1  ;;  %v6988_v24 = vcombine.high %v2816_v11, %v2820_v12  ;;  %v2904_v63 = vld [vmem:[#allocation13 + $0x5d0] sm:$0xff] }
 0x401   :  { %6170 = vmatprep.subr.bf16.mxu1 %v6908_v21  ;;  %v7370_v21 = vcombine.high %v3199_v8, %v3203_v9  ;;  %v2908_v0 = vld [vmem:[#allocation13 + $0x5f0] sm:$0xff] }
 0x402   :  { %v3032_v1 = vld [vmem:[#allocation13 + $0x9d0] sm:$0xff] }
 0x403   :  { %6130 = vmatpush1.bf16.msra.mxu0 %v7289_v17  ;;  %v2812_v17 = vld [vmem:[#allocation13 + $0x2f0] sm:$0xff] }
 0x404   :  { %6171 = vmatpush1.bf16.msra.mxu1 %v6907_v30  ;;  %6131 = vmatprep.subr.bf16.mxu0 %v7282_v32  ;;  %v7369_v30 = vcombine.low %v3199_v8, %v3203_v9  ;;  %v6987_v32 = vcombine.low %v2816_v11, %v2820_v12  ;;  %v6980_v34 = vcombine.high %v2808_v15, %v2812_v17  ;;  %v2896_v9 = vld [vmem:[#allocation13 + $0x590] sm:$0xff] }
 0x405   :  { %6172 = vmatprep.subr.bf16.mxu1 %v6900_v33  ;;  %v7362_v33 = vcombine.high %v3191_v25, %v3195_v26  ;;  %v2900_v11 = vld [vmem:[#allocation13 + $0x5b0] sm:$0xff]  ;;  %v7075_v12 = vcombine.low %v2904_v63, %v2908_v0 }
 0x407   :  { %6132 = vmatpush1.bf16.msra.mxu0 %v7281_v29  ;;  %v2804_v29 = vld [vmem:[#allocation13 + $0x2b0] sm:$0xff] }
 0x408   :  { %6173 = vmatpush1.bf16.msra.mxu1 %v6899_v18  ;;  %6133 = vmatprep.subr.bf16.mxu0 %v7274_v39  ;;  %v7361_v18 = vcombine.low %v3191_v25, %v3195_v26  ;;  %v6979_v39 = vcombine.low %v2808_v15, %v2812_v17  ;;  %v6972_v7 = vcombine.high %v2800_v36, %v2804_v29  ;;  %v2888_v25 = vld [vmem:[#allocation13 + $0x550] sm:$0xff] }
 0x409   :  { %6174 = vmatprep.subr.bf16.mxu1 %v6892_v40  ;;  %v7354_v40 = vcombine.high %v3183_v35, %v3187_v16  ;;  %v2892_v26 = vld [vmem:[#allocation13 + $0x570] sm:$0xff] }
 0x40b   :  { %6134 = vmatpush1.bf16.msra.mxu0 %v7273_v47  ;;  %v2796_v47 = vld [vmem:[#allocation13 + $0x270] sm:$0xff] }
 0x40c   :  { %6175 = vmatpush1.bf16.msra.mxu1 %v6891_v49  ;;  %6135 = vmatprep.subr.bf16.mxu0 %v7394_v54  ;;  %v7353_v49 = vcombine.low %v3183_v35, %v3187_v16  ;;  %v6971_v54 = vcombine.low %v2800_v36, %v2804_v29  ;;  %v6964_v57 = vcombine.high %v2792_v44, %v2796_v47 }
 0x40d   :  { %6176 = vmatprep.subr.bf16.mxu1 %v7012_v56  ;;  %v7346_v56 = vcombine.high %v3175_v41, %v3179_v43  ;;  %v7060_v36 = vcombine.high %v2888_v25, %v2892_v26 }
 0x40f   :  { %6136 = vmatpush2.bf16.msra.mxu0 %v7393_v22  ;;  %v2788_v22 = vld [vmem:[#allocation13 + $0x230] sm:$0xff] }
 0x410   :  { %6177 = vmatpush2.bf16.msra.mxu1 %v7011_v23  ;;  %6137 = vmatprep.subr.bf16.mxu0 %v7386_v27  ;;  %v7345_v23 = vcombine.low %v3175_v41, %v3179_v43  ;;  %v6963_v27 = vcombine.low %v2792_v44, %v2796_v47  ;;  %v6956_v62 = vcombine.high %v2784_v60, %v2788_v22  ;;  %v3012_v41 = vld [vmem:[#allocation13 + $0x930] sm:$0xff] }
 0x411   :  { %6178 = vmatprep.subr.bf16.mxu1 %v7004_v61  ;;  %v7338_v61 = vcombine.high %v3167_v58, %v3171_v59  ;;  %v7059_v43 = vcombine.low %v2888_v25, %v2892_v26  ;;  %v2976_v25 = vld [vmem:[#allocation13 + $0x810] sm:$0xff] }
 0x412   :  { %v2980_v26 = vld [vmem:[#allocation13 + $0x830] sm:$0xff] }
 0x413   :  { %6138 = vmatpush2.bf16.msra.mxu0 %v7385_v2  ;;  %v3036_v2 = vld [vmem:[#allocation13 + $0x9f0] sm:$0xff] }
 0x414   :  { %6179 = vmatpush2.bf16.msra.mxu1 %v7003_v3  ;;  %6139 = vmatprep.subr.bf16.mxu0 %v7378_v5  ;;  %v7337_v3 = vcombine.low %v3167_v58, %v3171_v59  ;;  %v6955_v5 = vcombine.low %v2784_v60, %v2788_v22  ;;  %v7204_v8 = vcombine.high %v3032_v1, %v3036_v2  ;;  %v3004_v58 = vld [vmem:[#allocation13 + $0x8f0] sm:$0xff] }
 0x415   :  { %6180 = vmatprep.subr.bf16.mxu1 %v6996_v6  ;;  %v7076_v6 = vcombine.high %v2904_v63, %v2908_v0  ;;  %v2996_v63 = vld [vmem:[#allocation13 + $0x8b0] sm:$0xff] }
 0x417   :  { %6140 = vmatpush2.bf16.msra.mxu0 %v7377_v19  ;;  %v3024_v19 = vld [vmem:[#allocation13 + $0x990] sm:$0xff] }
 0x418   :  { %6181 = vmatpush2.bf16.msra.mxu1 %v6995_v20  ;;  %6141 = vmatprep.subr.bf16.mxu0 %v7370_v21  ;;  %v3028_v20 = vld [vmem:[#allocation13 + $0x9b0] sm:$0xff]  ;;  %v7203_v21 = vcombine.low %v3032_v1, %v3036_v2 }
 0x419   :  { %6182 = vmatprep.subr.bf16.mxu1 %v6988_v24  ;;  %v7068_v24 = vcombine.high %v2896_v9, %v2900_v11  ;;  %v7196_v17 = vcombine.high %v3024_v19, %v3028_v20  ;;  %v7195_v16 = vcombine.low %v3024_v19, %v3028_v20 }
 0x41b   :  { %6142 = vmatpush2.bf16.msra.mxu0 %v7369_v30  ;;  %v3016_v30 = vld [vmem:[#allocation13 + $0x950] sm:$0xff] }
 0x41c   :  { %6183 = vmatpush2.bf16.msra.mxu1 %v6987_v32  ;;  %6143 = vmatprep.subr.bf16.mxu0 %v7362_v33  ;;  %v3020_v32 = vld [vmem:[#allocation13 + $0x970] sm:$0xff] }
 0x41d   :  { %6184 = vmatprep.subr.bf16.mxu1 %v6980_v34  ;;  %v7067_v34 = vcombine.low %v2896_v9, %v2900_v11  ;;  %v7187_v47 = vcombine.low %v3016_v30, %v3020_v32  ;;  %v2988_v9 = vld [vmem:[#allocation13 + $0x870] sm:$0xff] }
 0x41f   :  { %6144 = vmatpush2.bf16.msra.mxu0 %v7361_v18  ;;  %v7188_v18 = vcombine.high %v3016_v30, %v3020_v32  ;;  %v7148_v32 = vcombine.high %v2976_v25, %v2980_v26 }
 0x420   :  { %6185 = vmatpush2.bf16.msra.mxu1 %v6979_v39  ;;  %6145 = vmatprep.subr.bf16.mxu0 %v7354_v40  ;;  %v2880_v39 = vld [vmem:[#allocation13 + $0x510] sm:$0xff] }
 0x421   :  { %6186 = vmatprep.subr.bf16.mxu1 %v6972_v7  ;;  %v2884_v40 = vld [vmem:[#allocation13 + $0x530] sm:$0xff] }
 0x422   :  { %v3008_v7 = vld [vmem:[#allocation13 + $0x910] sm:$0xff]  ;;  %v7051_v59 = vcombine.low %v2880_v39, %v2884_v40 }
 0x423   :  { %6146 = vmatpush2.bf16.msra.mxu0 %v7353_v49  ;;  %v7052_v49 = vcombine.high %v2880_v39, %v2884_v40  ;;  %v7179_v60 = vcombine.low %v3008_v7, %v3012_v41  ;;  %v7147_v39 = vcombine.low %v2976_v25, %v2980_v26  ;;  %v2932_v25 = vld [vmem:[#allocation13 + $0x6b0] sm:$0xff] }
 0x424   :  { %6187 = vmatpush2.bf16.msra.mxu1 %v6971_v54  ;;  %6147 = vmatprep.subr.bf16.mxu0 %v7346_v56  ;;  %v7180_v54 = vcombine.high %v3008_v7, %v3012_v41  ;;  %v2872_v56 = vld [vmem:[#allocation13 + $0x4d0] sm:$0xff] }
 0x425   :  { %6188 = vmatprep.subr.bf16.mxu1 %v6964_v57  ;;  %v3000_v57 = vld [vmem:[#allocation13 + $0x8d0] sm:$0xff] }
 0x426   :  { %v7171_v1 = vcombine.low %v3000_v57, %v3004_v58  ;;  %v2960_v7 = vld [vmem:[#allocation13 + $0x790] sm:$0xff] }
 0x427   :  { %6148 = vmatpush2.bf16.msra.mxu0 %v7345_v23  ;;  %v7172_v23 = vcombine.high %v3000_v57, %v3004_v58  ;;  %v2964_v41 = vld [vmem:[#allocation13 + $0x7b0] sm:$0xff] }
 0x428   :  { %6189 = vmatpush2.bf16.msra.mxu1 %v6963_v27  ;;  %6149 = vmatprep.subr.bf16.mxu0 %v7338_v61  ;;  %v2864_v27 = vld [vmem:[#allocation13 + $0x490] sm:$0xff] }
 0x429   :  { %6190 = vmatprep.subr.bf16.mxu1 %v6956_v62  ;;  %v2868_v61 = vld [vmem:[#allocation13 + $0x4b0] sm:$0xff] }
 0x42a   :  { %v2992_v62 = vld [vmem:[#allocation13 + $0x890] sm:$0xff]  ;;  %v7036_v2 = vcombine.high %v2864_v27, %v2868_v61  ;;  %v7035_v11 = vcombine.low %v2864_v27, %v2868_v61 }
 0x42b   :  { %6150 = vmatpush2.bf16.msra.mxu0 %v7337_v3  ;;  %v7164_v3 = vcombine.high %v2992_v62, %v2996_v63  ;;  %v2956_v57 = vld [vmem:[#allocation13 + $0x770] sm:$0xff] }
 0x42c   :  { %6191 = vmatpush2.bf16.msra.mxu1 %v6955_v5  ;;  %6201 = vmatprep.subr.bf16.mxu0 %v7076_v6  ;;  %v2856_v5 = vld [vmem:[#allocation13 + $0x450] sm:$0xff] }
 0x42d   :  { %6242 = vmatprep.subr.bf16.mxu1 %v7204_v8  ;;  %v2860_v6 = vld [vmem:[#allocation13 + $0x470] sm:$0xff] }
 0x42e   :  { %6152 = vmatmul.mubr.bf16.vlgmr.msra.gmra.mxu0 %v7949_v38  ;;  %v5948_v15 = vpop.f32.mrf.mxu1  ;;  %v2984_v8 = vld [vmem:[#allocation13 + $0x850] sm:$0xff]  ;;  %v7028_v19 = vcombine.high %v2856_v5, %v2860_v6 }
 0x42f   :  { %6193 = vmatmul.mubr.bf16.vlgmr.msra.gmra.mxu1 %v7905_v42  ;;  %v7972_v33 = vadd.f32 %v5948_v15, %v7963_v31  ;;  %6202 = vmatpush1.bf16.msra.mxu0 %v7075_v12  ;;  %v7163_v12 = vcombine.low %v2992_v62, %v2996_v63  ;;  %v7156_v20 = vcombine.high %v2984_v8, %v2988_v9  ;;  %v3080_v58 = vld [vmem:[#allocation13 + $0xb50] sm:$0xff] }
 0x430   :  { %6233 = vmatprep.mubr.bf16.mxu0 %v7910_v13  ;;  %6243 = vmatpush1.bf16.msra.mxu1 %v7203_v21  ;;  %v5950_v35 = vpop.f32.mrf.mxu1  ;;  %v2848_v21 = vld [vmem:[#allocation13 + $0x410] sm:$0xff]  ;;  %v7027_v15 = vcombine.low %v2856_v5, %v2860_v6 }
 0x431   :  { %6274 = vmatprep.mubr.bf16.mxu1 %v7934_v48  ;;  %v7977_v29 = vadd.f32 %v5950_v35, %v7967_v45  ;;  %6203 = vmatprep.subr.bf16.mxu0 %v7068_v24  ;;  %v2876_v45 = vld [vmem:[#allocation13 + $0x4f0] sm:$0xff] }
 0x432   :  { %6244 = vmatprep.subr.bf16.mxu1 %v7196_v17  ;;  %v5952_v31 = vpop.f32.mrf.mxu1  ;;  %v7044_v22 = vcombine.high %v2872_v56, %v2876_v45  ;;  %v7043_v0 = vcombine.low %v2872_v56, %v2876_v45  ;;  %v2852_v24 = vld [vmem:[#allocation13 + $0x430] sm:$0xff]  ;;  %v7155_v17 = vcombine.low %v2984_v8, %v2988_v9 }
 0x433   :  { %6204 = vmatpush1.bf16.msra.mxu0 %v7067_v34  ;;  %v7020_v30 = vcombine.high %v2848_v21, %v2852_v24  ;;  %v2968_v34 = vld [vmem:[#allocation13 + $0x7d0] sm:$0xff] }
 0x434   :  { %6245 = vmatpush1.bf16.msra.mxu1 %v7195_v16  ;;  %v5953_v44 = vpop.f32.mrf.mxu1  ;;  %6205 = vmatprep.subr.bf16.mxu0 %v7060_v36  ;;  %v2972_v35 = vld [vmem:[#allocation13 + $0x7f0] sm:$0xff] }
 0x435   :  { %6246 = vmatprep.subr.bf16.mxu1 %v7188_v18  ;;  %v3096_v16 = vld [vmem:[#allocation13 + $0xbd0] sm:$0xff]  ;;  %v7019_v18 = vcombine.low %v2848_v21, %v2852_v24  ;;  %v7140_v40 = vcombine.high %v2968_v34, %v2972_v35 }
 0x436   :  { %v3100_v36 = vld [vmem:[#allocation13 + $0xbf0] sm:$0xff] }
 0x437   :  { %6206 = vmatpush1.bf16.msra.mxu0 %v7059_v43  ;;  %v7268_v31 = vcombine.high %v3096_v16, %v3100_v36  ;;  %v3088_v43 = vld [vmem:[#allocation13 + $0xb90] sm:$0xff] }
 0x438   :  { %6247 = vmatpush1.bf16.msra.mxu1 %v7187_v47  ;;  %6207 = vmatprep.subr.bf16.mxu0 %v7052_v49  ;;  %v3092_v44 = vld [vmem:[#allocation13 + $0xbb0] sm:$0xff]  ;;  %v7139_v47 = vcombine.low %v2968_v34, %v2972_v35  ;;  %v7267_v49 = vcombine.low %v3096_v16, %v3100_v36 }
 0x439   :  { %6248 = vmatprep.subr.bf16.mxu1 %v7180_v54  ;;  %v7132_v54 = vcombine.high %v2960_v7, %v2964_v41  ;;  %v7260_v56 = vcombine.high %v3088_v43, %v3092_v44  ;;  %v2952_v45 = vld [vmem:[#allocation13 + $0x750] sm:$0xff] }
 0x43a   :  { %v2944_v61 = vld [vmem:[#allocation13 + $0x710] sm:$0xff] }
 0x43b   :  { %6208 = vmatpush1.bf16.msra.mxu0 %v7051_v59  ;;  %v3084_v59 = vld [vmem:[#allocation13 + $0xb70] sm:$0xff] }
 0x43c   :  { %6249 = vmatpush1.bf16.msra.mxu1 %v7179_v60  ;;  %6209 = vmatprep.subr.bf16.mxu0 %v7044_v22  ;;  %v7131_v60 = vcombine.low %v2960_v7, %v2964_v41  ;;  %v7259_v22 = vcombine.low %v3088_v43, %v3092_v44  ;;  %v7252_v27 = vcombine.high %v3080_v58, %v3084_v59  ;;  %v2948_v62 = vld [vmem:[#allocation13 + $0x730] sm:$0xff] }
 0x43d   :  { %6250 = vmatprep.subr.bf16.mxu1 %v7172_v23  ;;  %v7124_v23 = vcombine.high %v2952_v45, %v2956_v57  ;;  %v3072_v63 = vld [vmem:[#allocation13 + $0xb10] sm:$0xff] }
 0x43e   :  { %v2936_v6 = vld [vmem:[#allocation13 + $0x6d0] sm:$0xff] }
 0x43f   :  { %6210 = vmatpush1.bf16.msra.mxu0 %v7043_v0  ;;  %v3076_v0 = vld [vmem:[#allocation13 + $0xb30] sm:$0xff] }
 0x440   :  { %6251 = vmatpush1.bf16.msra.mxu1 %v7171_v1  ;;  %6211 = vmatprep.subr.bf16.mxu0 %v7036_v2  ;;  %v7123_v1 = vcombine.low %v2952_v45, %v2956_v57  ;;  %v7251_v2 = vcombine.low %v3080_v58, %v3084_v59  ;;  %v7244_v5 = vcombine.high %v3072_v63, %v3076_v0  ;;  %v2940_v8 = vld [vmem:[#allocation13 + $0x6f0] sm:$0xff]  ;;  %v2777_v59 = vld [vmem:[#allocation13 + $0x1d8] sm:$0xff] }
 0x441   :  { %6252 = vmatprep.subr.bf16.mxu1 %v7164_v3  ;;  %v7116_v3 = vcombine.high %v2944_v61, %v2948_v62  ;;  %v3064_v9 = vld [vmem:[#allocation13 + $0xad0] sm:$0xff] }
 0x442   :  { %v2928_v24 = vld [vmem:[#allocation13 + $0x690] sm:$0xff] }
 0x443   :  { %6212 = vmatpush1.bf16.msra.mxu0 %v7035_v11  ;;  %v3068_v11 = vld [vmem:[#allocation13 + $0xaf0] sm:$0xff] }
 0x444   :  { %6253 = vmatpush1.bf16.msra.mxu1 %v7163_v12  ;;  %6213 = vmatprep.subr.bf16.mxu0 %v7028_v19  ;;  %v7115_v12 = vcombine.low %v2944_v61, %v2948_v62  ;;  %v7243_v19 = vcombine.low %v3072_v63, %v3076_v0  ;;  %v7236_v21 = vcombine.high %v3064_v9, %v3068_v11  ;;  %v3056_v26 = vld [vmem:[#allocation13 + $0xa90] sm:$0xff] }
 0x445   :  { %6254 = vmatprep.subr.bf16.mxu1 %v7156_v20  ;;  %v7108_v20 = vcombine.high %v2936_v6, %v2940_v8  ;;  %v2920_v35 = vld [vmem:[#allocation13 + $0x650] sm:$0xff] }
 0x446   :  { %v2924_v16 = vld [vmem:[#allocation13 + $0x670] sm:$0xff] }
 0x447   :  { %6214 = vmatpush1.bf16.msra.mxu0 %v7027_v15  ;;  %v3060_v15 = vld [vmem:[#allocation13 + $0xab0] sm:$0xff] }
 0x448   :  { %6255 = vmatpush1.bf16.msra.mxu1 %v7155_v17  ;;  %6215 = vmatprep.subr.bf16.mxu0 %v7020_v30  ;;  %v7107_v17 = vcombine.low %v2936_v6, %v2940_v8  ;;  %v7235_v30 = vcombine.low %v3064_v9, %v3068_v11  ;;  %v7228_v34 = vcombine.high %v3056_v26, %v3060_v15  ;;  %v3048_v36 = vld [vmem:[#allocation13 + $0xa50] sm:$0xff] }
 0x449   :  { %6256 = vmatprep.subr.bf16.mxu1 %v7148_v32  ;;  %v7100_v32 = vcombine.high %v2928_v24, %v2932_v25  ;;  %v2912_v41 = vld [vmem:[#allocation13 + $0x610] sm:$0xff] }
 0x44a   :  { %v2916_v43 = vld [vmem:[#allocation13 + $0x630] sm:$0xff] }
 0x44b   :  { %6216 = vmatpush1.bf16.msra.mxu0 %v7019_v18  ;;  %v3052_v18 = vld [vmem:[#allocation13 + $0xa70] sm:$0xff] }
 0x44c   :  { %6257 = vmatpush1.bf16.msra.mxu1 %v7147_v39  ;;  %6217 = vmatprep.subr.bf16.mxu0 %v7140_v40  ;;  %v7099_v39 = vcombine.low %v2928_v24, %v2932_v25  ;;  %v7227_v40 = vcombine.low %v3056_v26, %v3060_v15  ;;  %v7220_v7 = vcombine.high %v3048_v36, %v3052_v18  ;;  %v3040_v44 = vld [vmem:[#allocation13 + $0xa10] sm:$0xff] }
 0x44d   :  { %6258 = vmatprep.subr.bf16.mxu1 %v7268_v31  ;;  %v7092_v31 = vcombine.high %v2920_v35, %v2924_v16  ;;  %v3160_v57 = vld [vmem:[#allocation13 + $0xdd0] sm:$0xff] }
 0x44e   :  { %v3164_v58 = vld [vmem:[#allocation13 + $0xdf0] sm:$0xff] }
 0x44f   :  { %6218 = vmatpush2.bf16.msra.mxu0 %v7139_v47  ;;  %v3044_v47 = vld [vmem:[#allocation13 + $0xa30] sm:$0xff]  ;;  %v7331_v0 = vcombine.low %v3160_v57, %v3164_v58 }
 0x450   :  { %6259 = vmatpush2.bf16.msra.mxu1 %v7267_v49  ;;  %6219 = vmatprep.subr.bf16.mxu0 %v7132_v54  ;;  %v7091_v49 = vcombine.low %v2920_v35, %v2924_v16  ;;  %v7219_v54 = vcombine.low %v3048_v36, %v3052_v18  ;;  %v7212_v45 = vcombine.high %v3040_v44, %v3044_v47  ;;  %v3152_v62 = vld [vmem:[#allocation13 + $0xd90] sm:$0xff]  ;;  %v2753_v36 = vld [vmem:[#allocation13 + $0x118] sm:$0xff] }
 0x451   :  { %6260 = vmatprep.subr.bf16.mxu1 %v7260_v56  ;;  %v7084_v56 = vcombine.high %v2912_v41, %v2916_v43  ;;  %v3156_v63 = vld [vmem:[#allocation13 + $0xdb0] sm:$0xff]  ;;  %v2757_v18 = vld [vmem:[#allocation13 + $0x138] sm:$0xff] }
 0x452   :  { %v3144_v6 = vld [vmem:[#allocation13 + $0xd50] sm:$0xff]  ;;  %v7323_v24 = vcombine.low %v3152_v62, %v3156_v63 }
 0x453   :  { %6220 = vmatpush2.bf16.msra.mxu0 %v7131_v60  ;;  %v2781_v60 = vld [vmem:[#allocation13 + $0x1f8] sm:$0xff]  ;;  %v3148_v8 = vld [vmem:[#allocation13 + $0xd70] sm:$0xff] }
 0x454   :  { %6261 = vmatpush2.bf16.msra.mxu1 %v7259_v22  ;;  %6221 = vmatprep.subr.bf16.mxu0 %v7124_v23  ;;  %v7083_v22 = vcombine.low %v2912_v41, %v2916_v43  ;;  %v7211_v23 = vcombine.low %v3040_v44, %v3044_v47  ;;  %v6950_v61 = vcombine.high %v2777_v59, %v2781_v60  ;;  %v3140_v35 = vld [vmem:[#allocation13 + $0xd30] sm:$0xff]  ;;  %v2745_v44 = vld [vmem:[#allocation13 + $0xd8] sm:$0xff] }
 0x455   :  { %6262 = vmatprep.subr.bf16.mxu1 %v7252_v27  ;;  %v7332_v27 = vcombine.high %v3160_v57, %v3164_v58  ;;  %v3128_v41 = vld [vmem:[#allocation13 + $0xcd0] sm:$0xff]  ;;  %v2749_v47 = vld [vmem:[#allocation13 + $0xf8] sm:$0xff] }
 0x456   :  { %v3132_v43 = vld [vmem:[#allocation13 + $0xcf0] sm:$0xff] }
 0x457   :  { %6222 = vmatpush2.bf16.msra.mxu0 %v7123_v1  ;;  %v2769_v1 = vld [vmem:[#allocation13 + $0x198] sm:$0xff]  ;;  %v3120_v57 = vld [vmem:[#allocation13 + $0xc90] sm:$0xff] }
 0x458   :  { %6263 = vmatpush2.bf16.msra.mxu1 %v7251_v2  ;;  %6223 = vmatprep.subr.bf16.mxu0 %v7116_v3  ;;  %v2773_v2 = vld [vmem:[#allocation13 + $0x1b8] sm:$0xff]  ;;  %v6949_v3 = vcombine.low %v2777_v59, %v2781_v60  ;;  %v3124_v58 = vld [vmem:[#allocation13 + $0xcb0] sm:$0xff] }
 0x459   :  { %6264 = vmatprep.subr.bf16.mxu1 %v7244_v5  ;;  %v7324_v5 = vcombine.high %v3152_v62, %v3156_v63  ;;  %v6941_v15 = vcombine.low %v2769_v1, %v2773_v2  ;;  %v2737_v59 = vld [vmem:[#allocation13 + $0x98] sm:$0xff]  ;;  %v3112_v62 = vld [vmem:[#allocation13 + $0xc50] sm:$0xff] }
 0x45a   :  { %v2741_v60 = vld [vmem:[#allocation13 + $0xb8] sm:$0xff]  ;;  %v3116_v63 = vld [vmem:[#allocation13 + $0xc70] sm:$0xff] }
 0x45b   :  { %6224 = vmatpush2.bf16.msra.mxu0 %v7115_v12  ;;  %v6942_v12 = vcombine.high %v2769_v1, %v2773_v2  ;;  %v2733_v1 = vld [vmem:[#allocation13 + $0x78] sm:$0xff] }
 0x45c   :  { %6265 = vmatpush2.bf16.msra.mxu1 %v7243_v19  ;;  %6225 = vmatprep.subr.bf16.mxu0 %v7108_v20  ;;  %v2761_v19 = vld [vmem:[#allocation13 + $0x158] sm:$0xff] }
 0x45d   :  { %6266 = vmatprep.subr.bf16.mxu1 %v7236_v21  ;;  %v2765_v20 = vld [vmem:[#allocation13 + $0x178] sm:$0xff] }
 0x45f   :  { %6226 = vmatpush2.bf16.msra.mxu0 %v7107_v17  ;;  %v7316_v17 = vcombine.high %v3144_v6, %v3148_v8 }
 0x460   :  { %6267 = vmatpush2.bf16.msra.mxu1 %v7235_v30  ;;  %6227 = vmatprep.subr.bf16.mxu0 %v7100_v32  ;;  %v6934_v32 = vcombine.high %v2761_v19, %v2765_v20 }
 0x461   :  { %6268 = vmatprep.subr.bf16.mxu1 %v7228_v34  ;;  %v3136_v34 = vld [vmem:[#allocation13 + $0xd10] sm:$0xff] }
 0x463   :  { %6228 = vmatpush2.bf16.msra.mxu0 %v7099_v39  ;;  %v7315_v39 = vcombine.low %v3144_v6, %v3148_v8  ;;  %v6909_v6 = vcombine.low %v2737_v59, %v2741_v60  ;;  %v7284_v8 = vcombine.high %v3112_v62, %v3116_v63 }
 0x464   :  { %6269 = vmatpush2.bf16.msra.mxu1 %v7227_v40  ;;  %6229 = vmatprep.subr.bf16.mxu0 %v7092_v31 }
 0x465   :  { %6270 = vmatprep.subr.bf16.mxu1 %v7220_v7  ;;  %v7308_v7 = vcombine.high %v3136_v34, %v3140_v35 }
 0x467   :  { %6230 = vmatpush2.bf16.msra.mxu0 %v7091_v49  ;;  %v7307_v49 = vcombine.low %v3136_v34, %v3140_v35  ;;  %v3228_v34 = vld [vmem:[#allocation13 + $0xff0] sm:$0xff]  ;;  %v2841_v35 = vld [vmem:[#allocation13 + $0x3d8] sm:$0xff] }
 0x468   :  { %6271 = vmatpush2.bf16.msra.mxu1 %v7219_v54  ;;  %6231 = vmatprep.subr.bf16.mxu0 %v7084_v56  ;;  %v6925_v54 = vcombine.low %v2753_v36, %v2757_v18  ;;  %v7300_v56 = vcombine.high %v3128_v41, %v3132_v43 }
 0x469   :  { %6272 = vmatprep.subr.bf16.mxu1 %v7212_v45  ;;  %v6918_v45 = vcombine.high %v2745_v44, %v2749_v47 }
 0x46b   :  { %6232 = vmatpush2.bf16.msra.mxu0 %v7083_v22  ;;  %v7299_v22 = vcombine.low %v3128_v41, %v3132_v43 }
 0x46c   :  { %6273 = vmatpush2.bf16.msra.mxu1 %v7211_v23  ;;  %6283 = vmatprep.subr.bf16.mxu0 %v7332_v27  ;;  %v6917_v23 = vcombine.low %v2745_v44, %v2749_v47  ;;  %v7292_v27 = vcombine.high %v3120_v57, %v3124_v58  ;;  %v3208_v47 = vld [vmem:[#allocation13 + $0xf50] sm:$0xff] }
 0x46d   :  { %6324 = vmatprep.subr.bf16.mxu1 %v6950_v61  ;;  %v6910_v61 = vcombine.high %v2737_v59, %v2741_v60  ;;  %v3200_v60 = vld [vmem:[#allocation13 + $0xf10] sm:$0xff] }
 0x46e   :  { %v7979_v9 = vpop.f32.mrf.mxu1  ;;  %6234 = vmatmul.mubr.bf16.vlgmr.msra.gmra.mxu0 %v7914_v14  ;;  %v5989_v11 = vpop.f32.mrf.mxu0 }
 0x46f   :  { %6275 = vmatmul.mubr.bf16.vlgmr.msra.gmra.mxu1 %v7936_v51  ;;  %v5990_v21 = vadd.f32 %v5989_v11, %v7972_v33  ;;  %6284 = vmatpush1.bf16.msra.mxu0 %v7331_v0  ;;  %v2729_v0 = vld [vmem:[#allocation13 + $0x58] sm:$0xff] }
 0x470   :  { %6315 = vmatprep.mubr.bf16.mxu0 %v7947_v37  ;;  %6325 = vmatpush1.bf16.msra.mxu1 %v6949_v3  ;;  %v7985_v25 = vpop.f32.mrf.mxu1  ;;  %v5991_v26 = vpop.f32.mrf.mxu0  ;;  %v7291_v3 = vcombine.low %v3120_v57, %v3124_v58 }
 0x471   :  { %6356 = vmatprep.mubr.bf16.mxu1 %v7890_v46  ;;  %v5992_v30 = vadd.f32 %v5991_v26, %v7977_v29  ;;  %6285 = vmatprep.subr.bf16.mxu0 %v7324_v5  ;;  %7536 = vtanh.f32 %v5990_v21  ;;  %v6933_v46 = vcombine.low %v2761_v19, %v2765_v20  ;;  %v6926_v29 = vcombine.high %v2753_v36, %v2757_v18  ;;  %v3104_v19 = vld [vmem:[#allocation13 + $0xc10] sm:$0xff]  ;;  %v2721_v21 = vld [vmem:[#allocation13 + $0x18] sm:$0xff] }
 0x472   :  { %v6034_v33 = vpop.f32.mrf.mxu1  ;;  %6326 = vmatprep.subr.bf16.mxu1 %v6942_v12  ;;  %v5993_v16 = vpop.f32.mrf.mxu0  ;;  %v6902_v12 = vcombine.high %v2729_v0, %v2733_v1  ;;  %v3108_v20 = vld [vmem:[#allocation13 + $0xc30] sm:$0xff]  ;;  %v7283_v26 = vcombine.low %v3112_v62, %v3116_v63 }
 0x473   :  { %7538 = vtanh.f32 %v5992_v30  ;;  %6286 = vmatpush1.bf16.msra.mxu0 %v7323_v24  ;;  %v2725_v24 = vld [vmem:[#allocation13 + $0x38] sm:$0xff]  ;;  %v7275_v16 = vcombine.low %v3104_v19, %v3108_v20 }
 0x474   :  { %6327 = vmatpush1.bf16.msra.mxu1 %v6941_v15  ;;  %v6035_v40 = vpop.f32.mrf.mxu1  ;;  %v5994_v31 = vpop.f32.mrf.mxu0  ;;  %6287 = vmatprep.subr.bf16.mxu0 %v7316_v17  ;;  %v6901_v15 = vcombine.low %v2729_v0, %v2733_v1  ;;  %v7276_v17 = vcombine.high %v3104_v19, %v3108_v20  ;;  %v6894_v30 = vcombine.high %v2721_v21, %v2725_v24  ;;  %v2845_v33 = vld [vmem:[#allocation13 + $0x3f8] sm:$0xff]  ;;  %v3192_v1 = vld [vmem:[#allocation13 + $0xed0] sm:$0xff] }
 0x475   :  { %6328 = vmatprep.subr.bf16.mxu1 %v6934_v32  ;;  %v3224_v32 = vld [vmem:[#allocation13 + $0xfd0] sm:$0xff]  ;;  %v6893_v36 = vcombine.low %v2721_v21, %v2725_v24  ;;  %v7013_v41 = vcombine.low %v2841_v35, %v2845_v33 }
 0x476   :  { %v7396_v18 = vcombine.high %v3224_v32, %v3228_v34  ;;  %v3216_v40 = vld [vmem:[#allocation13 + $0xf90] sm:$0xff] }
 0x477   :  { %6288 = vmatpush1.bf16.msra.mxu0 %v7315_v39  ;;  %v7014_v39 = vcombine.high %v2841_v35, %v2845_v33  ;;  %v3220_v31 = vld [vmem:[#allocation13 + $0xfb0] sm:$0xff] }
 0x478   :  { %6329 = vmatpush1.bf16.msra.mxu1 %v6933_v46  ;;  %6289 = vmatprep.subr.bf16.mxu0 %v7308_v7  ;;  %v2833_v46 = vld [vmem:[#allocation13 + $0x398] sm:$0xff]  ;;  %v7388_v43 = vcombine.high %v3216_v40, %v3220_v31  ;;  %v3184_v24 = vld [vmem:[#allocation13 + $0xe90] sm:$0xff] }
 0x479   :  { %6330 = vmatprep.subr.bf16.mxu1 %v6926_v29  ;;  %v2837_v7 = vld [vmem:[#allocation13 + $0x3b8] sm:$0xff]  ;;  %v7395_v29 = vcombine.low %v3224_v32, %v3228_v34  ;;  %v3176_v33 = vld [vmem:[#allocation13 + $0xe50] sm:$0xff] }
 0x47a   :  { %v7006_v44 = vcombine.high %v2833_v46, %v2837_v7  ;;  %v7005_v57 = vcombine.low %v2833_v46, %v2837_v7  ;;  %v3168_v7 = vld [vmem:[#allocation13 + $0xe10] sm:$0xff] }
 0x47b   :  { %6290 = vmatpush1.bf16.msra.mxu0 %v7307_v49  ;;  %v3212_v49 = vld [vmem:[#allocation13 + $0xf70] sm:$0xff] }
 0x47c   :  { %6331 = vmatpush1.bf16.msra.mxu1 %v6925_v54  ;;  %6291 = vmatprep.subr.bf16.mxu0 %v7300_v56  ;;  %v2825_v54 = vld [vmem:[#allocation13 + $0x358] sm:$0xff]  ;;  %v7380_v58 = vcombine.high %v3208_v47, %v3212_v49 }
 0x47d   :  { %6332 = vmatprep.subr.bf16.mxu1 %v6918_v45  ;;  %v2829_v56 = vld [vmem:[#allocation13 + $0x378] sm:$0xff]  ;;  %v7387_v45 = vcombine.low %v3216_v40, %v3220_v31 }
 0x47e   :  { %v7989_v2 = vpop.eup %7536  ;;  %v6998_v59 = vcombine.high %v2825_v54, %v2829_v56  ;;  %v6997_v62 = vcombine.low %v2825_v54, %v2829_v56  ;;  %v2905_v56 = vld [vmem:[#allocation13 + $0x5d8] sm:$0xff] }
 0x47f   :  { %6292 = vmatpush1.bf16.msra.mxu0 %v7299_v22  ;;  %v3204_v22 = vld [vmem:[#allocation13 + $0xf30] sm:$0xff] }
 0x480   :  { %v7991_v5 = vpop.eup %7538  ;;  %6333 = vmatpush1.bf16.msra.mxu1 %v6917_v23  ;;  %6293 = vmatprep.subr.bf16.mxu0 %v7292_v27  ;;  %v2817_v23 = vld [vmem:[#allocation13 + $0x318] sm:$0xff]  ;;  %v7372_v63 = vcombine.high %v3200_v60, %v3204_v22 }
 0x481   :  { %v6504_v11 = vcombine.low %v7989_v2, %v7991_v5  ;;  %6334 = vmatprep.subr.bf16.mxu1 %v6910_v61  ;;  %v2821_v27 = vld [vmem:[#allocation13 + $0x338] sm:$0xff]  ;;  %v7379_v61 = vcombine.low %v3208_v47, %v3212_v49 }
 0x482   :  { %v6990_v0 = vcombine.high %v2817_v23, %v2821_v27  ;;  %v6989_v19 = vcombine.low %v2817_v23, %v2821_v27  ;;  %v7995_v23 = vld [vmem:[#allocation15] sm:$0xff]  ;;  %v3221_v2 = vld [vmem:[#allocation13 + $0xfb8] sm:$0xff] }
 0x483   :  { %6294 = vmatpush1.bf16.msra.mxu0 %v7291_v3  ;;  %v3196_v3 = vld [vmem:[#allocation13 + $0xef0] sm:$0xff]  ;;  %v3243_v27 = vrot.slane %v7995_v23, %v7849_v50 }
 0x484   :  { %6335 = vmatpush1.bf16.msra.mxu1 %v6909_v6  ;;  %6295 = vmatprep.subr.bf16.mxu0 %v7284_v8  ;;  %v2809_v6 = vld [vmem:[#allocation13 + $0x2d8] sm:$0xff]  ;;  %v7364_v20 = vcombine.high %v3192_v1, %v3196_v3 }
 0x485   :  { %6336 = vmatprep.subr.bf16.mxu1 %v6902_v12  ;;  %v2813_v8 = vld [vmem:[#allocation13 + $0x2f8] sm:$0xff]  ;;  %v7371_v12 = vcombine.low %v3200_v60, %v3204_v22 }
 0x486   :  { %v6982_v21 = vcombine.high %v2809_v6, %v2813_v8  ;;  %v6981_v32 = vcombine.low %v2809_v6, %v2813_v8  ;;  %v6031_v8 = vadd.f32 %v7979_v9, %v3243_v27 }
 0x487   :  { %6296 = vmatpush1.bf16.msra.mxu0 %v7283_v26  ;;  %v3188_v26 = vld [vmem:[#allocation13 + $0xeb0] sm:$0xff] }
 0x488   :  { %6337 = vmatpush1.bf16.msra.mxu1 %v6901_v15  ;;  %6297 = vmatprep.subr.bf16.mxu0 %v7276_v17  ;;  %v2801_v15 = vld [vmem:[#allocation13 + $0x298] sm:$0xff]  ;;  %v7356_v34 = vcombine.high %v3184_v24, %v3188_v26 }
 0x489   :  { %6338 = vmatprep.subr.bf16.mxu1 %v6894_v30  ;;  %v2805_v17 = vld [vmem:[#allocation13 + $0x2b8] sm:$0xff]  ;;  %v7363_v30 = vcombine.low %v3192_v1, %v3196_v3 }
 0x48a   :  { %v6974_v35 = vcombine.high %v2801_v15, %v2805_v17  ;;  %v6973_v40 = vcombine.low %v2801_v15, %v2805_v17  ;;  %v3025_v1 = vld [vmem:[#allocation13 + $0x998] sm:$0xff] }
 0x48b   :  { %6298 = vmatpush1.bf16.msra.mxu0 %v7275_v16  ;;  %v3180_v16 = vld [vmem:[#allocation13 + $0xe70] sm:$0xff]  ;;  %v3029_v3 = vld [vmem:[#allocation13 + $0x9b8] sm:$0xff] }
 0x48c   :  { %6339 = vmatpush1.bf16.msra.mxu1 %v6893_v36  ;;  %6299 = vmatprep.subr.bf16.mxu0 %v7396_v18  ;;  %v2793_v36 = vld [vmem:[#allocation13 + $0x258] sm:$0xff]  ;;  %v7348_v31 = vcombine.high %v3176_v33, %v3180_v16  ;;  %v7198_v50 = vcombine.high %v3025_v1, %v3029_v3 }
 0x48d   :  { %6340 = vmatprep.subr.bf16.mxu1 %v7014_v39  ;;  %v2797_v18 = vld [vmem:[#allocation13 + $0x278] sm:$0xff]  ;;  %v7355_v39 = vcombine.low %v3184_v24, %v3188_v26 }
 0x48e   :  { %v6966_v46 = vcombine.high %v2793_v36, %v2797_v18  ;;  %v6965_v47 = vcombine.low %v2793_v36, %v2797_v18  ;;  %v3017_v26 = vld [vmem:[#allocation13 + $0x958] sm:$0xff] }
 0x48f   :  { %6300 = vmatpush2.bf16.msra.mxu0 %v7395_v29  ;;  %v3172_v29 = vld [vmem:[#allocation13 + $0xe30] sm:$0xff]  ;;  %v3021_v15 = vld [vmem:[#allocation13 + $0x978] sm:$0xff] }
 0x490   :  { %6341 = vmatpush2.bf16.msra.mxu1 %v7013_v41  ;;  %6301 = vmatprep.subr.bf16.mxu0 %v7388_v43  ;;  %v2785_v41 = vld [vmem:[#allocation13 + $0x218] sm:$0xff]  ;;  %v7340_v49 = vcombine.high %v3168_v7, %v3172_v29 }
 0x491   :  { %6342 = vmatprep.subr.bf16.mxu1 %v7006_v44  ;;  %v2789_v43 = vld [vmem:[#allocation13 + $0x238] sm:$0xff]  ;;  %v7347_v44 = vcombine.low %v3176_v33, %v3180_v16  ;;  %v7190_v16 = vcombine.high %v3017_v26, %v3021_v15 }
 0x492   :  { %v6958_v54 = vcombine.high %v2785_v41, %v2789_v43  ;;  %v6957_v60 = vcombine.low %v2785_v41, %v2789_v43  ;;  %v2881_v36 = vld [vmem:[#allocation13 + $0x518] sm:$0xff] }
 0x493   :  { %6302 = vmatpush2.bf16.msra.mxu0 %v7387_v45  ;;  %v2909_v45 = vld [vmem:[#allocation13 + $0x5f8] sm:$0xff] }
 0x494   :  { %6343 = vmatpush2.bf16.msra.mxu1 %v7005_v57  ;;  %6303 = vmatprep.subr.bf16.mxu0 %v7380_v58  ;;  %v3033_v57 = vld [vmem:[#allocation13 + $0x9d8] sm:$0xff]  ;;  %v7078_v22 = vcombine.high %v2905_v56, %v2909_v45 }
 0x495   :  { %6344 = vmatprep.subr.bf16.mxu1 %v6998_v59  ;;  %v3037_v58 = vld [vmem:[#allocation13 + $0x9f8] sm:$0xff]  ;;  %v7339_v59 = vcombine.low %v3168_v7, %v3172_v29  ;;  %v7189_v29 = vcombine.low %v3017_v26, %v3021_v15 }
 0x496   :  { %v7205_v6 = vcombine.low %v3033_v57, %v3037_v58  ;;  %v2885_v18 = vld [vmem:[#allocation13 + $0x538] sm:$0xff] }
 0x497   :  { %6304 = vmatpush2.bf16.msra.mxu0 %v7379_v61  ;;  %v7206_v61 = vcombine.high %v3033_v57, %v3037_v58  ;;  %v7054_v41 = vcombine.high %v2881_v36, %v2885_v18  ;;  %v2865_v58 = vld [vmem:[#allocation13 + $0x498] sm:$0xff] }
 0x498   :  { %6345 = vmatpush2.bf16.msra.mxu1 %v6997_v62  ;;  %6305 = vmatprep.subr.bf16.mxu0 %v7372_v63  ;;  %v2897_v62 = vld [vmem:[#allocation13 + $0x598] sm:$0xff] }
 0x499   :  { %6346 = vmatprep.subr.bf16.mxu1 %v6990_v0  ;;  %v2901_v63 = vld [vmem:[#allocation13 + $0x5b8] sm:$0xff]  ;;  %v7077_v0 = vcombine.low %v2905_v56, %v2909_v45 }
 0x49a   :  { %v2981_v26 = vld [vmem:[#allocation13 + $0x838] sm:$0xff] }
 0x49b   :  { %6306 = vmatpush2.bf16.msra.mxu0 %v7371_v12  ;;  %v7070_v12 = vcombine.high %v2897_v62, %v2901_v63 }
 0x49c   :  { %6347 = vmatpush2.bf16.msra.mxu1 %v6989_v19  ;;  %6307 = vmatprep.subr.bf16.mxu0 %v7364_v20  ;;  %v2889_v19 = vld [vmem:[#allocation13 + $0x558] sm:$0xff] }
 0x49d   :  { %6348 = vmatprep.subr.bf16.mxu1 %v6982_v21  ;;  %v2893_v20 = vld [vmem:[#allocation13 + $0x578] sm:$0xff] }
 0x49f   :  { %6308 = vmatpush2.bf16.msra.mxu0 %v7363_v30  ;;  %v7069_v30 = vcombine.low %v2897_v62, %v2901_v63 }
 0x4a0   :  { %6349 = vmatpush2.bf16.msra.mxu1 %v6981_v32  ;;  %6309 = vmatprep.subr.bf16.mxu0 %v7356_v34  ;;  %v7197_v34 = vcombine.low %v3025_v1, %v3029_v3  ;;  %v2861_v1 = vld [vmem:[#allocation13 + $0x478] sm:$0xff] }
 0x4a1   :  { %6350 = vmatprep.subr.bf16.mxu1 %v6974_v35  ;;  %v7062_v35 = vcombine.high %v2889_v19, %v2893_v20  ;;  %v2985_v3 = vld [vmem:[#allocation13 + $0x858] sm:$0xff] }
 0x4a3   :  { %6310 = vmatpush2.bf16.msra.mxu0 %v7355_v39 }
 0x4a4   :  { %6351 = vmatpush2.bf16.msra.mxu1 %v6973_v40  ;;  %6311 = vmatprep.subr.bf16.mxu0 %v7348_v31  ;;  %v3009_v40 = vld [vmem:[#allocation13 + $0x918] sm:$0xff]  ;;  %v7061_v31 = vcombine.low %v2889_v19, %v2893_v20 }
 0x4a5   :  { %6352 = vmatprep.subr.bf16.mxu1 %v6966_v46 }
 0x4a7   :  { %6312 = vmatpush2.bf16.msra.mxu0 %v7347_v44  ;;  %v2877_v44 = vld [vmem:[#allocation13 + $0x4f8] sm:$0xff] }
 0x4a8   :  { %6353 = vmatpush2.bf16.msra.mxu1 %v6965_v47  ;;  %6313 = vmatprep.subr.bf16.mxu0 %v7340_v49  ;;  %v3001_v47 = vld [vmem:[#allocation13 + $0x8d8] sm:$0xff] }
 0x4a9   :  { %6354 = vmatprep.subr.bf16.mxu1 %v6958_v54  ;;  %v3005_v49 = vld [vmem:[#allocation13 + $0x8f8] sm:$0xff]  ;;  %v7053_v54 = vcombine.low %v2881_v36, %v2885_v18 }
 0x4aa   :  { %v7174_v57 = vcombine.high %v3001_v47, %v3005_v49  ;;  %v3097_v36 = vld [vmem:[#allocation13 + $0xbd8] sm:$0xff] }
 0x4ab   :  { %6314 = vmatpush2.bf16.msra.mxu0 %v7339_v59  ;;  %v2869_v59 = vld [vmem:[#allocation13 + $0x4b8] sm:$0xff] }
 0x4ac   :  { %6355 = vmatpush2.bf16.msra.mxu1 %v6957_v60  ;;  %6365 = vmatprep.subr.bf16.mxu0 %v7078_v22  ;;  %v2993_v60 = vld [vmem:[#allocation13 + $0x898] sm:$0xff]  ;;  %v7038_v62 = vcombine.high %v2865_v58, %v2869_v59 }
 0x4ad   :  { %6406 = vmatprep.subr.bf16.mxu1 %v7206_v61  ;;  %v2997_v22 = vld [vmem:[#allocation13 + $0x8b8] sm:$0xff]  ;;  %v7173_v61 = vcombine.low %v3001_v47, %v3005_v49 }
 0x4ae   :  { %v6071_v21 = vpop.f32.mrf.mxu0  ;;  %v6112_v24 = vpop.f32.mrf.mxu1  ;;  %6316 = vmatmul.mubr.bf16.vlgmr.msra.gmra.mxu0 %v7949_v38  ;;  %v7166_v63 = vcombine.high %v2993_v60, %v2997_v22  ;;  %v3101_v18 = vld [vmem:[#allocation13 + $0xbf8] sm:$0xff] }
 0x4af   :  { %v6072_v17 = vadd.f32 %v6071_v21, %v6031_v8  ;;  %6357 = vmatmul.mubr.bf16.vlgmr.msra.gmra.mxu1 %v7905_v42  ;;  %6366 = vmatpush1.bf16.msra.mxu0 %v7077_v0  ;;  %v2857_v0 = vld [vmem:[#allocation13 + $0x458] sm:$0xff]  ;;  %v7037_v8 = vcombine.low %v2865_v58, %v2869_v59 }
 0x4b0   :  { %6397 = vmatprep.mubr.bf16.mxu0 %v7910_v13  ;;  %6407 = vmatpush1.bf16.msra.mxu1 %v7205_v6  ;;  %v8003_v9 = vpop.f32.mrf.mxu0  ;;  %v8005_v32 = vpop.f32.mrf.mxu1  ;;  %v3013_v13 = vld [vmem:[#allocation13 + $0x938] sm:$0xff]  ;;  %v7030_v19 = vcombine.high %v2857_v0, %v2861_v1  ;;  %v7029_v15 = vcombine.low %v2857_v0, %v2861_v1 }
 0x4b1   :  { %v8007_v33 = vadd.f32 %v6112_v24, %v6072_v17  ;;  %6438 = vmatprep.mubr.bf16.mxu1 %v7934_v48  ;;  %6367 = vmatprep.subr.bf16.mxu0 %v7070_v12  ;;  %v7182_v43 = vcombine.high %v3009_v40, %v3013_v13  ;;  %v2873_v48 = vld [vmem:[#allocation13 + $0x4d8] sm:$0xff]  ;;  %v7181_v56 = vcombine.low %v3009_v40, %v3013_v13 }
 0x4b2   :  { %v6075_v42 = vpop.f32.mrf.mxu0  ;;  %v6116_v39 = vpop.f32.mrf.mxu1  ;;  %6408 = vmatprep.subr.bf16.mxu1 %v7198_v50  ;;  %v7046_v45 = vcombine.high %v2873_v48, %v2877_v44  ;;  %v7045_v27 = vcombine.low %v2873_v48, %v2877_v44  ;;  %v2989_v6 = vld [vmem:[#allocation13 + $0x878] sm:$0xff]  ;;  %v7165_v12 = vcombine.low %v2993_v60, %v2997_v22  ;;  %v7270_v13 = vcombine.high %v3097_v36, %v3101_v18 }
 0x4b3   :  { %6368 = vmatpush1.bf16.msra.mxu0 %v7069_v30  ;;  %v7158_v20 = vcombine.high %v2985_v3, %v2989_v6  ;;  %v2849_v21 = vld [vmem:[#allocation13 + $0x418] sm:$0xff]  ;;  %v7157_v17 = vcombine.low %v2985_v3, %v2989_v6 }
 0x4b4   :  { %6409 = vmatpush1.bf16.msra.mxu1 %v7197_v34  ;;  %v6076_v46 = vpop.f32.mrf.mxu0  ;;  %v6117_v7 = vpop.f32.mrf.mxu1  ;;  %6369 = vmatprep.subr.bf16.mxu0 %v7062_v35  ;;  %v2853_v24 = vld [vmem:[#allocation13 + $0x438] sm:$0xff] }
 0x4b5   :  { %6410 = vmatprep.subr.bf16.mxu1 %v7190_v16  ;;  %v2977_v50 = vld [vmem:[#allocation13 + $0x818] sm:$0xff]  ;;  %v7022_v30 = vcombine.high %v2849_v21, %v2853_v24  ;;  %v7021_v42 = vcombine.low %v2849_v21, %v2853_v24 }
 0x4b6   :  { %v7150_v34 = vcombine.high %v2977_v50, %v2981_v26  ;;  %v2969_v35 = vld [vmem:[#allocation13 + $0x7d8] sm:$0xff]  ;;  %v7149_v39 = vcombine.low %v2977_v50, %v2981_v26 }
 0x4b7   :  { %6370 = vmatpush1.bf16.msra.mxu0 %v7061_v31  ;;  %v2973_v16 = vld [vmem:[#allocation13 + $0x7f8] sm:$0xff] }
 0x4b8   :  { %6411 = vmatpush1.bf16.msra.mxu1 %v7189_v29  ;;  %6371 = vmatprep.subr.bf16.mxu0 %v7054_v41  ;;  %v7142_v40 = vcombine.high %v2969_v35, %v2973_v16  ;;  %v2961_v31 = vld [vmem:[#allocation13 + $0x798] sm:$0xff]  ;;  %v7141_v41 = vcombine.low %v2969_v35, %v2973_v16 }
 0x4b9   :  { %6412 = vmatprep.subr.bf16.mxu1 %v7182_v43  ;;  %v2965_v46 = vld [vmem:[#allocation13 + $0x7b8] sm:$0xff]  ;;  %v7269_v43 = vcombine.low %v3097_v36, %v3101_v18 }
 0x4ba   :  { %v3089_v7 = vld [vmem:[#allocation13 + $0xb98] sm:$0xff]  ;;  %v7134_v48 = vcombine.high %v2961_v31, %v2965_v46 }
 0x4bb   :  { %6372 = vmatpush1.bf16.msra.mxu0 %v7053_v54  ;;  %v3093_v29 = vld [vmem:[#allocation13 + $0xbb8] sm:$0xff] }
 0x4bc   :  { %6413 = vmatpush1.bf16.msra.mxu1 %v7181_v56  ;;  %6373 = vmatprep.subr.bf16.mxu0 %v7046_v45  ;;  %v7262_v44 = vcombine.high %v3089_v7, %v3093_v29  ;;  %v2953_v47 = vld [vmem:[#allocation13 + $0x758] sm:$0xff]  ;;  %v7133_v45 = vcombine.low %v2961_v31, %v2965_v46 }
 0x4bd   :  { %6414 = vmatprep.subr.bf16.mxu1 %v7174_v57  ;;  %v2957_v49 = vld [vmem:[#allocation13 + $0x778] sm:$0xff]  ;;  %v7261_v57 = vcombine.low %v3089_v7, %v3093_v29 }
 0x4be   :  { %v3081_v54 = vld [vmem:[#allocation13 + $0xb58] sm:$0xff]  ;;  %v7126_v58 = vcombine.high %v2953_v47, %v2957_v49 }
 0x4bf   :  { %6374 = vmatpush1.bf16.msra.mxu0 %v7045_v27  ;;  %v3085_v56 = vld [vmem:[#allocation13 + $0xb78] sm:$0xff] }
 0x4c0   :  { %6415 = vmatpush1.bf16.msra.mxu1 %v7173_v61  ;;  %6375 = vmatprep.subr.bf16.mxu0 %v7038_v62  ;;  %v7254_v59 = vcombine.high %v3081_v54, %v3085_v56  ;;  %v2945_v60 = vld [vmem:[#allocation13 + $0x718] sm:$0xff]  ;;  %v7125_v62 = vcombine.low %v2953_v47, %v2957_v49  ;;  %v3247_v49 = vrot.slane %v7995_v23, %v7852_v52 }
 0x4c1   :  { %6416 = vmatprep.subr.bf16.mxu1 %v7166_v63  ;;  %v2949_v22 = vld [vmem:[#allocation13 + $0x738] sm:$0xff]  ;;  %v7253_v63 = vcombine.low %v3081_v54, %v3085_v56 }
 0x4c2   :  { %v3073_v27 = vld [vmem:[#allocation13 + $0xb18] sm:$0xff]  ;;  %v7118_v0 = vcombine.high %v2945_v60, %v2949_v22 }
 0x4c3   :  { %6376 = vmatpush1.bf16.msra.mxu0 %v7037_v8  ;;  %v3077_v61 = vld [vmem:[#allocation13 + $0xb38] sm:$0xff] }
 0x4c4   :  { %6417 = vmatpush1.bf16.msra.mxu1 %v7165_v12  ;;  %6377 = vmatprep.subr.bf16.mxu0 %v7030_v19  ;;  %v7246_v1 = vcombine.high %v3073_v27, %v3077_v61  ;;  %v2937_v3 = vld [vmem:[#allocation13 + $0x6d8] sm:$0xff]  ;;  %v7117_v19 = vcombine.low %v2945_v60, %v2949_v22  ;;  %v6033_v60 = vadd.f32 %v7985_v25, %v3247_v49 }
 0x4c5   :  { %6418 = vmatprep.subr.bf16.mxu1 %v7158_v20  ;;  %v2941_v6 = vld [vmem:[#allocation13 + $0x6f8] sm:$0xff]  ;;  %v7245_v20 = vcombine.low %v3073_v27, %v3077_v61 }
 0x4c6   :  { %v3065_v8 = vld [vmem:[#allocation13 + $0xad8] sm:$0xff]  ;;  %v7110_v21 = vcombine.high %v2937_v3, %v2941_v6  ;;  %v6074_v61 = vadd.f32 %v8003_v9, %v6033_v60 }
 0x4c7   :  { %6378 = vmatpush1.bf16.msra.mxu0 %v7029_v15  ;;  %v3069_v12 = vld [vmem:[#allocation13 + $0xaf8] sm:$0xff] }
 0x4c8   :  { %6419 = vmatpush1.bf16.msra.mxu1 %v7157_v17  ;;  %6379 = vmatprep.subr.bf16.mxu0 %v7022_v30  ;;  %v7238_v24 = vcombine.high %v3065_v8, %v3069_v12  ;;  %v2929_v50 = vld [vmem:[#allocation13 + $0x698] sm:$0xff]  ;;  %v7109_v30 = vcombine.low %v2937_v3, %v2941_v6  ;;  %v6115_v3 = vadd.f32 %v8005_v32, %v6074_v61 }
 0x4c9   :  { %6420 = vmatprep.subr.bf16.mxu1 %v7150_v34  ;;  %v2933_v26 = vld [vmem:[#allocation13 + $0x6b8] sm:$0xff]  ;;  %v7237_v34 = vcombine.low %v3065_v8, %v3069_v12 }
 0x4ca   :  { %v3057_v15 = vld [vmem:[#allocation13 + $0xa98] sm:$0xff]  ;;  %v7102_v35 = vcombine.high %v2929_v50, %v2933_v26 }
 0x4cb   :  { %6380 = vmatpush1.bf16.msra.mxu0 %v7021_v42  ;;  %v3061_v17 = vld [vmem:[#allocation13 + $0xab8] sm:$0xff] }
 0x4cc   :  { %6421 = vmatpush1.bf16.msra.mxu1 %v7149_v39  ;;  %6381 = vmatprep.subr.bf16.mxu0 %v7142_v40  ;;  %v7230_v16 = vcombine.high %v3057_v15, %v3061_v17  ;;  %v2921_v36 = vld [vmem:[#allocation13 + $0x658] sm:$0xff]  ;;  %v7101_v40 = vcombine.low %v2929_v50, %v2933_v26 }
 0x4cd   :  { %6422 = vmatprep.subr.bf16.mxu1 %v7270_v13  ;;  %v2925_v18 = vld [vmem:[#allocation13 + $0x678] sm:$0xff]  ;;  %v7229_v13 = vcombine.low %v3057_v15, %v3061_v17  ;;  %v7760_v17 = vmov 1983009808  }
 0x4ce   :  { %v3049_v42 = vld [vmem:[#allocation13 + $0xa58] sm:$0xff]  ;;  %v7094_v31 = vcombine.high %v2921_v36, %v2925_v18 }
 0x4cf   :  { %6382 = vmatpush2.bf16.msra.mxu0 %v7141_v41  ;;  %v3053_v39 = vld [vmem:[#allocation13 + $0xa78] sm:$0xff] }
 0x4d0   :  { %6423 = vmatpush2.bf16.msra.mxu1 %v7269_v43  ;;  %6383 = vmatprep.subr.bf16.mxu0 %v7134_v48  ;;  %v7222_v46 = vcombine.high %v3049_v42, %v3053_v39  ;;  %v2913_v7 = vld [vmem:[#allocation13 + $0x618] sm:$0xff]  ;;  %v7093_v48 = vcombine.low %v2921_v36, %v2925_v18 }
 0x4d1   :  { %6424 = vmatprep.subr.bf16.mxu1 %v7262_v44  ;;  %v2917_v29 = vld [vmem:[#allocation13 + $0x638] sm:$0xff]  ;;  %v7221_v44 = vcombine.low %v3049_v42, %v3053_v39 }
 0x4d2   :  { %v3041_v41 = vld [vmem:[#allocation13 + $0xa18] sm:$0xff]  ;;  %v7086_v47 = vcombine.high %v2913_v7, %v2917_v29 }
 0x4d3   :  { %6384 = vmatpush2.bf16.msra.mxu0 %v7133_v45  ;;  %v3045_v43 = vld [vmem:[#allocation13 + $0xa38] sm:$0xff] }
 0x4d4   :  { %6425 = vmatpush2.bf16.msra.mxu1 %v7261_v57  ;;  %6385 = vmatprep.subr.bf16.mxu0 %v7126_v58  ;;  %v7214_v54 = vcombine.high %v3041_v41, %v3045_v43  ;;  %v3161_v56 = vld [vmem:[#allocation13 + $0xdd8] sm:$0xff]  ;;  %v7085_v57 = vcombine.low %v2913_v7, %v2917_v29  ;;  %v7213_v58 = vcombine.low %v3041_v41, %v3045_v43 }
 0x4d5   :  { %6426 = vmatprep.subr.bf16.mxu1 %v7254_v59  ;;  %v3165_v45 = vld [vmem:[#allocation13 + $0xdf8] sm:$0xff] }
 0x4d6   :  { %v7334_v59 = vcombine.high %v3161_v56, %v3165_v45  ;;  %v3153_v22 = vld [vmem:[#allocation13 + $0xd98] sm:$0xff] }
 0x4d7   :  { %6386 = vmatpush2.bf16.msra.mxu0 %v7125_v62  ;;  %v3157_v27 = vld [vmem:[#allocation13 + $0xdb8] sm:$0xff]  ;;  %v7333_v62 = vcombine.low %v3161_v56, %v3165_v45 }
 0x4d8   :  { %6427 = vmatpush2.bf16.msra.mxu1 %v7253_v63  ;;  %6387 = vmatprep.subr.bf16.mxu0 %v7118_v0  ;;  %v7326_v52 = vcombine.high %v3153_v22, %v3157_v27  ;;  %v3145_v63 = vld [vmem:[#allocation13 + $0xd58] sm:$0xff]  ;;  %v7325_v9 = vcombine.low %v3153_v22, %v3157_v27 }
 0x4d9   :  { %6428 = vmatprep.subr.bf16.mxu1 %v7246_v1  ;;  %v3149_v0 = vld [vmem:[#allocation13 + $0xd78] sm:$0xff] }
 0x4da   :  { %v7318_v12 = vcombine.high %v3145_v63, %v3149_v0  ;;  %v3129_v15 = vld [vmem:[#allocation13 + $0xcd8] sm:$0xff] }
 0x4db   :  { %6388 = vmatpush2.bf16.msra.mxu0 %v7117_v19  ;;  %v3125_v36 = vld [vmem:[#allocation13 + $0xcb8] sm:$0xff] }
 0x4dc   :  { %6429 = vmatpush2.bf16.msra.mxu1 %v7245_v20  ;;  %6389 = vmatprep.subr.bf16.mxu0 %v7110_v21  ;;  %v3137_v21 = vld [vmem:[#allocation13 + $0xd18] sm:$0xff] }
 0x4dd   :  { %6430 = vmatprep.subr.bf16.mxu1 %v7238_v24  ;;  %v7317_v24 = vcombine.low %v3145_v63, %v3149_v0  ;;  %v3217_v22 = vld [vmem:[#allocation13 + $0xf98] sm:$0xff] }
 0x4de   :  { %v3209_v27 = vld [vmem:[#allocation13 + $0xf58] sm:$0xff] }
 0x4df   :  { %6390 = vmatpush2.bf16.msra.mxu0 %v7109_v30  ;;  %v6507_v30 = vunpack.c.l.s4 %v7760_v17  ;;  %v3213_v61 = vld [vmem:[#allocation13 + $0xf78] sm:$0xff] }
 0x4e0   :  { %6431 = vmatpush2.bf16.msra.mxu1 %v7237_v34  ;;  %6391 = vmatprep.subr.bf16.mxu0 %v7102_v35  ;;  %v3201_v63 = vld [vmem:[#allocation13 + $0xf18] sm:$0xff] }
 0x4e1   :  { %6432 = vmatprep.subr.bf16.mxu1 %v7230_v16  ;;  %v3121_v16 = vld [vmem:[#allocation13 + $0xc98] sm:$0xff]  ;;  %v6508_v18 = vunpack.c.0.s8 %v6507_v30 }
 0x4e2   :  { %v7294_v39 = vcombine.high %v3121_v16, %v3125_v36  ;;  %v7293_v7 = vcombine.low %v3121_v16, %v3125_v36  ;;  %v3205_v0 = vld [vmem:[#allocation13 + $0xf38] sm:$0xff] }
 0x4e3   :  { %6392 = vmatpush2.bf16.msra.mxu0 %v7101_v40  ;;  %v3113_v40 = vld [vmem:[#allocation13 + $0xc58] sm:$0xff] }
 0x4e4   :  { %6433 = vmatpush2.bf16.msra.mxu1 %v7229_v13  ;;  %6393 = vmatprep.subr.bf16.mxu0 %v7094_v31  ;;  %v3117_v13 = vld [vmem:[#allocation13 + $0xc78] sm:$0xff] }
 0x4e5   :  { %6434 = vmatprep.subr.bf16.mxu1 %v7222_v46  ;;  %v8024_v46 = vsub.s32 %v6508_v18, %v7838_v28  ;;  %v7286_v41 = vcombine.high %v3113_v40, %v3117_v13 }
 0x4e7   :  { %6394 = vmatpush2.bf16.msra.mxu0 %v7093_v48  ;;  %v3105_v48 = vld [vmem:[#allocation13 + $0xc18] sm:$0xff] }
 0x4e8   :  { %6435 = vmatpush2.bf16.msra.mxu1 %v7221_v44  ;;  %6395 = vmatprep.subr.bf16.mxu0 %v7086_v47  ;;  %v3109_v44 = vld [vmem:[#allocation13 + $0xc38] sm:$0xff]  ;;  %v6512_v47 = vrot.slane %v6504_v11, %v8024_v46  ;;  %v7390_v11 = vcombine.high %v3217_v22, %v3221_v2 }
 0x4e9   :  { %6436 = vmatprep.subr.bf16.mxu1 %v7214_v54  ;;  %v7285_v54 = vcombine.low %v3113_v40, %v3117_v13  ;;  %v7278_v56 = vcombine.high %v3105_v48, %v3109_v44 }
 0x4eb   :  { %6396 = vmatpush2.bf16.msra.mxu0 %v7085_v57  ;;  %v3225_v57 = vld [vmem:[#allocation13 + $0xfd8] sm:$0xff] }
 0x4ec   :  { %6437 = vmatpush2.bf16.msra.mxu1 %v7213_v58  ;;  %6447 = vmatprep.subr.bf16.mxu0 %v7334_v59  ;;  %v3229_v58 = vld [vmem:[#allocation13 + $0xff8] sm:$0xff]  ;;  %v7277_v59 = vcombine.low %v3105_v48, %v3109_v44 }
 0x4ed   :  { %v7398_v60 = vcombine.high %v3225_v57, %v3229_v58  ;;  %v7397_v5 = vcombine.low %v3225_v57, %v3229_v58 }
 0x4ee   :  { %v6153_v1 = vpop.f32.mrf.mxu0  ;;  %6398 = vmatmul.mubr.bf16.vlgmr.msra.gmra.mxu0 %v7914_v14  ;;  %v3141_v14 = vld [vmem:[#allocation13 + $0xd38] sm:$0xff] }
 0x4ef   :  { %v6154_v6 = vadd.f32 %v6153_v1, %v8007_v33  ;;  %v8017_v25 = vpop.f32.mrf.mxu1  ;;  %6439 = vmatmul.mubr.bf16.vlgmr.msra.gmra.mxu1 %v7936_v51  ;;  %6448 = vmatpush1.bf16.msra.mxu0 %v7333_v62  ;;  %v7310_v51 = vcombine.high %v3137_v21, %v3141_v14  ;;  %v7309_v34 = vcombine.low %v3137_v21, %v3141_v14  ;;  %v3189_v21 = vld [vmem:[#allocation13 + $0xeb8] sm:$0xff] }
 0x4f0   :  { %6479 = vmatprep.mubr.bf16.mxu0 %v7947_v37  ;;  %v6155_v8 = vpop.f32.mrf.mxu0  ;;  %6449 = vmatprep.subr.bf16.mxu0 %v7326_v52  ;;  %v3133_v37 = vld [vmem:[#allocation13 + $0xcf8] sm:$0xff]  ;;  %v7389_v62 = vcombine.low %v3217_v22, %v3221_v2  ;;  %v7382_v52 = vcombine.high %v3209_v27, %v3213_v61  ;;  %v7381_v1 = vcombine.low %v3209_v27, %v3213_v61 }
 0x4f1   :  { %v6156_v19 = vadd.f32 %v6155_v8, %v6115_v3  ;;  %v8021_v20 = vpop.f32.mrf.mxu1  ;;  %7540 = vtanh.f32 %v6154_v6  ;;  %v7302_v35 = vcombine.high %v3129_v15, %v3133_v37  ;;  %v7301_v42 = vcombine.low %v3129_v15, %v3133_v37  ;;  %v3193_v6 = vld [vmem:[#allocation13 + $0xed8] sm:$0xff] }
 0x4f2   :  { %v6157_v32 = vpop.f32.mrf.mxu0  ;;  %v7374_v3 = vcombine.high %v3201_v63, %v3205_v0  ;;  %v7373_v8 = vcombine.low %v3201_v63, %v3205_v0  ;;  %v3173_v15 = vld [vmem:[#allocation13 + $0xe38] sm:$0xff]  ;;  %v3263_v63 = vrot.slane %v7995_v23, %v1084_v55 }
 0x4f3   :  { %7542 = vtanh.f32 %v6156_v19  ;;  %v6198_v33 = vpop.f32.mrf.mxu1  ;;  %6450 = vmatpush1.bf16.msra.mxu0 %v7325_v9  ;;  %v3197_v9 = vld [vmem:[#allocation13 + $0xef8] sm:$0xff] }
 0x4f4   :  { %v6158_v50 = vpop.f32.mrf.mxu0  ;;  %6451 = vmatprep.subr.bf16.mxu0 %v7318_v12  ;;  %v7366_v12 = vcombine.high %v3193_v6, %v3197_v9  ;;  %v3185_v19 = vld [vmem:[#allocation13 + $0xe98] sm:$0xff]  ;;  %v7365_v14 = vcombine.low %v3193_v6, %v3197_v9 }
 0x4f5   :  { %v6199_v26 = vpop.f32.mrf.mxu1  ;;  %v7358_v32 = vcombine.high %v3185_v19, %v3189_v21  ;;  %v3177_v33 = vld [vmem:[#allocation13 + $0xe58] sm:$0xff]  ;;  %v7357_v50 = vcombine.low %v3185_v19, %v3189_v21 }
 0x4f6   :  { %v3169_v26 = vld [vmem:[#allocation13 + $0xe18] sm:$0xff] }
 0x4f7   :  { %6452 = vmatpush1.bf16.msra.mxu0 %v7317_v24  ;;  %v3181_v24 = vld [vmem:[#allocation13 + $0xe78] sm:$0xff]  ;;  %v7342_v17 = vcombine.high %v3169_v26, %v3173_v15  ;;  %v7341_v30 = vcombine.low %v3169_v26, %v3173_v15 }
 0x4f8   :  { %6453 = vmatprep.subr.bf16.mxu0 %v7310_v51  ;;  %v7350_v51 = vcombine.high %v3177_v33, %v3181_v24  ;;  %v7349_v37 = vcombine.low %v3177_v33, %v3181_v24 }
 0x4fb   :  { %6454 = vmatpush1.bf16.msra.mxu0 %v7309_v34  ;;  %v3251_v34 = vrot.slane %v7995_v23, %v1072_v4 }
 0x4fc   :  { %6455 = vmatprep.subr.bf16.mxu0 %v7302_v35  ;;  %v3255_v35 = vrot.slane %v7995_v23, %v1076_v10 }
 0x4fd   :  { %v6195_v16 = vadd.f32 %v8017_v25, %v3251_v34 }
 0x4fe   :  { %v7541_v31 = vpop.eup %7540  ;;  %v6197_v18 = vadd.f32 %v8021_v20, %v3255_v35 }
 0x4ff   :  { %6456 = vmatpush1.bf16.msra.mxu0 %v7301_v42 }
 0x500   :  { %v7543_v29 = vpop.eup %7542  ;;  %6457 = vmatprep.subr.bf16.mxu0 %v7294_v39 }
 0x501   :  { %v6505_v43 = vcombine.low %v7541_v31, %v7543_v29 }
 0x503   :  { %v6519_v49 = vrot.slane %v6505_v43, %v8024_v46  ;;  %6458 = vmatpush1.bf16.msra.mxu0 %v7293_v7 }
 0x504   :  { %6459 = vmatprep.subr.bf16.mxu0 %v7286_v41 }
 0x505   :  { %v6520_v45 = vcombine.low %v6512_v47, %v6519_v49 }
 0x507   :  { %6540 = vst [vmem:[%s8063_s9] sm:$0xff] %v6520_v45  ;;  %6460 = vmatpush1.bf16.msra.mxu0 %v7285_v54 }
 0x508   :  { %6461 = vmatprep.subr.bf16.mxu0 %v7278_v56 }
 0x50b   :  { %6462 = vmatpush1.bf16.msra.mxu0 %v7277_v59 }
 0x50c   :  { %6463 = vmatprep.subr.bf16.mxu0 %v7398_v60 }
 0x50f   :  { %6464 = vmatpush2.bf16.msra.mxu0 %v7397_v5 }
 0x510   :  { %6465 = vmatprep.subr.bf16.mxu0 %v7390_v11 }
 0x513   :  { %6466 = vmatpush2.bf16.msra.mxu0 %v7389_v62 }
 0x514   :  { %6467 = vmatprep.subr.bf16.mxu0 %v7382_v52  ;;  %v3259_v52 = vrot.slane %v7995_v23, %v1080_v53 }
 0x517   :  { %6468 = vmatpush2.bf16.msra.mxu0 %v7381_v1 }
 0x518   :  { %6469 = vmatprep.subr.bf16.mxu0 %v7374_v3 }
 0x51b   :  { %6470 = vmatpush2.bf16.msra.mxu0 %v7373_v8 }
 0x51c   :  { %6471 = vmatprep.subr.bf16.mxu0 %v7366_v12 }
 0x51f   :  { %6472 = vmatpush2.bf16.msra.mxu0 %v7365_v14 }
 0x520   :  { %6473 = vmatprep.subr.bf16.mxu0 %v7358_v32 }
 0x523   :  { %6474 = vmatpush2.bf16.msra.mxu0 %v7357_v50 }
 0x524   :  { %6475 = vmatprep.subr.bf16.mxu0 %v7350_v51 }
 0x527   :  { %6476 = vmatpush2.bf16.msra.mxu0 %v7349_v37 }
 0x528   :  { %6477 = vmatprep.subr.bf16.mxu0 %v7342_v17 }
 0x52b   :  { %6478 = vmatpush2.bf16.msra.mxu0 %v7341_v30 }
 0x52e   :  { %v6235_v36 = vpop.f32.mrf.mxu0  ;;  %6480 = vmatmul.mubr.bf16.vlgmr.msra.gmra.mxu0 %v7949_v38 }
 0x52f   :  { %v6236_v42 = vadd.f32 %v6235_v36, %v6195_v16  ;;  %v6276_v39 = vpop.f32.mrf.mxu1 }
 0x530   :  { %v6237_v40 = vpop.f32.mrf.mxu0 }
 0x531   :  { %v6277_v13 = vadd.f32 %v6276_v39, %v6236_v42  ;;  %v6238_v31 = vadd.f32 %v6237_v40, %v6197_v18  ;;  %v6278_v7 = vpop.f32.mrf.mxu1 }
 0x532   :  { %v6239_v29 = vpop.f32.mrf.mxu0 }
 0x533   :  { %v6279_v4 = vadd.f32 %v6278_v7, %v6238_v31  ;;  %v6280_v41 = vpop.f32.mrf.mxu1 }
 0x534   :  { %v6240_v43 = vpop.f32.mrf.mxu0 }
 0x535   :  { %v6281_v48 = vpop.f32.mrf.mxu1 }
 0x56e   :  { %v6317_v10 = vpop.f32.mrf.mxu0 }
 0x56f   :  { %v6318_v44 = vadd.f32 %v6317_v10, %v6277_v13  ;;  %v6358_v47 = vpop.f32.mrf.mxu1 }
 0x570   :  { %v6319_v25 = vpop.f32.mrf.mxu0  ;;  %v6359_v0 = vadd.f32 %v6358_v47, %v3259_v52 }
 0x571   :  { %v6320_v49 = vadd.f32 %v6319_v25, %v6279_v4  ;;  %v6360_v54 = vpop.f32.mrf.mxu1  ;;  %7544 = vtanh.f32 %v6318_v44 }
 0x572   :  { %v6321_v38 = vpop.f32.mrf.mxu0  ;;  %v6361_v1 = vadd.f32 %v6360_v54, %v3263_v63 }
 0x573   :  { %7546 = vtanh.f32 %v6320_v49  ;;  %v6362_v20 = vpop.f32.mrf.mxu1 }
 0x574   :  { %v6322_v56 = vpop.f32.mrf.mxu0 }
 0x575   :  { %v6363_v45 = vpop.f32.mrf.mxu1 }
 0x57e   :  { %v7545_v57 = vpop.eup %7544 }
 0x580   :  { %v7547_v58 = vpop.eup %7546 }
 0x581   :  { %v6521_v59 = vcombine.low %v7545_v57, %v7547_v58 }
 0x583   :  { %v6529_v28 = vrot.slane %v6521_v59, %v8024_v46 }
 0x5ae   :  { %v6399_v60 = vpop.f32.mrf.mxu0 }
 0x5af   :  { %v6440_v22 = vpop.f32.mrf.mxu1  ;;  %v6400_v3 = vadd.f32 %v6399_v60, %v6359_v0 }
 0x5b0   :  { %v6401_v2 = vpop.f32.mrf.mxu0 }
 0x5b1   :  { %v6442_v5 = vpop.f32.mrf.mxu1  ;;  %v6402_v6 = vadd.f32 %v6401_v2, %v6361_v1  ;;  %v6441_v9 = vadd.f32 %v6440_v22, %v6400_v3 }
 0x5b2   :  { %v6403_v11 = vpop.f32.mrf.mxu0 }
 0x5b3   :  { %v6444_v27 = vpop.f32.mrf.mxu1  ;;  %v6443_v12 = vadd.f32 %v6442_v5, %v6402_v6 }
 0x5b4   :  { %v6404_v61 = vpop.f32.mrf.mxu0 }
 0x5b5   :  { %v6445_v62 = vpop.f32.mrf.mxu1 }
 0x5ee   :  { %v6481_v8 = vpop.f32.mrf.mxu0 }
 0x5ef   :  { %v6482_v19 = vadd.f32 %v6481_v8, %v6441_v9 }
 0x5f0   :  { %v6483_v21 = vpop.f32.mrf.mxu0 }
 0x5f1   :  { %v6484_v14 = vadd.f32 %v6483_v21, %v6443_v12  ;;  %7548 = vtanh.f32 %v6482_v19 }
 0x5f2   :  { %v6485_v32 = vpop.f32.mrf.mxu0 }
 0x5f3   :  { %7550 = vtanh.f32 %v6484_v14 }
 0x5f4   :  { %v6486_v33 = vpop.f32.mrf.mxu0 }
 0x5fe   :  { %v7549_v24 = vpop.eup %7548 }
 0x600   :  { %v7551_v53 = vpop.eup %7550 }
 0x601   :  { %v6522_v50 = vcombine.low %v7549_v24, %v7551_v53 }
 0x603   :  { %v6536_v55 = vrot.slane %v6522_v50, %v8024_v46 }
 0x605   :  { %v6537_v23 = vcombine.low %v6529_v28, %v6536_v55 }
 0x607   :  { %6541 = vst [vmem:[%s8063_s9 + $0x8] sm:$0xff] %v6537_v23 }
 0x608   :  { %6546 = vsyncpa [#allocation3], 1 }
 0x609   :  { %6547 = vsyncpa [#allocation5], 1 }
 0x60a   :  { %6548 = vsyncpa [#allocation8], 1 }
 0x60b   :  { %6549 = vsyncpa [#allocation11], 1 }
 0x60c   :  { %6550 = vsyncpa [#allocation14], 1 }

</bundles_post_ra>
